<compile_context>
chip_gen: v5e
topology: v5e:2x2
jax: 0.10.0
libtpu: 0.0.40
codegen_flags: <defaults>
</compile_context>

<pallas_src>
import functools

import numpy as np
import jax
import jax.numpy as jnp
from jax.experimental import pallas as pl
from jax.experimental.pallas import tpu as pltpu


# ----------------------------------------------------------------------------
# Fused forward kernel (gridless, everything VMEM/SMEM-resident)
# ----------------------------------------------------------------------------
def _fused_forward_kernel(
    # index tables (SMEM, int32)
    atom_ref, nbr_ref,
    # dense inputs (VMEM)
    node0_ref, edge0_ref, pool_ref,
    w1_ref, w2_ref, bn1_ref, bn2_ref,
    fw_ref, fbn_ref, lw_ref, lb_ref,
    # output
    out_ref,
    # VMEM scratch
    node_buf, n2e_buf, edge_buf, e2n_buf,
    *, num_layers, hidden_dim, mid_dim, num_nodes, num_edges, max_deg, dense_dim,
):
    H, MH, N, E, L, D = hidden_dim, mid_dim, num_nodes, num_edges, num_layers, dense_dim
    E2 = 2 * E
    f32, bf16 = jnp.float32, jnp.bfloat16
    eps = 1e-5

    def dot(a, b):
        # MXU operands in bf16 (native on v6e/v7x, fine on v5e), f32 accumulate.
        return jnp.dot(a.astype(bf16), b.astype(bf16), preferred_element_type=f32)

    def bn_relu(x, g, b):
        # BatchNorm1d (training mode, biased variance) + ReLU, single reduction pass.
        inv_n = 1.0 / x.shape[0]
        s1 = jnp.sum(x, axis=0, keepdims=True)
        s2 = jnp.sum(x * x, axis=0, keepdims=True)
        mu = s1 * inv_n
        var = jnp.maximum(s2 * inv_n - mu * mu, 0.0)
        return jnp.maximum((x - mu) * jax.lax.rsqrt(var + eps) * g + b, 0.0)

    def gather_nodes_to_atoms():
        # n2e_buf[r] = node_buf[atom[r]] : dynamic-row loads, static-row stores.
        for r in range(E2):
            idx = atom_ref[r]
            n2e_buf[r:r + 1, :] = node_buf[pl.ds(idx, 1), :]
        return n2e_buf[...]

    def scatter_atoms_to_nodes():
        # e2n_buf[n] = sum_{r: atom[r]==n} edge_buf[r] via reverse table
        # (padded with a sentinel index pointing at a zero row of edge_buf).
        for n in range(N):
            acc = jnp.zeros((1, H), f32)
            for k in range(max_deg):
                idx = nbr_ref[n * max_deg + k]
                acc = acc + edge_buf[pl.ds(idx, 1), :]
            e2n_buf[n:n + 1, :] = acc
        return e2n_buf[...]

    # ---- init ----
    edge_buf[...] = jnp.zeros_like(edge_buf)   # rows >= 2E stay zero (scatter sentinel)
    node_buf[...] = node0_ref[...]

    edge_feat0 = edge0_ref[...]                # [E, H]
    node_rep = node0_ref[...]                  # [N, H]
    edge_rep = None                            # layer 0 handled specially
    edge2node = None

    for l in range(L):                         # static unroll over layers
        w1 = w1_ref[l]                         # [5H, MH] rows: edge 3H, node 2H
        w2 = w2_ref[l]                         # [2MH, H] rows: edge MH, node MH
        eg1, eb1 = bn1_ref[l, 0:1, :], bn1_ref[l, 1:2, :]
        ng1, nb1 = bn1_ref[l, 2:3, :], bn1_ref[l, 3:4, :]
        eg2, eb2 = bn2_ref[l, 0:1, :], bn2_ref[l, 1:2, :]
        ng2, nb2 = bn2_ref[l, 2:3, :], bn2_ref[l, 3:4, :]

        # node -> edge-atom gather (ptensors0 -> order-1 edge atoms)
        node2edge = gather_nodes_to_atoms()                        # [2E, H]
        # linmaps order1->order1: identity + per-edge pair sum broadcast.
        # Partner of row i is row i±E in block layout -> one XLU sublane rotate.
        n2e_sum = node2edge + pltpu.roll(node2edge, shift=E, axis=0)

        # Edge MLP; the 3H-wide concat is folded into row-blocks of w1.
        if l == 0:
            # Layer-0 edge features are identical on both atom rows:
            # do the [E,H]x[H,MH] matmul once and duplicate the result.
            t = dot(edge_feat0, w1[0:H])
            term_e = jnp.concatenate([t, t], axis=0)               # [2E, MH]
        else:
            term_e = dot(edge_rep, w1[0:H])
        h = term_e + dot(node2edge, w1[H:2 * H]) + dot(n2e_sum, w1[2 * H:3 * H])
        h = bn_relu(h, eg1, eb1)
        edge_out = bn_relu(dot(h, w2[0:MH]), eg2, eb2)             # [2E, H]

        # edge-atom -> node scatter-add (order-1 -> ptensors0)
        edge_buf[0:E2, :] = edge_out
        edge2node = scatter_atoms_to_nodes()                       # [N, H]

        # Node MLP; the 2H-wide concat is folded into row-blocks of w1.
        h2 = dot(node_rep, w1[3 * H:4 * H]) + dot(edge2node, w1[4 * H:5 * H])
        h2 = bn_relu(h2, ng1, nb1)
        node_out = bn_relu(dot(h2, w2[MH:2 * MH]), ng2, nb2)       # [N, H]

        node_rep, edge_rep = node_out, edge_out
        node_buf[...] = node_rep                                   # for next gather

    # ---- readout: final edge->node gather == last layer's edge2node (reuse) ----
    pool = pool_ref[...]                                           # [B, N] 0/1 (sum pool)
    pooled_n = dot(pool, node_rep)                                 # [B, H]
    pooled_e = dot(pool, edge2node)                                # [B, H]

    fw = fw_ref[...]                                               # [2H+D, D]
    y = dot(pooled_n, fw[0:H]) + dot(pooled_e, fw[H:2 * H])
    y = bn_relu(y, fbn_ref[0:1, :], fbn_ref[1:2, :])
    y = bn_relu(dot(y, fw[2 * H:2 * H + D]), fbn_ref[2:3, :], fbn_ref[3:4, :])
    out_ref[...] = dot(y, lw_ref[...]) + lb_ref[...]


def model_forward(params, x_tokens, edge_attr_tokens, edge_index, batch, num_graphs):
    """Fused Pallas forward. Embeddings + index-table construction are host glue."""
    src = np.asarray(edge_index[0]).astype(np.int32)
    dst = np.asarray(edge_index[1]).astype(np.int32)
    n_nodes = int(x_tokens.shape[0])
    n_edges = int(src.shape[0])
    layers = params["conv_layers"]
    num_layers = len(layers)
    hidden_dim = params["node_emb"].shape[1]
    mid_dim = layers[0]["edge_mlp"][0].shape[1]
    dense_dim = params["final_mlp"][0].shape[1]
    out_dim = params["lin_w"].shape[1]

    # --- glue: embeddings, pooling indicator, index tables (loop-invariant) ---
    node_feat0 = params["node_emb"][x_tokens].astype(jnp.float32)            # [N, H]
    edge_feat0 = params["edge_emb"][edge_attr_tokens].astype(jnp.float32)    # [E, H]
    p_pool = (jnp.arange(num_graphs)[:, None] == batch[None, :]).astype(jnp.bfloat16)

    atom = np.concatenate([src, dst]).astype(np.int32)          # [2E] atom-row -> node id
    counts = np.bincount(atom, minlength=n_nodes)
    max_deg = max(int(counts.max()), 1)
    sentinel = 2 * n_edges                                      # points at a zero row
    nbr = np.full((n_nodes, max_deg), sentinel, dtype=np.int32) # node -> its atom rows
    fill = np.zeros(n_nodes, dtype=np.int64)
    for r, node in enumerate(atom):
        nbr[node, fill[node]] = r
        fill[node] += 1

    # --- pack per-layer weights into few stacked arrays; bf16 for MXU operands ---
    def cat(*xs):
        return jnp.concatenate(xs, axis=0)

    W1 = jnp.stack([cat(l["edge_mlp"][0], l["node_mlp"][0]) for l in layers], 0).astype(jnp.bfloat16)
    W2 = jnp.stack([cat(l["edge_mlp"][3], l["node_mlp"][3]) for l in layers], 0).astype(jnp.bfloat16)
    BN1 = jnp.stack([cat(l["edge_mlp"][1], l["edge_mlp"][2],
                         l["node_mlp"][1], l["node_mlp"][2]) for l in layers], 0)
    BN2 = jnp.stack([cat(l["edge_mlp"][4], l["edge_mlp"][5],
                         l["node_mlp"][4], l["node_mlp"][5]) for l in layers], 0)
    fm = params["final_mlp"]
    FW = cat(fm[0], fm[3]).astype(jnp.bfloat16)                 # [2H+D, D]
    FBN = cat(fm[1], fm[2], fm[4], fm[5])                       # [4, D]
    LINW = params["lin_w"].astype(jnp.bfloat16)
    LINB = params["lin_b"].astype(jnp.float32)

    inputs = [jnp.asarray(atom), jnp.asarray(nbr.reshape(-1)),
              node_feat0, edge_feat0, p_pool,
              W1, W2, BN1, BN2, FW, FBN, LINW, LINB]

    kernel = functools.partial(
        _fused_forward_kernel,
        num_layers=num_layers, hidden_dim=hidden_dim, mid_dim=mid_dim,
        num_nodes=n_nodes, num_edges=n_edges, max_deg=max_deg, dense_dim=dense_dim)

    in_specs = ([pl.BlockSpec(memory_space=pltpu.MemorySpace.SMEM) for _ in range(2)]
                + [pl.BlockSpec(memory_space=pltpu.MemorySpace.VMEM)
                   for _ in range(len(inputs) - 2)])

    return pl.pallas_call(
        kernel,
        out_shape=jax.ShapeDtypeStruct((num_graphs, out_dim), jnp.float32),
        in_specs=in_specs,
        out_specs=pl.BlockSpec(memory_space=pltpu.MemorySpace.VMEM),
        scratch_shapes=[
            pltpu.VMEM((n_nodes, hidden_dim), jnp.float32),          # node_buf
            pltpu.VMEM((2 * n_edges, hidden_dim), jnp.float32),      # n2e_buf
            pltpu.VMEM((2 * n_edges + 8, hidden_dim), jnp.float32),  # edge_buf (+ zero sentinel rows)
            pltpu.VMEM((n_nodes, hidden_dim), jnp.float32),          # e2n_buf
        ],
    )(*inputs)


# ----------------------------------------------------------------------------
# Pure-JAX reference (index-based gather/scatter, same bf16 MXU policy)
# ----------------------------------------------------------------------------
def _reference_forward(params, x_tokens, edge_attr_tokens, edge_index, batch, num_graphs):
    eps = 1e-5
    bf16 = jnp.bfloat16

    def dot(a, b):
        return jnp.dot(a.astype(bf16), b.astype(bf16), preferred_element_type=jnp.float32)

    def bn_relu(x, g, b):
        n = x.shape[0]
        mu = jnp.sum(x, axis=0, keepdims=True) / n
        var = jnp.maximum(jnp.sum(x * x, axis=0, keepdims=True) / n - mu * mu, 0.0)
        return jnp.maximum((x - mu) * jax.lax.rsqrt(var + eps) * g + b, 0.0)

    def mlp(x, w1, g1, b1, w2, g2, b2):
        return bn_relu(dot(bn_relu(dot(x, w1), g1, b1), w2), g2, b2)

    src, dst = edge_index[0], edge_index[1]
    n_nodes = x_tokens.shape[0]
    n_edges = src.shape[0]
    atom = jnp.concatenate([src, dst], axis=0)

    node_rep = params["node_emb"][x_tokens].astype(jnp.float32)
    edge_feat0 = params["edge_emb"][edge_attr_tokens].astype(jnp.float32)
    edge_rep = jnp.concatenate([edge_feat0, edge_feat0], axis=0)

    for layer in params["conv_layers"]:
        node2edge = node_rep[atom]
        pair = node2edge[:n_edges] + node2edge[n_edges:]
        n2e_sum = jnp.concatenate([pair, pair], axis=0)
        edge_in = jnp.concatenate([edge_rep, node2edge, n2e_sum], axis=-1)
        edge_out = mlp(edge_in, *layer["edge_mlp"])
        edge2node = jnp.zeros((n_nodes, edge_out.shape[1]), jnp.float32).at[atom].add(edge_out)
        node_in = jnp.concatenate([node_rep, edge2node], axis=-1)
        node_out = mlp(node_in, *layer["node_mlp"])
        node_rep, edge_rep = node_out, edge_out

    edge2node = jnp.zeros((n_nodes, edge_rep.shape[1]), jnp.float32).at[atom].add(edge_rep)
    seg = (jnp.arange(num_graphs)[:, None] == batch[None, :]).astype(jnp.float32)
    pooled = jnp.concatenate([dot(seg, node_rep), dot(seg, edge2node)], axis=-1)
    pooled = mlp(pooled, *params["final_mlp"])
    return dot(pooled, params["lin_w"]) + params["lin_b"]


# ----------------------------------------------------------------------------
# Deterministic parameter init
# ----------------------------------------------------------------------------
def init_params(key, hidden_dim, dense_dim, out_dim, num_layers,
                num_node_types, num_edge_types):
    mult = 2  # _inner_mlp_mult

    def dense(k, din, dout):
        return (jax.random.normal(k, (din, dout), jnp.float32) / jnp.sqrt(din)).astype(jnp.float32)

    def bn(k, d):
        kg, kb = jax.random.split(k)
        g = 1.0 + 0.1 * jax.random.normal(kg, (1, d), jnp.float32)
        b = 0.1 * jax.random.normal(kb, (1, d), jnp.float32)
        return g, b

    def mlp(k, din, dh, dout):
        k1, k2, k3, k4 = jax.random.split(k, 4)
        w1 = dense(k1, din, dh)
        g1, b1 = bn(k2, dh)
        w2 = dense(k3, dh, dout)
        g2, b2 = bn(k4, dout)
        return (w1, g1, b1, w2, g2, b2)

    keys = jax.random.split(key, 5 + num_layers)
    params = {
        "node_emb": jax.random.normal(keys[0], (num_node_types, hidden_dim), jnp.float32),
        "edge_emb": jax.random.normal(keys[1], (num_edge_types, hidden_dim), jnp.float32),
        "conv_layers": [],
        "final_mlp": mlp(keys[2], 2 * hidden_dim, dense_dim, dense_dim),
        "lin_w": dense(keys[3], dense_dim, out_dim),
        "lin_b": 0.1 * jax.random.normal(keys[4], (1, out_dim), jnp.float32),
    }
    for li in range(num_layers):
        ke, kn = jax.random.split(keys[5 + li])
        params["conv_layers"].append({
            "edge_mlp": mlp(ke, 3 * hidden_dim, mult * hidden_dim, hidden_dim),
            "node_mlp": mlp(kn, 2 * hidden_dim, mult * hidden_dim, hidden_dim),
        })
    return params


# ----------------------------------------------------------------------------
# Main
# ----------------------------------------------------------------------------
if __name__ == "__main__":
    hidden_dim, dense_dim, out_dim, num_layers = 32, 64, 8, 2
    num_node_types, num_edge_types = 5, 3

    key = jax.random.PRNGKey(0)
    kp, kx, ke = jax.random.split(key, 3)
    params = init_params(kp, hidden_dim, dense_dim, out_dim, num_layers,
                         num_node_types, num_edge_types)

    # Two 4-node ring graphs (directed edges both ways): N=8, E=16, B=2.
    def ring_edges(offset):
        und = [(0, 1), (1, 2), (2, 3), (3, 0)]
        e = []
        for a, b in und:
            e.append((a + offset, b + offset))
            e.append((b + offset, a + offset))
        return e

    edges = ring_edges(0) + ring_edges(4)
    edge_index = jnp.array(edges, dtype=jnp.int32).T                 # [2, 16]
    num_nodes, num_edges, num_graphs = 8, edge_index.shape[1], 2
    x_tokens = jax.random.randint(kx, (num_nodes,), 0, num_node_types)          # data.x.flatten()
    edge_attr_tokens = jax.random.randint(ke, (num_edges,), 0, num_edge_types)  # data.edge_attr.flatten()
    batch = jnp.array([0, 0, 0, 0, 1, 1, 1, 1], dtype=jnp.int32)

    out = model_forward(params, x_tokens, edge_attr_tokens, edge_index, batch, num_graphs)
    out = jax.block_until_ready(out)

    # Sanity check vs pure-JAX reference (same bf16 MXU policy -> tight tolerance).
    ref = _reference_forward(params, x_tokens, edge_attr_tokens, edge_index, batch, num_graphs)
    ref = jax.block_until_ready(ref)
    assert out.shape == (num_graphs, out_dim)
    max_err = float(jnp.max(jnp.abs(out - ref)))
    assert max_err < 2e-2, f"Pallas output mismatch vs reference (max abs err {max_err:.3e})"

    print("KERNEL_OK")
</pallas_src>

<mosaic_0001>
module attributes {stable_mosaic.version = 11 : i64} {
  func.func @_fused_forward_kernel(%arg0: memref<32xi32, #tpu.memory_space<smem>>, %arg1: memref<32xi32, #tpu.memory_space<smem>>, %arg2: memref<8x32xf32, #tpu.memory_space<vmem>>, %arg3: memref<16x32xf32, #tpu.memory_space<vmem>>, %arg4: memref<2x8xbf16, #tpu.memory_space<vmem>>, %arg5: memref<2x160x64xbf16, #tpu.memory_space<vmem>>, %arg6: memref<2x128x32xbf16, #tpu.memory_space<vmem>>, %arg7: memref<2x4x64xf32, #tpu.memory_space<vmem>>, %arg8: memref<2x4x32xf32, #tpu.memory_space<vmem>>, %arg9: memref<128x64xbf16, #tpu.memory_space<vmem>>, %arg10: memref<4x64xf32, #tpu.memory_space<vmem>>, %arg11: memref<64x8xbf16, #tpu.memory_space<vmem>>, %arg12: memref<1x8xf32, #tpu.memory_space<vmem>>, %arg13: memref<2x8xf32, #tpu.memory_space<vmem>>, %arg14: memref<8x32xf32, #tpu.memory_space<vmem>>, %arg15: memref<32x32xf32, #tpu.memory_space<vmem>>, %arg16: memref<40x32xf32, #tpu.memory_space<vmem>>, %arg17: memref<8x32xf32, #tpu.memory_space<vmem>>) attributes {dimension_semantics = [], scalar_prefetch = 0 : i64, scratch_operands = 4 : i64, tpu.core_type = #tpu.core_type<tc>} {
    %cst = arith.constant 0.000000e+00 : f32
    %0 = vector.broadcast %cst : f32 to vector<40x32xf32>
    %c0 = arith.constant 0 : index
    %c0_0 = arith.constant 0 : index
    %1 = vector.load %arg16[%c0, %c0_0] : memref<40x32xf32, #tpu.memory_space<vmem>>, vector<40x32xf32>
    tpu.vector_store %arg16[%c0, %c0_0], %0 {strides = array<i32>} : memref<40x32xf32, #tpu.memory_space<vmem>>, vector<40x32xf32>,
    %c0_1 = arith.constant 0 : index
    %c0_2 = arith.constant 0 : index
    %2 = vector.load %arg2[%c0_1, %c0_2] : memref<8x32xf32, #tpu.memory_space<vmem>>, vector<8x32xf32>
    %c0_3 = arith.constant 0 : index
    %c0_4 = arith.constant 0 : index
    %3 = vector.load %arg14[%c0_3, %c0_4] : memref<8x32xf32, #tpu.memory_space<vmem>>, vector<8x32xf32>
    tpu.vector_store %arg14[%c0_3, %c0_4], %2 {strides = array<i32>} : memref<8x32xf32, #tpu.memory_space<vmem>>, vector<8x32xf32>,
    %c0_5 = arith.constant 0 : index
    %c0_6 = arith.constant 0 : index
    %4 = vector.load %arg3[%c0_5, %c0_6] : memref<16x32xf32, #tpu.memory_space<vmem>>, vector<16x32xf32>
    %c0_7 = arith.constant 0 : index
    %c0_8 = arith.constant 0 : index
    %5 = vector.load %arg2[%c0_7, %c0_8] : memref<8x32xf32, #tpu.memory_space<vmem>>, vector<8x32xf32>
    %c0_9 = arith.constant 0 : index
    %c0_10 = arith.constant 0 : index
    %c0_11 = arith.constant 0 : index
    %6 = vector.load %arg5[%c0_9, %c0_10, %c0_11] : memref<2x160x64xbf16, #tpu.memory_space<vmem>>, vector<1x160x64xbf16>
    %7 = vector.shape_cast %6 : vector<1x160x64xbf16> to vector<160x64xbf16>
    %c0_12 = arith.constant 0 : index
    %c0_13 = arith.constant 0 : index
    %c0_14 = arith.constant 0 : index
    %8 = vector.load %arg6[%c0_12, %c0_13, %c0_14] : memref<2x128x32xbf16, #tpu.memory_space<vmem>>, vector<1x128x32xbf16>
    %9 = vector.shape_cast %8 : vector<1x128x32xbf16> to vector<128x32xbf16>
    %c0_15 = arith.constant 0 : index
    %c0_16 = arith.constant 0 : index
    %c0_17 = arith.constant 0 : index
    %10 = vector.load %arg7[%c0_15, %c0_16, %c0_17] : memref<2x4x64xf32, #tpu.memory_space<vmem>>, vector<1x1x64xf32>
    %11 = vector.shape_cast %10 : vector<1x1x64xf32> to vector<1x64xf32>
    %c0_18 = arith.constant 0 : index
    %c1 = arith.constant 1 : index
    %c0_19 = arith.constant 0 : index
    %12 = vector.load %arg7[%c0_18, %c1, %c0_19] : memref<2x4x64xf32, #tpu.memory_space<vmem>>, vector<1x1x64xf32>
    %13 = vector.shape_cast %12 : vector<1x1x64xf32> to vector<1x64xf32>
    %c0_20 = arith.constant 0 : index
    %c2 = arith.constant 2 : index
    %c0_21 = arith.constant 0 : index
    %14 = vector.load %arg7[%c0_20, %c2, %c0_21] : memref<2x4x64xf32, #tpu.memory_space<vmem>>, vector<1x1x64xf32>
    %15 = vector.shape_cast %14 : vector<1x1x64xf32> to vector<1x64xf32>
    %c0_22 = arith.constant 0 : index
    %c3 = arith.constant 3 : index
    %c0_23 = arith.constant 0 : index
    %16 = vector.load %arg7[%c0_22, %c3, %c0_23] : memref<2x4x64xf32, #tpu.memory_space<vmem>>, vector<1x1x64xf32>
    %17 = vector.shape_cast %16 : vector<1x1x64xf32> to vector<1x64xf32>
    %c0_24 = arith.constant 0 : index
    %c0_25 = arith.constant 0 : index
    %c0_26 = arith.constant 0 : index
    %18 = vector.load %arg8[%c0_24, %c0_25, %c0_26] : memref<2x4x32xf32, #tpu.memory_space<vmem>>, vector<1x1x32xf32>
    %19 = vector.shape_cast %18 : vector<1x1x32xf32> to vector<1x32xf32>
    %c0_27 = arith.constant 0 : index
    %c1_28 = arith.constant 1 : index
    %c0_29 = arith.constant 0 : index
    %20 = vector.load %arg8[%c0_27, %c1_28, %c0_29] : memref<2x4x32xf32, #tpu.memory_space<vmem>>, vector<1x1x32xf32>
    %21 = vector.shape_cast %20 : vector<1x1x32xf32> to vector<1x32xf32>
    %c0_30 = arith.constant 0 : index
    %c2_31 = arith.constant 2 : index
    %c0_32 = arith.constant 0 : index
    %22 = vector.load %arg8[%c0_30, %c2_31, %c0_32] : memref<2x4x32xf32, #tpu.memory_space<vmem>>, vector<1x1x32xf32>
    %23 = vector.shape_cast %22 : vector<1x1x32xf32> to vector<1x32xf32>
    %c0_33 = arith.constant 0 : index
    %c3_34 = arith.constant 3 : index
    %c0_35 = arith.constant 0 : index
    %24 = vector.load %arg8[%c0_33, %c3_34, %c0_35] : memref<2x4x32xf32, #tpu.memory_space<vmem>>, vector<1x1x32xf32>
    %25 = vector.shape_cast %24 : vector<1x1x32xf32> to vector<1x32xf32>
    %c0_36 = arith.constant 0 : index
    %26 = memref.load %arg0[%c0_36] : memref<32xi32, #tpu.memory_space<smem>>
    %27 = arith.index_cast %26 : i32 to index
    %c0_37 = arith.constant 0 : index
    %28 = vector.load %arg14[%27, %c0_37] : memref<8x32xf32, #tpu.memory_space<vmem>>, vector<1x32xf32>
    %c0_38 = arith.constant 0 : index
    %c0_39 = arith.constant 0 : index
    %29 = vector.load %arg15[%c0_38, %c0_39] : memref<32x32xf32, #tpu.memory_space<vmem>>, vector<1x32xf32>
    tpu.vector_store %arg15[%c0_38, %c0_39], %28 {strides = array<i32>} : memref<32x32xf32, #tpu.memory_space<vmem>>, vector<1x32xf32>,
    %c1_40 = arith.constant 1 : index
    %30 = memref.load %arg0[%c1_40] : memref<32xi32, #tpu.memory_space<smem>>
    %31 = arith.index_cast %30 : i32 to index
    %c0_41 = arith.constant 0 : index
    %32 = vector.load %arg14[%31, %c0_41] : memref<8x32xf32, #tpu.memory_space<vmem>>, vector<1x32xf32>
    %c1_42 = arith.constant 1 : index
    %c0_43 = arith.constant 0 : index
    %33 = vector.load %arg15[%c1_42, %c0_43] : memref<32x32xf32, #tpu.memory_space<vmem>>, vector<1x32xf32>
    tpu.vector_store %arg15[%c1_42, %c0_43], %32 {strides = array<i32>} : memref<32x32xf32, #tpu.memory_space<vmem>>, vector<1x32xf32>,
    %c2_44 = arith.constant 2 : index
    %34 = memref.load %arg0[%c2_44] : memref<32xi32, #tpu.memory_space<smem>>
    %35 = arith.index_cast %34 : i32 to index
    %c0_45 = arith.constant 0 : index
    %36 = vector.load %arg14[%35, %c0_45] : memref<8x32xf32, #tpu.memory_space<vmem>>, vector<1x32xf32>
    %c2_46 = arith.constant 2 : index
    %c0_47 = arith.constant 0 : index
    %37 = vector.load %arg15[%c2_46, %c0_47] : memref<32x32xf32, #tpu.memory_space<vmem>>, vector<1x32xf32>
    tpu.vector_store %arg15[%c2_46, %c0_47], %36 {strides = array<i32>} : memref<32x32xf32, #tpu.memory_space<vmem>>, vector<1x32xf32>,
    %c3_48 = arith.constant 3 : index
    %38 = memref.load %arg0[%c3_48] : memref<32xi32, #tpu.memory_space<smem>>
    %39 = arith.index_cast %38 : i32 to index
    %c0_49 = arith.constant 0 : index
    %40 = vector.load %arg14[%39, %c0_49] : memref<8x32xf32, #tpu.memory_space<vmem>>, vector<1x32xf32>
    %c3_50 = arith.constant 3 : index
    %c0_51 = arith.constant 0 : index
    %41 = vector.load %arg15[%c3_50, %c0_51] : memref<32x32xf32, #tpu.memory_space<vmem>>, vector<1x32xf32>
    tpu.vector_store %arg15[%c3_50, %c0_51], %40 {strides = array<i32>} : memref<32x32xf32, #tpu.memory_space<vmem>>, vector<1x32xf32>,
    %c4 = arith.constant 4 : index
    %42 = memref.load %arg0[%c4] : memref<32xi32, #tpu.memory_space<smem>>
    %43 = arith.index_cast %42 : i32 to index
    %c0_52 = arith.constant 0 : index
    %44 = vector.load %arg14[%43, %c0_52] : memref<8x32xf32, #tpu.memory_space<vmem>>, vector<1x32xf32>
    %c4_53 = arith.constant 4 : index
    %c0_54 = arith.constant 0 : index
    %45 = vector.load %arg15[%c4_53, %c0_54] : memref<32x32xf32, #tpu.memory_space<vmem>>, vector<1x32xf32>
    tpu.vector_store %arg15[%c4_53, %c0_54], %44 {strides = array<i32>} : memref<32x32xf32, #tpu.memory_space<vmem>>, vector<1x32xf32>,
    %c5 = arith.constant 5 : index
    %46 = memref.load %arg0[%c5] : memref<32xi32, #tpu.memory_space<smem>>
    %47 = arith.index_cast %46 : i32 to index
    %c0_55 = arith.constant 0 : index
    %48 = vector.load %arg14[%47, %c0_55] : memref<8x32xf32, #tpu.memory_space<vmem>>, vector<1x32xf32>
    %c5_56 = arith.constant 5 : index
    %c0_57 = arith.constant 0 : index
    %49 = vector.load %arg15[%c5_56, %c0_57] : memref<32x32xf32, #tpu.memory_space<vmem>>, vector<1x32xf32>
    tpu.vector_store %arg15[%c5_56, %c0_57], %48 {strides = array<i32>} : memref<32x32xf32, #tpu.memory_space<vmem>>, vector<1x32xf32>,
    %c6 = arith.constant 6 : index
    %50 = memref.load %arg0[%c6] : memref<32xi32, #tpu.memory_space<smem>>
    %51 = arith.index_cast %50 : i32 to index
    %c0_58 = arith.constant 0 : index
    %52 = vector.load %arg14[%51, %c0_58] : memref<8x32xf32, #tpu.memory_space<vmem>>, vector<1x32xf32>
    %c6_59 = arith.constant 6 : index
    %c0_60 = arith.constant 0 : index
    %53 = vector.load %arg15[%c6_59, %c0_60] : memref<32x32xf32, #tpu.memory_space<vmem>>, vector<1x32xf32>
    tpu.vector_store %arg15[%c6_59, %c0_60], %52 {strides = array<i32>} : memref<32x32xf32, #tpu.memory_space<vmem>>, vector<1x32xf32>,
    %c7 = arith.constant 7 : index
    %54 = memref.load %arg0[%c7] : memref<32xi32, #tpu.memory_space<smem>>
    %55 = arith.index_cast %54 : i32 to index
    %c0_61 = arith.constant 0 : index
    %56 = vector.load %arg14[%55, %c0_61] : memref<8x32xf32, #tpu.memory_space<vmem>>, vector<1x32xf32>
    %c7_62 = arith.constant 7 : index
    %c0_63 = arith.constant 0 : index
    %57 = vector.load %arg15[%c7_62, %c0_63] : memref<32x32xf32, #tpu.memory_space<vmem>>, vector<1x32xf32>
    tpu.vector_store %arg15[%c7_62, %c0_63], %56 {strides = array<i32>} : memref<32x32xf32, #tpu.memory_space<vmem>>, vector<1x32xf32>,
    %c8 = arith.constant 8 : index
    %58 = memref.load %arg0[%c8] : memref<32xi32, #tpu.memory_space<smem>>
    %59 = arith.index_cast %58 : i32 to index
    %c0_64 = arith.constant 0 : index
    %60 = vector.load %arg14[%59, %c0_64] : memref<8x32xf32, #tpu.memory_space<vmem>>, vector<1x32xf32>
    %c8_65 = arith.constant 8 : index
    %c0_66 = arith.constant 0 : index
    %61 = vector.load %arg15[%c8_65, %c0_66] : memref<32x32xf32, #tpu.memory_space<vmem>>, vector<1x32xf32>
    tpu.vector_store %arg15[%c8_65, %c0_66], %60 {strides = array<i32>} : memref<32x32xf32, #tpu.memory_space<vmem>>, vector<1x32xf32>,
    %c9 = arith.constant 9 : index
    %62 = memref.load %arg0[%c9] : memref<32xi32, #tpu.memory_space<smem>>
    %63 = arith.index_cast %62 : i32 to index
    %c0_67 = arith.constant 0 : index
    %64 = vector.load %arg14[%63, %c0_67] : memref<8x32xf32, #tpu.memory_space<vmem>>, vector<1x32xf32>
    %c9_68 = arith.constant 9 : index
    %c0_69 = arith.constant 0 : index
    %65 = vector.load %arg15[%c9_68, %c0_69] : memref<32x32xf32, #tpu.memory_space<vmem>>, vector<1x32xf32>
    tpu.vector_store %arg15[%c9_68, %c0_69], %64 {strides = array<i32>} : memref<32x32xf32, #tpu.memory_space<vmem>>, vector<1x32xf32>,
    %c10 = arith.constant 10 : index
    %66 = memref.load %arg0[%c10] : memref<32xi32, #tpu.memory_space<smem>>
    %67 = arith.index_cast %66 : i32 to index
    %c0_70 = arith.constant 0 : index
    %68 = vector.load %arg14[%67, %c0_70] : memref<8x32xf32, #tpu.memory_space<vmem>>, vector<1x32xf32>
    %c10_71 = arith.constant 10 : index
    %c0_72 = arith.constant 0 : index
    %69 = vector.load %arg15[%c10_71, %c0_72] : memref<32x32xf32, #tpu.memory_space<vmem>>, vector<1x32xf32>
    tpu.vector_store %arg15[%c10_71, %c0_72], %68 {strides = array<i32>} : memref<32x32xf32, #tpu.memory_space<vmem>>, vector<1x32xf32>,
    %c11 = arith.constant 11 : index
    %70 = memref.load %arg0[%c11] : memref<32xi32, #tpu.memory_space<smem>>
    %71 = arith.index_cast %70 : i32 to index
    %c0_73 = arith.constant 0 : index
    %72 = vector.load %arg14[%71, %c0_73] : memref<8x32xf32, #tpu.memory_space<vmem>>, vector<1x32xf32>
    %c11_74 = arith.constant 11 : index
    %c0_75 = arith.constant 0 : index
    %73 = vector.load %arg15[%c11_74, %c0_75] : memref<32x32xf32, #tpu.memory_space<vmem>>, vector<1x32xf32>
    tpu.vector_store %arg15[%c11_74, %c0_75], %72 {strides = array<i32>} : memref<32x32xf32, #tpu.memory_space<vmem>>, vector<1x32xf32>,
    %c12 = arith.constant 12 : index
    %74 = memref.load %arg0[%c12] : memref<32xi32, #tpu.memory_space<smem>>
    %75 = arith.index_cast %74 : i32 to index
    %c0_76 = arith.constant 0 : index
    %76 = vector.load %arg14[%75, %c0_76] : memref<8x32xf32, #tpu.memory_space<vmem>>, vector<1x32xf32>
    %c12_77 = arith.constant 12 : index
    %c0_78 = arith.constant 0 : index
    %77 = vector.load %arg15[%c12_77, %c0_78] : memref<32x32xf32, #tpu.memory_space<vmem>>, vector<1x32xf32>
    tpu.vector_store %arg15[%c12_77, %c0_78], %76 {strides = array<i32>} : memref<32x32xf32, #tpu.memory_space<vmem>>, vector<1x32xf32>,
    %c13 = arith.constant 13 : index
    %78 = memref.load %arg0[%c13] : memref<32xi32, #tpu.memory_space<smem>>
    %79 = arith.index_cast %78 : i32 to index
    %c0_79 = arith.constant 0 : index
    %80 = vector.load %arg14[%79, %c0_79] : memref<8x32xf32, #tpu.memory_space<vmem>>, vector<1x32xf32>
    %c13_80 = arith.constant 13 : index
    %c0_81 = arith.constant 0 : index
    %81 = vector.load %arg15[%c13_80, %c0_81] : memref<32x32xf32, #tpu.memory_space<vmem>>, vector<1x32xf32>
    tpu.vector_store %arg15[%c13_80, %c0_81], %80 {strides = array<i32>} : memref<32x32xf32, #tpu.memory_space<vmem>>, vector<1x32xf32>,
    %c14 = arith.constant 14 : index
    %82 = memref.load %arg0[%c14] : memref<32xi32, #tpu.memory_space<smem>>
    %83 = arith.index_cast %82 : i32 to index
    %c0_82 = arith.constant 0 : index
    %84 = vector.load %arg14[%83, %c0_82] : memref<8x32xf32, #tpu.memory_space<vmem>>, vector<1x32xf32>
    %c14_83 = arith.constant 14 : index
    %c0_84 = arith.constant 0 : index
    %85 = vector.load %arg15[%c14_83, %c0_84] : memref<32x32xf32, #tpu.memory_space<vmem>>, vector<1x32xf32>
    tpu.vector_store %arg15[%c14_83, %c0_84], %84 {strides = array<i32>} : memref<32x32xf32, #tpu.memory_space<vmem>>, vector<1x32xf32>,
    %c15 = arith.constant 15 : index
    %86 = memref.load %arg0[%c15] : memref<32xi32, #tpu.memory_space<smem>>
    %87 = arith.index_cast %86 : i32 to index
    %c0_85 = arith.constant 0 : index
    %88 = vector.load %arg14[%87, %c0_85] : memref<8x32xf32, #tpu.memory_space<vmem>>, vector<1x32xf32>
    %c15_86 = arith.constant 15 : index
    %c0_87 = arith.constant 0 : index
    %89 = vector.load %arg15[%c15_86, %c0_87] : memref<32x32xf32, #tpu.memory_space<vmem>>, vector<1x32xf32>
    tpu.vector_store %arg15[%c15_86, %c0_87], %88 {strides = array<i32>} : memref<32x32xf32, #tpu.memory_space<vmem>>, vector<1x32xf32>,
    %c16 = arith.constant 16 : index
    %90 = memref.load %arg0[%c16] : memref<32xi32, #tpu.memory_space<smem>>
    %91 = arith.index_cast %90 : i32 to index
    %c0_88 = arith.constant 0 : index
    %92 = vector.load %arg14[%91, %c0_88] : memref<8x32xf32, #tpu.memory_space<vmem>>, vector<1x32xf32>
    %c16_89 = arith.constant 16 : index
    %c0_90 = arith.constant 0 : index
    %93 = vector.load %arg15[%c16_89, %c0_90] : memref<32x32xf32, #tpu.memory_space<vmem>>, vector<1x32xf32>
    tpu.vector_store %arg15[%c16_89, %c0_90], %92 {strides = array<i32>} : memref<32x32xf32, #tpu.memory_space<vmem>>, vector<1x32xf32>,
    %c17 = arith.constant 17 : index
    %94 = memref.load %arg0[%c17] : memref<32xi32, #tpu.memory_space<smem>>
    %95 = arith.index_cast %94 : i32 to index
    %c0_91 = arith.constant 0 : index
    %96 = vector.load %arg14[%95, %c0_91] : memref<8x32xf32, #tpu.memory_space<vmem>>, vector<1x32xf32>
    %c17_92 = arith.constant 17 : index
    %c0_93 = arith.constant 0 : index
    %97 = vector.load %arg15[%c17_92, %c0_93] : memref<32x32xf32, #tpu.memory_space<vmem>>, vector<1x32xf32>
    tpu.vector_store %arg15[%c17_92, %c0_93], %96 {strides = array<i32>} : memref<32x32xf32, #tpu.memory_space<vmem>>, vector<1x32xf32>,
    %c18 = arith.constant 18 : index
    %98 = memref.load %arg0[%c18] : memref<32xi32, #tpu.memory_space<smem>>
    %99 = arith.index_cast %98 : i32 to index
    %c0_94 = arith.constant 0 : index
    %100 = vector.load %arg14[%99, %c0_94] : memref<8x32xf32, #tpu.memory_space<vmem>>, vector<1x32xf32>
    %c18_95 = arith.constant 18 : index
    %c0_96 = arith.constant 0 : index
    %101 = vector.load %arg15[%c18_95, %c0_96] : memref<32x32xf32, #tpu.memory_space<vmem>>, vector<1x32xf32>
    tpu.vector_store %arg15[%c18_95, %c0_96], %100 {strides = array<i32>} : memref<32x32xf32, #tpu.memory_space<vmem>>, vector<1x32xf32>,
    %c19 = arith.constant 19 : index
    %102 = memref.load %arg0[%c19] : memref<32xi32, #tpu.memory_space<smem>>
    %103 = arith.index_cast %102 : i32 to index
    %c0_97 = arith.constant 0 : index
    %104 = vector.load %arg14[%103, %c0_97] : memref<8x32xf32, #tpu.memory_space<vmem>>, vector<1x32xf32>
    %c19_98 = arith.constant 19 : index
    %c0_99 = arith.constant 0 : index
    %105 = vector.load %arg15[%c19_98, %c0_99] : memref<32x32xf32, #tpu.memory_space<vmem>>, vector<1x32xf32>
    tpu.vector_store %arg15[%c19_98, %c0_99], %104 {strides = array<i32>} : memref<32x32xf32, #tpu.memory_space<vmem>>, vector<1x32xf32>,
    %c20 = arith.constant 20 : index
    %106 = memref.load %arg0[%c20] : memref<32xi32, #tpu.memory_space<smem>>
    %107 = arith.index_cast %106 : i32 to index
    %c0_100 = arith.constant 0 : index
    %108 = vector.load %arg14[%107, %c0_100] : memref<8x32xf32, #tpu.memory_space<vmem>>, vector<1x32xf32>
    %c20_101 = arith.constant 20 : index
    %c0_102 = arith.constant 0 : index
    %109 = vector.load %arg15[%c20_101, %c0_102] : memref<32x32xf32, #tpu.memory_space<vmem>>, vector<1x32xf32>
    tpu.vector_store %arg15[%c20_101, %c0_102], %108 {strides = array<i32>} : memref<32x32xf32, #tpu.memory_space<vmem>>, vector<1x32xf32>,
    %c21 = arith.constant 21 : index
    %110 = memref.load %arg0[%c21] : memref<32xi32, #tpu.memory_space<smem>>
    %111 = arith.index_cast %110 : i32 to index
    %c0_103 = arith.constant 0 : index
    %112 = vector.load %arg14[%111, %c0_103] : memref<8x32xf32, #tpu.memory_space<vmem>>, vector<1x32xf32>
    %c21_104 = arith.constant 21 : index
    %c0_105 = arith.constant 0 : index
    %113 = vector.load %arg15[%c21_104, %c0_105] : memref<32x32xf32, #tpu.memory_space<vmem>>, vector<1x32xf32>
    tpu.vector_store %arg15[%c21_104, %c0_105], %112 {strides = array<i32>} : memref<32x32xf32, #tpu.memory_space<vmem>>, vector<1x32xf32>,
    %c22 = arith.constant 22 : index
    %114 = memref.load %arg0[%c22] : memref<32xi32, #tpu.memory_space<smem>>
    %115 = arith.index_cast %114 : i32 to index
    %c0_106 = arith.constant 0 : index
    %116 = vector.load %arg14[%115, %c0_106] : memref<8x32xf32, #tpu.memory_space<vmem>>, vector<1x32xf32>
    %c22_107 = arith.constant 22 : index
    %c0_108 = arith.constant 0 : index
    %117 = vector.load %arg15[%c22_107, %c0_108] : memref<32x32xf32, #tpu.memory_space<vmem>>, vector<1x32xf32>
    tpu.vector_store %arg15[%c22_107, %c0_108], %116 {strides = array<i32>} : memref<32x32xf32, #tpu.memory_space<vmem>>, vector<1x32xf32>,
    %c23 = arith.constant 23 : index
    %118 = memref.load %arg0[%c23] : memref<32xi32, #tpu.memory_space<smem>>
    %119 = arith.index_cast %118 : i32 to index
    %c0_109 = arith.constant 0 : index
    %120 = vector.load %arg14[%119, %c0_109] : memref<8x32xf32, #tpu.memory_space<vmem>>, vector<1x32xf32>
    %c23_110 = arith.constant 23 : index
    %c0_111 = arith.constant 0 : index
    %121 = vector.load %arg15[%c23_110, %c0_111] : memref<32x32xf32, #tpu.memory_space<vmem>>, vector<1x32xf32>
    tpu.vector_store %arg15[%c23_110, %c0_111], %120 {strides = array<i32>} : memref<32x32xf32, #tpu.memory_space<vmem>>, vector<1x32xf32>,
    %c24 = arith.constant 24 : index
    %122 = memref.load %arg0[%c24] : memref<32xi32, #tpu.memory_space<smem>>
    %123 = arith.index_cast %122 : i32 to index
    %c0_112 = arith.constant 0 : index
    %124 = vector.load %arg14[%123, %c0_112] : memref<8x32xf32, #tpu.memory_space<vmem>>, vector<1x32xf32>
    %c24_113 = arith.constant 24 : index
    %c0_114 = arith.constant 0 : index
    %125 = vector.load %arg15[%c24_113, %c0_114] : memref<32x32xf32, #tpu.memory_space<vmem>>, vector<1x32xf32>
    tpu.vector_store %arg15[%c24_113, %c0_114], %124 {strides = array<i32>} : memref<32x32xf32, #tpu.memory_space<vmem>>, vector<1x32xf32>,
    %c25 = arith.constant 25 : index
    %126 = memref.load %arg0[%c25] : memref<32xi32, #tpu.memory_space<smem>>
    %127 = arith.index_cast %126 : i32 to index
    %c0_115 = arith.constant 0 : index
    %128 = vector.load %arg14[%127, %c0_115] : memref<8x32xf32, #tpu.memory_space<vmem>>, vector<1x32xf32>
    %c25_116 = arith.constant 25 : index
    %c0_117 = arith.constant 0 : index
    %129 = vector.load %arg15[%c25_116, %c0_117] : memref<32x32xf32, #tpu.memory_space<vmem>>, vector<1x32xf32>
    tpu.vector_store %arg15[%c25_116, %c0_117], %128 {strides = array<i32>} : memref<32x32xf32, #tpu.memory_space<vmem>>, vector<1x32xf32>,
    %c26 = arith.constant 26 : index
    %130 = memref.load %arg0[%c26] : memref<32xi32, #tpu.memory_space<smem>>
    %131 = arith.index_cast %130 : i32 to index
    %c0_118 = arith.constant 0 : index
    %132 = vector.load %arg14[%131, %c0_118] : memref<8x32xf32, #tpu.memory_space<vmem>>, vector<1x32xf32>
    %c26_119 = arith.constant 26 : index
    %c0_120 = arith.constant 0 : index
    %133 = vector.load %arg15[%c26_119, %c0_120] : memref<32x32xf32, #tpu.memory_space<vmem>>, vector<1x32xf32>
    tpu.vector_store %arg15[%c26_119, %c0_120], %132 {strides = array<i32>} : memref<32x32xf32, #tpu.memory_space<vmem>>, vector<1x32xf32>,
    %c27 = arith.constant 27 : index
    %134 = memref.load %arg0[%c27] : memref<32xi32, #tpu.memory_space<smem>>
    %135 = arith.index_cast %134 : i32 to index
    %c0_121 = arith.constant 0 : index
    %136 = vector.load %arg14[%135, %c0_121] : memref<8x32xf32, #tpu.memory_space<vmem>>, vector<1x32xf32>
    %c27_122 = arith.constant 27 : index
    %c0_123 = arith.constant 0 : index
    %137 = vector.load %arg15[%c27_122, %c0_123] : memref<32x32xf32, #tpu.memory_space<vmem>>, vector<1x32xf32>
    tpu.vector_store %arg15[%c27_122, %c0_123], %136 {strides = array<i32>} : memref<32x32xf32, #tpu.memory_space<vmem>>, vector<1x32xf32>,
    %c28 = arith.constant 28 : index
    %138 = memref.load %arg0[%c28] : memref<32xi32, #tpu.memory_space<smem>>
    %139 = arith.index_cast %138 : i32 to index
    %c0_124 = arith.constant 0 : index
    %140 = vector.load %arg14[%139, %c0_124] : memref<8x32xf32, #tpu.memory_space<vmem>>, vector<1x32xf32>
    %c28_125 = arith.constant 28 : index
    %c0_126 = arith.constant 0 : index
    %141 = vector.load %arg15[%c28_125, %c0_126] : memref<32x32xf32, #tpu.memory_space<vmem>>, vector<1x32xf32>
    tpu.vector_store %arg15[%c28_125, %c0_126], %140 {strides = array<i32>} : memref<32x32xf32, #tpu.memory_space<vmem>>, vector<1x32xf32>,
    %c29 = arith.constant 29 : index
    %142 = memref.load %arg0[%c29] : memref<32xi32, #tpu.memory_space<smem>>
    %143 = arith.index_cast %142 : i32 to index
    %c0_127 = arith.constant 0 : index
    %144 = vector.load %arg14[%143, %c0_127] : memref<8x32xf32, #tpu.memory_space<vmem>>, vector<1x32xf32>
    %c29_128 = arith.constant 29 : index
    %c0_129 = arith.constant 0 : index
    %145 = vector.load %arg15[%c29_128, %c0_129] : memref<32x32xf32, #tpu.memory_space<vmem>>, vector<1x32xf32>
    tpu.vector_store %arg15[%c29_128, %c0_129], %144 {strides = array<i32>} : memref<32x32xf32, #tpu.memory_space<vmem>>, vector<1x32xf32>,
    %c30 = arith.constant 30 : index
    %146 = memref.load %arg0[%c30] : memref<32xi32, #tpu.memory_space<smem>>
    %147 = arith.index_cast %146 : i32 to index
    %c0_130 = arith.constant 0 : index
    %148 = vector.load %arg14[%147, %c0_130] : memref<8x32xf32, #tpu.memory_space<vmem>>, vector<1x32xf32>
    %c30_131 = arith.constant 30 : index
    %c0_132 = arith.constant 0 : index
    %149 = vector.load %arg15[%c30_131, %c0_132] : memref<32x32xf32, #tpu.memory_space<vmem>>, vector<1x32xf32>
    tpu.vector_store %arg15[%c30_131, %c0_132], %148 {strides = array<i32>} : memref<32x32xf32, #tpu.memory_space<vmem>>, vector<1x32xf32>,
    %c31 = arith.constant 31 : index
    %150 = memref.load %arg0[%c31] : memref<32xi32, #tpu.memory_space<smem>>
    %151 = arith.index_cast %150 : i32 to index
    %c0_133 = arith.constant 0 : index
    %152 = vector.load %arg14[%151, %c0_133] : memref<8x32xf32, #tpu.memory_space<vmem>>, vector<1x32xf32>
    %c31_134 = arith.constant 31 : index
    %c0_135 = arith.constant 0 : index
    %153 = vector.load %arg15[%c31_134, %c0_135] : memref<32x32xf32, #tpu.memory_space<vmem>>, vector<1x32xf32>
    tpu.vector_store %arg15[%c31_134, %c0_135], %152 {strides = array<i32>} : memref<32x32xf32, #tpu.memory_space<vmem>>, vector<1x32xf32>,
    %c0_136 = arith.constant 0 : index
    %c0_137 = arith.constant 0 : index
    %154 = vector.load %arg15[%c0_136, %c0_137] : memref<32x32xf32, #tpu.memory_space<vmem>>, vector<32x32xf32>
    %c16_i32 = arith.constant 16 : i32
    %155 = tpu.dynamic_rotate %154 by %c16_i32 dim 0 : vector<32x32xf32>, i32 -> vector<32x32xf32>
    %156 = arith.addf %154, %155 : vector<32x32xf32>
    %157 = vector.extract_strided_slice %7 {offsets = [0, 0], sizes = [32, 64], strides = [1, 1]} : vector<160x64xbf16> to vector<32x64xbf16>
    %158 = arith.truncf %4 : vector<16x32xf32> to vector<16x32xbf16>
    %cst_138 = arith.constant dense<0.000000e+00> : vector<16x64xf32>
    %159 = tpu.matmul %158, %157, %cst_138 {dimension_numbers = #tpu.dot_dimension_numbers<[1], [0], [0], [1], [0, 0, 1, 1], [], []>} : vector<16x32xbf16>, vector<32x64xbf16>, vector<16x64xf32> -> vector<16x64xf32>
    %160 = tpu.concatenate %159, %159 in 0 : vector<16x64xf32>, vector<16x64xf32> -> vector<32x64xf32>
    %161 = vector.extract_strided_slice %7 {offsets = [32, 0], sizes = [32, 64], strides = [1, 1]} : vector<160x64xbf16> to vector<32x64xbf16>
    %162 = arith.truncf %154 : vector<32x32xf32> to vector<32x32xbf16>
    %cst_139 = arith.constant dense<0.000000e+00> : vector<32x64xf32>
    %163 = tpu.matmul %162, %161, %cst_139 {dimension_numbers = #tpu.dot_dimension_numbers<[1], [0], [0], [1], [0, 0, 1, 1], [], []>} : vector<32x32xbf16>, vector<32x64xbf16>, vector<32x64xf32> -> vector<32x64xf32>
    %164 = arith.addf %160, %163 : vector<32x64xf32>
    %165 = vector.extract_strided_slice %7 {offsets = [64, 0], sizes = [32, 64], strides = [1, 1]} : vector<160x64xbf16> to vector<32x64xbf16>
    %166 = arith.truncf %156 : vector<32x32xf32> to vector<32x32xbf16>
    %cst_140 = arith.constant dense<0.000000e+00> : vector<32x64xf32>
    %167 = tpu.matmul %166, %165, %cst_140 {dimension_numbers = #tpu.dot_dimension_numbers<[1], [0], [0], [1], [0, 0, 1, 1], [], []>} : vector<32x32xbf16>, vector<32x64xbf16>, vector<32x64xf32> -> vector<32x64xf32>
    %168 = arith.addf %164, %167 : vector<32x64xf32>
    %cst_141 = arith.constant dense<0.000000e+00> : vector<64xf32>
    %169 = vector.multi_reduction <add>, %168, %cst_141 [0] : vector<32x64xf32> to vector<64xf32>
    %170 = vector.shape_cast %169 : vector<64xf32> to vector<1x64xf32>
    %171 = arith.mulf %168, %168 : vector<32x64xf32>
    %cst_142 = arith.constant dense<0.000000e+00> : vector<64xf32>
    %172 = vector.multi_reduction <add>, %171, %cst_142 [0] : vector<32x64xf32> to vector<64xf32>
    %173 = vector.shape_cast %172 : vector<64xf32> to vector<1x64xf32>
    %cst_143 = arith.constant 3.125000e-02 : f32
    %174 = vector.broadcast %cst_143 : f32 to vector<1x64xf32>
    %175 = arith.mulf %170, %174 : vector<1x64xf32>
    %cst_144 = arith.constant 3.125000e-02 : f32
    %176 = vector.broadcast %cst_144 : f32 to vector<1x64xf32>
    %177 = arith.mulf %173, %176 : vector<1x64xf32>
    %178 = arith.mulf %175, %175 : vector<1x64xf32>
    %179 = arith.subf %177, %178 : vector<1x64xf32>
    %cst_145 = arith.constant 0.000000e+00 : f32
    %180 = vector.broadcast %cst_145 : f32 to vector<1x64xf32>
    %181 = arith.maximumf %179, %180 : vector<1x64xf32>
    %182 = vector.broadcast %175 : vector<1x64xf32> to vector<32x64xf32>
    %183 = arith.subf %168, %182 : vector<32x64xf32>
    %cst_146 = arith.constant 9.99999974E-6 : f32
    %184 = vector.broadcast %cst_146 : f32 to vector<1x64xf32>
    %185 = arith.addf %181, %184 : vector<1x64xf32>
    %186 = math.rsqrt %185 : vector<1x64xf32>
    %187 = vector.broadcast %186 : vector<1x64xf32> to vector<32x64xf32>
    %188 = arith.mulf %183, %187 : vector<32x64xf32>
    %189 = vector.broadcast %11 : vector<1x64xf32> to vector<32x64xf32>
    %190 = arith.mulf %188, %189 : vector<32x64xf32>
    %191 = vector.broadcast %13 : vector<1x64xf32> to vector<32x64xf32>
    %192 = arith.addf %190, %191 : vector<32x64xf32>
    %cst_147 = arith.constant 0.000000e+00 : f32
    %193 = vector.broadcast %cst_147 : f32 to vector<32x64xf32>
    %194 = arith.maximumf %192, %193 : vector<32x64xf32>
    %195 = vector.extract_strided_slice %9 {offsets = [0, 0], sizes = [64, 32], strides = [1, 1]} : vector<128x32xbf16> to vector<64x32xbf16>
    %196 = arith.truncf %194 : vector<32x64xf32> to vector<32x64xbf16>
    %cst_148 = arith.constant dense<0.000000e+00> : vector<32x32xf32>
    %197 = tpu.matmul %196, %195, %cst_148 {dimension_numbers = #tpu.dot_dimension_numbers<[1], [0], [0], [1], [0, 0, 1, 1], [], []>} : vector<32x64xbf16>, vector<64x32xbf16>, vector<32x32xf32> -> vector<32x32xf32>
    %cst_149 = arith.constant dense<0.000000e+00> : vector<32xf32>
    %198 = vector.multi_reduction <add>, %197, %cst_149 [0] : vector<32x32xf32> to vector<32xf32>
    %199 = vector.shape_cast %198 : vector<32xf32> to vector<1x32xf32>
    %200 = arith.mulf %197, %197 : vector<32x32xf32>
    %cst_150 = arith.constant dense<0.000000e+00> : vector<32xf32>
    %201 = vector.multi_reduction <add>, %200, %cst_150 [0] : vector<32x32xf32> to vector<32xf32>
    %202 = vector.shape_cast %201 : vector<32xf32> to vector<1x32xf32>
    %cst_151 = arith.constant 3.125000e-02 : f32
    %203 = vector.broadcast %cst_151 : f32 to vector<1x32xf32>
    %204 = arith.mulf %199, %203 : vector<1x32xf32>
    %cst_152 = arith.constant 3.125000e-02 : f32
    %205 = vector.broadcast %cst_152 : f32 to vector<1x32xf32>
    %206 = arith.mulf %202, %205 : vector<1x32xf32>
    %207 = arith.mulf %204, %204 : vector<1x32xf32>
    %208 = arith.subf %206, %207 : vector<1x32xf32>
    %cst_153 = arith.constant 0.000000e+00 : f32
    %209 = vector.broadcast %cst_153 : f32 to vector<1x32xf32>
    %210 = arith.maximumf %208, %209 : vector<1x32xf32>
    %211 = vector.broadcast %204 : vector<1x32xf32> to vector<32x32xf32>
    %212 = arith.subf %197, %211 : vector<32x32xf32>
    %cst_154 = arith.constant 9.99999974E-6 : f32
    %213 = vector.broadcast %cst_154 : f32 to vector<1x32xf32>
    %214 = arith.addf %210, %213 : vector<1x32xf32>
    %215 = math.rsqrt %214 : vector<1x32xf32>
    %216 = vector.broadcast %215 : vector<1x32xf32> to vector<32x32xf32>
    %217 = arith.mulf %212, %216 : vector<32x32xf32>
    %218 = vector.broadcast %19 : vector<1x32xf32> to vector<32x32xf32>
    %219 = arith.mulf %217, %218 : vector<32x32xf32>
    %220 = vector.broadcast %21 : vector<1x32xf32> to vector<32x32xf32>
    %221 = arith.addf %219, %220 : vector<32x32xf32>
    %cst_155 = arith.constant 0.000000e+00 : f32
    %222 = vector.broadcast %cst_155 : f32 to vector<32x32xf32>
    %223 = arith.maximumf %221, %222 : vector<32x32xf32>
    %c0_156 = arith.constant 0 : index
    %c0_157 = arith.constant 0 : index
    %224 = vector.load %arg16[%c0_156, %c0_157] : memref<40x32xf32, #tpu.memory_space<vmem>>, vector<32x32xf32>
    tpu.vector_store %arg16[%c0_156, %c0_157], %223 {strides = array<i32>} : memref<40x32xf32, #tpu.memory_space<vmem>>, vector<32x32xf32>,
    %cst_158 = arith.constant 0.000000e+00 : f32
    %225 = vector.broadcast %cst_158 : f32 to vector<1x32xf32>
    %c0_159 = arith.constant 0 : index
    %226 = memref.load %arg1[%c0_159] : memref<32xi32, #tpu.memory_space<smem>>
    %227 = arith.index_cast %226 : i32 to index
    %c0_160 = arith.constant 0 : index
    %228 = vector.load %arg16[%227, %c0_160] : memref<40x32xf32, #tpu.memory_space<vmem>>, vector<1x32xf32>
    %229 = arith.addf %225, %228 : vector<1x32xf32>
    %c1_161 = arith.constant 1 : index
    %230 = memref.load %arg1[%c1_161] : memref<32xi32, #tpu.memory_space<smem>>
    %231 = arith.index_cast %230 : i32 to index
    %c0_162 = arith.constant 0 : index
    %232 = vector.load %arg16[%231, %c0_162] : memref<40x32xf32, #tpu.memory_space<vmem>>, vector<1x32xf32>
    %233 = arith.addf %229, %232 : vector<1x32xf32>
    %c2_163 = arith.constant 2 : index
    %234 = memref.load %arg1[%c2_163] : memref<32xi32, #tpu.memory_space<smem>>
    %235 = arith.index_cast %234 : i32 to index
    %c0_164 = arith.constant 0 : index
    %236 = vector.load %arg16[%235, %c0_164] : memref<40x32xf32, #tpu.memory_space<vmem>>, vector<1x32xf32>
    %237 = arith.addf %233, %236 : vector<1x32xf32>
    %c3_165 = arith.constant 3 : index
    %238 = memref.load %arg1[%c3_165] : memref<32xi32, #tpu.memory_space<smem>>
    %239 = arith.index_cast %238 : i32 to index
    %c0_166 = arith.constant 0 : index
    %240 = vector.load %arg16[%239, %c0_166] : memref<40x32xf32, #tpu.memory_space<vmem>>, vector<1x32xf32>
    %241 = arith.addf %237, %240 : vector<1x32xf32>
    %c0_167 = arith.constant 0 : index
    %c0_168 = arith.constant 0 : index
    %242 = vector.load %arg17[%c0_167, %c0_168] : memref<8x32xf32, #tpu.memory_space<vmem>>, vector<1x32xf32>
    tpu.vector_store %arg17[%c0_167, %c0_168], %241 {strides = array<i32>} : memref<8x32xf32, #tpu.memory_space<vmem>>, vector<1x32xf32>,
    %cst_169 = arith.constant 0.000000e+00 : f32
    %243 = vector.broadcast %cst_169 : f32 to vector<1x32xf32>
    %c4_170 = arith.constant 4 : index
    %244 = memref.load %arg1[%c4_170] : memref<32xi32, #tpu.memory_space<smem>>
    %245 = arith.index_cast %244 : i32 to index
    %c0_171 = arith.constant 0 : index
    %246 = vector.load %arg16[%245, %c0_171] : memref<40x32xf32, #tpu.memory_space<vmem>>, vector<1x32xf32>
    %247 = arith.addf %243, %246 : vector<1x32xf32>
    %c5_172 = arith.constant 5 : index
    %248 = memref.load %arg1[%c5_172] : memref<32xi32, #tpu.memory_space<smem>>
    %249 = arith.index_cast %248 : i32 to index
    %c0_173 = arith.constant 0 : index
    %250 = vector.load %arg16[%249, %c0_173] : memref<40x32xf32, #tpu.memory_space<vmem>>, vector<1x32xf32>
    %251 = arith.addf %247, %250 : vector<1x32xf32>
    %c6_174 = arith.constant 6 : index
    %252 = memref.load %arg1[%c6_174] : memref<32xi32, #tpu.memory_space<smem>>
    %253 = arith.index_cast %252 : i32 to index
    %c0_175 = arith.constant 0 : index
    %254 = vector.load %arg16[%253, %c0_175] : memref<40x32xf32, #tpu.memory_space<vmem>>, vector<1x32xf32>
    %255 = arith.addf %251, %254 : vector<1x32xf32>
    %c7_176 = arith.constant 7 : index
    %256 = memref.load %arg1[%c7_176] : memref<32xi32, #tpu.memory_space<smem>>
    %257 = arith.index_cast %256 : i32 to index
    %c0_177 = arith.constant 0 : index
    %258 = vector.load %arg16[%257, %c0_177] : memref<40x32xf32, #tpu.memory_space<vmem>>, vector<1x32xf32>
    %259 = arith.addf %255, %258 : vector<1x32xf32>
    %c1_178 = arith.constant 1 : index
    %c0_179 = arith.constant 0 : index
    %260 = vector.load %arg17[%c1_178, %c0_179] : memref<8x32xf32, #tpu.memory_space<vmem>>, vector<1x32xf32>
    tpu.vector_store %arg17[%c1_178, %c0_179], %259 {strides = array<i32>} : memref<8x32xf32, #tpu.memory_space<vmem>>, vector<1x32xf32>,
    %cst_180 = arith.constant 0.000000e+00 : f32
    %261 = vector.broadcast %cst_180 : f32 to vector<1x32xf32>
    %c8_181 = arith.constant 8 : index
    %262 = memref.load %arg1[%c8_181] : memref<32xi32, #tpu.memory_space<smem>>
    %263 = arith.index_cast %262 : i32 to index
    %c0_182 = arith.constant 0 : index
    %264 = vector.load %arg16[%263, %c0_182] : memref<40x32xf32, #tpu.memory_space<vmem>>, vector<1x32xf32>
    %265 = arith.addf %261, %264 : vector<1x32xf32>
    %c9_183 = arith.constant 9 : index
    %266 = memref.load %arg1[%c9_183] : memref<32xi32, #tpu.memory_space<smem>>
    %267 = arith.index_cast %266 : i32 to index
    %c0_184 = arith.constant 0 : index
    %268 = vector.load %arg16[%267, %c0_184] : memref<40x32xf32, #tpu.memory_space<vmem>>, vector<1x32xf32>
    %269 = arith.addf %265, %268 : vector<1x32xf32>
    %c10_185 = arith.constant 10 : index
    %270 = memref.load %arg1[%c10_185] : memref<32xi32, #tpu.memory_space<smem>>
    %271 = arith.index_cast %270 : i32 to index
    %c0_186 = arith.constant 0 : index
    %272 = vector.load %arg16[%271, %c0_186] : memref<40x32xf32, #tpu.memory_space<vmem>>, vector<1x32xf32>
    %273 = arith.addf %269, %272 : vector<1x32xf32>
    %c11_187 = arith.constant 11 : index
    %274 = memref.load %arg1[%c11_187] : memref<32xi32, #tpu.memory_space<smem>>
    %275 = arith.index_cast %274 : i32 to index
    %c0_188 = arith.constant 0 : index
    %276 = vector.load %arg16[%275, %c0_188] : memref<40x32xf32, #tpu.memory_space<vmem>>, vector<1x32xf32>
    %277 = arith.addf %273, %276 : vector<1x32xf32>
    %c2_189 = arith.constant 2 : index
    %c0_190 = arith.constant 0 : index
    %278 = vector.load %arg17[%c2_189, %c0_190] : memref<8x32xf32, #tpu.memory_space<vmem>>, vector<1x32xf32>
    tpu.vector_store %arg17[%c2_189, %c0_190], %277 {strides = array<i32>} : memref<8x32xf32, #tpu.memory_space<vmem>>, vector<1x32xf32>,
    %cst_191 = arith.constant 0.000000e+00 : f32
    %279 = vector.broadcast %cst_191 : f32 to vector<1x32xf32>
    %c12_192 = arith.constant 12 : index
    %280 = memref.load %arg1[%c12_192] : memref<32xi32, #tpu.memory_space<smem>>
    %281 = arith.index_cast %280 : i32 to index
    %c0_193 = arith.constant 0 : index
    %282 = vector.load %arg16[%281, %c0_193] : memref<40x32xf32, #tpu.memory_space<vmem>>, vector<1x32xf32>
    %283 = arith.addf %279, %282 : vector<1x32xf32>
    %c13_194 = arith.constant 13 : index
    %284 = memref.load %arg1[%c13_194] : memref<32xi32, #tpu.memory_space<smem>>
    %285 = arith.index_cast %284 : i32 to index
    %c0_195 = arith.constant 0 : index
    %286 = vector.load %arg16[%285, %c0_195] : memref<40x32xf32, #tpu.memory_space<vmem>>, vector<1x32xf32>
    %287 = arith.addf %283, %286 : vector<1x32xf32>
    %c14_196 = arith.constant 14 : index
    %288 = memref.load %arg1[%c14_196] : memref<32xi32, #tpu.memory_space<smem>>
    %289 = arith.index_cast %288 : i32 to index
    %c0_197 = arith.constant 0 : index
    %290 = vector.load %arg16[%289, %c0_197] : memref<40x32xf32, #tpu.memory_space<vmem>>, vector<1x32xf32>
    %291 = arith.addf %287, %290 : vector<1x32xf32>
    %c15_198 = arith.constant 15 : index
    %292 = memref.load %arg1[%c15_198] : memref<32xi32, #tpu.memory_space<smem>>
    %293 = arith.index_cast %292 : i32 to index
    %c0_199 = arith.constant 0 : index
    %294 = vector.load %arg16[%293, %c0_199] : memref<40x32xf32, #tpu.memory_space<vmem>>, vector<1x32xf32>
    %295 = arith.addf %291, %294 : vector<1x32xf32>
    %c3_200 = arith.constant 3 : index
    %c0_201 = arith.constant 0 : index
    %296 = vector.load %arg17[%c3_200, %c0_201] : memref<8x32xf32, #tpu.memory_space<vmem>>, vector<1x32xf32>
    tpu.vector_store %arg17[%c3_200, %c0_201], %295 {strides = array<i32>} : memref<8x32xf32, #tpu.memory_space<vmem>>, vector<1x32xf32>,
    %cst_202 = arith.constant 0.000000e+00 : f32
    %297 = vector.broadcast %cst_202 : f32 to vector<1x32xf32>
    %c16_203 = arith.constant 16 : index
    %298 = memref.load %arg1[%c16_203] : memref<32xi32, #tpu.memory_space<smem>>
    %299 = arith.index_cast %298 : i32 to index
    %c0_204 = arith.constant 0 : index
    %300 = vector.load %arg16[%299, %c0_204] : memref<40x32xf32, #tpu.memory_space<vmem>>, vector<1x32xf32>
    %301 = arith.addf %297, %300 : vector<1x32xf32>
    %c17_205 = arith.constant 17 : index
    %302 = memref.load %arg1[%c17_205] : memref<32xi32, #tpu.memory_space<smem>>
    %303 = arith.index_cast %302 : i32 to index
    %c0_206 = arith.constant 0 : index
    %304 = vector.load %arg16[%303, %c0_206] : memref<40x32xf32, #tpu.memory_space<vmem>>, vector<1x32xf32>
    %305 = arith.addf %301, %304 : vector<1x32xf32>
    %c18_207 = arith.constant 18 : index
    %306 = memref.load %arg1[%c18_207] : memref<32xi32, #tpu.memory_space<smem>>
    %307 = arith.index_cast %306 : i32 to index
    %c0_208 = arith.constant 0 : index
    %308 = vector.load %arg16[%307, %c0_208] : memref<40x32xf32, #tpu.memory_space<vmem>>, vector<1x32xf32>
    %309 = arith.addf %305, %308 : vector<1x32xf32>
    %c19_209 = arith.constant 19 : index
    %310 = memref.load %arg1[%c19_209] : memref<32xi32, #tpu.memory_space<smem>>
    %311 = arith.index_cast %310 : i32 to index
    %c0_210 = arith.constant 0 : index
    %312 = vector.load %arg16[%311, %c0_210] : memref<40x32xf32, #tpu.memory_space<vmem>>, vector<1x32xf32>
    %313 = arith.addf %309, %312 : vector<1x32xf32>
    %c4_211 = arith.constant 4 : index
    %c0_212 = arith.constant 0 : index
    %314 = vector.load %arg17[%c4_211, %c0_212] : memref<8x32xf32, #tpu.memory_space<vmem>>, vector<1x32xf32>
    tpu.vector_store %arg17[%c4_211, %c0_212], %313 {strides = array<i32>} : memref<8x32xf32, #tpu.memory_space<vmem>>, vector<1x32xf32>,
    %cst_213 = arith.constant 0.000000e+00 : f32
    %315 = vector.broadcast %cst_213 : f32 to vector<1x32xf32>
    %c20_214 = arith.constant 20 : index
    %316 = memref.load %arg1[%c20_214] : memref<32xi32, #tpu.memory_space<smem>>
    %317 = arith.index_cast %316 : i32 to index
    %c0_215 = arith.constant 0 : index
    %318 = vector.load %arg16[%317, %c0_215] : memref<40x32xf32, #tpu.memory_space<vmem>>, vector<1x32xf32>
    %319 = arith.addf %315, %318 : vector<1x32xf32>
    %c21_216 = arith.constant 21 : index
    %320 = memref.load %arg1[%c21_216] : memref<32xi32, #tpu.memory_space<smem>>
    %321 = arith.index_cast %320 : i32 to index
    %c0_217 = arith.constant 0 : index
    %322 = vector.load %arg16[%321, %c0_217] : memref<40x32xf32, #tpu.memory_space<vmem>>, vector<1x32xf32>
    %323 = arith.addf %319, %322 : vector<1x32xf32>
    %c22_218 = arith.constant 22 : index
    %324 = memref.load %arg1[%c22_218] : memref<32xi32, #tpu.memory_space<smem>>
    %325 = arith.index_cast %324 : i32 to index
    %c0_219 = arith.constant 0 : index
    %326 = vector.load %arg16[%325, %c0_219] : memref<40x32xf32, #tpu.memory_space<vmem>>, vector<1x32xf32>
    %327 = arith.addf %323, %326 : vector<1x32xf32>
    %c23_220 = arith.constant 23 : index
    %328 = memref.load %arg1[%c23_220] : memref<32xi32, #tpu.memory_space<smem>>
    %329 = arith.index_cast %328 : i32 to index
    %c0_221 = arith.constant 0 : index
    %330 = vector.load %arg16[%329, %c0_221] : memref<40x32xf32, #tpu.memory_space<vmem>>, vector<1x32xf32>
    %331 = arith.addf %327, %330 : vector<1x32xf32>
    %c5_222 = arith.constant 5 : index
    %c0_223 = arith.constant 0 : index
    %332 = vector.load %arg17[%c5_222, %c0_223] : memref<8x32xf32, #tpu.memory_space<vmem>>, vector<1x32xf32>
    tpu.vector_store %arg17[%c5_222, %c0_223], %331 {strides = array<i32>} : memref<8x32xf32, #tpu.memory_space<vmem>>, vector<1x32xf32>,
    %cst_224 = arith.constant 0.000000e+00 : f32
    %333 = vector.broadcast %cst_224 : f32 to vector<1x32xf32>
    %c24_225 = arith.constant 24 : index
    %334 = memref.load %arg1[%c24_225] : memref<32xi32, #tpu.memory_space<smem>>
    %335 = arith.index_cast %334 : i32 to index
    %c0_226 = arith.constant 0 : index
    %336 = vector.load %arg16[%335, %c0_226] : memref<40x32xf32, #tpu.memory_space<vmem>>, vector<1x32xf32>
    %337 = arith.addf %333, %336 : vector<1x32xf32>
    %c25_227 = arith.constant 25 : index
    %338 = memref.load %arg1[%c25_227] : memref<32xi32, #tpu.memory_space<smem>>
    %339 = arith.index_cast %338 : i32 to index
    %c0_228 = arith.constant 0 : index
    %340 = vector.load %arg16[%339, %c0_228] : memref<40x32xf32, #tpu.memory_space<vmem>>, vector<1x32xf32>
    %341 = arith.addf %337, %340 : vector<1x32xf32>
    %c26_229 = arith.constant 26 : index
    %342 = memref.load %arg1[%c26_229] : memref<32xi32, #tpu.memory_space<smem>>
    %343 = arith.index_cast %342 : i32 to index
    %c0_230 = arith.constant 0 : index
    %344 = vector.load %arg16[%343, %c0_230] : memref<40x32xf32, #tpu.memory_space<vmem>>, vector<1x32xf32>
    %345 = arith.addf %341, %344 : vector<1x32xf32>
    %c27_231 = arith.constant 27 : index
    %346 = memref.load %arg1[%c27_231] : memref<32xi32, #tpu.memory_space<smem>>
    %347 = arith.index_cast %346 : i32 to index
    %c0_232 = arith.constant 0 : index
    %348 = vector.load %arg16[%347, %c0_232] : memref<40x32xf32, #tpu.memory_space<vmem>>, vector<1x32xf32>
    %349 = arith.addf %345, %348 : vector<1x32xf32>
    %c6_233 = arith.constant 6 : index
    %c0_234 = arith.constant 0 : index
    %350 = vector.load %arg17[%c6_233, %c0_234] : memref<8x32xf32, #tpu.memory_space<vmem>>, vector<1x32xf32>
    tpu.vector_store %arg17[%c6_233, %c0_234], %349 {strides = array<i32>} : memref<8x32xf32, #tpu.memory_space<vmem>>, vector<1x32xf32>,
    %cst_235 = arith.constant 0.000000e+00 : f32
    %351 = vector.broadcast %cst_235 : f32 to vector<1x32xf32>
    %c28_236 = arith.constant 28 : index
    %352 = memref.load %arg1[%c28_236] : memref<32xi32, #tpu.memory_space<smem>>
    %353 = arith.index_cast %352 : i32 to index
    %c0_237 = arith.constant 0 : index
    %354 = vector.load %arg16[%353, %c0_237] : memref<40x32xf32, #tpu.memory_space<vmem>>, vector<1x32xf32>
    %355 = arith.addf %351, %354 : vector<1x32xf32>
    %c29_238 = arith.constant 29 : index
    %356 = memref.load %arg1[%c29_238] : memref<32xi32, #tpu.memory_space<smem>>
    %357 = arith.index_cast %356 : i32 to index
    %c0_239 = arith.constant 0 : index
    %358 = vector.load %arg16[%357, %c0_239] : memref<40x32xf32, #tpu.memory_space<vmem>>, vector<1x32xf32>
    %359 = arith.addf %355, %358 : vector<1x32xf32>
    %c30_240 = arith.constant 30 : index
    %360 = memref.load %arg1[%c30_240] : memref<32xi32, #tpu.memory_space<smem>>
    %361 = arith.index_cast %360 : i32 to index
    %c0_241 = arith.constant 0 : index
    %362 = vector.load %arg16[%361, %c0_241] : memref<40x32xf32, #tpu.memory_space<vmem>>, vector<1x32xf32>
    %363 = arith.addf %359, %362 : vector<1x32xf32>
    %c31_242 = arith.constant 31 : index
    %364 = memref.load %arg1[%c31_242] : memref<32xi32, #tpu.memory_space<smem>>
    %365 = arith.index_cast %364 : i32 to index
    %c0_243 = arith.constant 0 : index
    %366 = vector.load %arg16[%365, %c0_243] : memref<40x32xf32, #tpu.memory_space<vmem>>, vector<1x32xf32>
    %367 = arith.addf %363, %366 : vector<1x32xf32>
    %c7_244 = arith.constant 7 : index
    %c0_245 = arith.constant 0 : index
    %368 = vector.load %arg17[%c7_244, %c0_245] : memref<8x32xf32, #tpu.memory_space<vmem>>, vector<1x32xf32>
    tpu.vector_store %arg17[%c7_244, %c0_245], %367 {strides = array<i32>} : memref<8x32xf32, #tpu.memory_space<vmem>>, vector<1x32xf32>,
    %c0_246 = arith.constant 0 : index
    %c0_247 = arith.constant 0 : index
    %369 = vector.load %arg17[%c0_246, %c0_247] : memref<8x32xf32, #tpu.memory_space<vmem>>, vector<8x32xf32>
    %370 = vector.extract_strided_slice %7 {offsets = [96, 0], sizes = [32, 64], strides = [1, 1]} : vector<160x64xbf16> to vector<32x64xbf16>
    %371 = arith.truncf %5 : vector<8x32xf32> to vector<8x32xbf16>
    %cst_248 = arith.constant dense<0.000000e+00> : vector<8x64xf32>
    %372 = tpu.matmul %371, %370, %cst_248 {dimension_numbers = #tpu.dot_dimension_numbers<[1], [0], [0], [1], [0, 0, 1, 1], [], []>} : vector<8x32xbf16>, vector<32x64xbf16>, vector<8x64xf32> -> vector<8x64xf32>
    %373 = vector.extract_strided_slice %7 {offsets = [128, 0], sizes = [32, 64], strides = [1, 1]} : vector<160x64xbf16> to vector<32x64xbf16>
    %374 = arith.truncf %369 : vector<8x32xf32> to vector<8x32xbf16>
    %cst_249 = arith.constant dense<0.000000e+00> : vector<8x64xf32>
    %375 = tpu.matmul %374, %373, %cst_249 {dimension_numbers = #tpu.dot_dimension_numbers<[1], [0], [0], [1], [0, 0, 1, 1], [], []>} : vector<8x32xbf16>, vector<32x64xbf16>, vector<8x64xf32> -> vector<8x64xf32>
    %376 = arith.addf %372, %375 : vector<8x64xf32>
    %cst_250 = arith.constant dense<0.000000e+00> : vector<64xf32>
    %377 = vector.multi_reduction <add>, %376, %cst_250 [0] : vector<8x64xf32> to vector<64xf32>
    %378 = vector.shape_cast %377 : vector<64xf32> to vector<1x64xf32>
    %379 = arith.mulf %376, %376 : vector<8x64xf32>
    %cst_251 = arith.constant dense<0.000000e+00> : vector<64xf32>
    %380 = vector.multi_reduction <add>, %379, %cst_251 [0] : vector<8x64xf32> to vector<64xf32>
    %381 = vector.shape_cast %380 : vector<64xf32> to vector<1x64xf32>
    %cst_252 = arith.constant 1.250000e-01 : f32
    %382 = vector.broadcast %cst_252 : f32 to vector<1x64xf32>
    %383 = arith.mulf %378, %382 : vector<1x64xf32>
    %cst_253 = arith.constant 1.250000e-01 : f32
    %384 = vector.broadcast %cst_253 : f32 to vector<1x64xf32>
    %385 = arith.mulf %381, %384 : vector<1x64xf32>
    %386 = arith.mulf %383, %383 : vector<1x64xf32>
    %387 = arith.subf %385, %386 : vector<1x64xf32>
    %cst_254 = arith.constant 0.000000e+00 : f32
    %388 = vector.broadcast %cst_254 : f32 to vector<1x64xf32>
    %389 = arith.maximumf %387, %388 : vector<1x64xf32>
    %390 = vector.broadcast %383 : vector<1x64xf32> to vector<8x64xf32>
    %391 = arith.subf %376, %390 : vector<8x64xf32>
    %cst_255 = arith.constant 9.99999974E-6 : f32
    %392 = vector.broadcast %cst_255 : f32 to vector<1x64xf32>
    %393 = arith.addf %389, %392 : vector<1x64xf32>
    %394 = math.rsqrt %393 : vector<1x64xf32>
    %395 = vector.broadcast %394 : vector<1x64xf32> to vector<8x64xf32>
    %396 = arith.mulf %391, %395 : vector<8x64xf32>
    %397 = vector.broadcast %15 : vector<1x64xf32> to vector<8x64xf32>
    %398 = arith.mulf %396, %397 : vector<8x64xf32>
    %399 = vector.broadcast %17 : vector<1x64xf32> to vector<8x64xf32>
    %400 = arith.addf %398, %399 : vector<8x64xf32>
    %cst_256 = arith.constant 0.000000e+00 : f32
    %401 = vector.broadcast %cst_256 : f32 to vector<8x64xf32>
    %402 = arith.maximumf %400, %401 : vector<8x64xf32>
    %403 = vector.extract_strided_slice %9 {offsets = [64, 0], sizes = [64, 32], strides = [1, 1]} : vector<128x32xbf16> to vector<64x32xbf16>
    %404 = arith.truncf %402 : vector<8x64xf32> to vector<8x64xbf16>
    %cst_257 = arith.constant dense<0.000000e+00> : vector<8x32xf32>
    %405 = tpu.matmul %404, %403, %cst_257 {dimension_numbers = #tpu.dot_dimension_numbers<[1], [0], [0], [1], [0, 0, 1, 1], [], []>} : vector<8x64xbf16>, vector<64x32xbf16>, vector<8x32xf32> -> vector<8x32xf32>
    %cst_258 = arith.constant dense<0.000000e+00> : vector<32xf32>
    %406 = vector.multi_reduction <add>, %405, %cst_258 [0] : vector<8x32xf32> to vector<32xf32>
    %407 = vector.shape_cast %406 : vector<32xf32> to vector<1x32xf32>
    %408 = arith.mulf %405, %405 : vector<8x32xf32>
    %cst_259 = arith.constant dense<0.000000e+00> : vector<32xf32>
    %409 = vector.multi_reduction <add>, %408, %cst_259 [0] : vector<8x32xf32> to vector<32xf32>
    %410 = vector.shape_cast %409 : vector<32xf32> to vector<1x32xf32>
    %cst_260 = arith.constant 1.250000e-01 : f32
    %411 = vector.broadcast %cst_260 : f32 to vector<1x32xf32>
    %412 = arith.mulf %407, %411 : vector<1x32xf32>
    %cst_261 = arith.constant 1.250000e-01 : f32
    %413 = vector.broadcast %cst_261 : f32 to vector<1x32xf32>
    %414 = arith.mulf %410, %413 : vector<1x32xf32>
    %415 = arith.mulf %412, %412 : vector<1x32xf32>
    %416 = arith.subf %414, %415 : vector<1x32xf32>
    %cst_262 = arith.constant 0.000000e+00 : f32
    %417 = vector.broadcast %cst_262 : f32 to vector<1x32xf32>
    %418 = arith.maximumf %416, %417 : vector<1x32xf32>
    %419 = vector.broadcast %412 : vector<1x32xf32> to vector<8x32xf32>
    %420 = arith.subf %405, %419 : vector<8x32xf32>
    %cst_263 = arith.constant 9.99999974E-6 : f32
    %421 = vector.broadcast %cst_263 : f32 to vector<1x32xf32>
    %422 = arith.addf %418, %421 : vector<1x32xf32>
    %423 = math.rsqrt %422 : vector<1x32xf32>
    %424 = vector.broadcast %423 : vector<1x32xf32> to vector<8x32xf32>
    %425 = arith.mulf %420, %424 : vector<8x32xf32>
    %426 = vector.broadcast %23 : vector<1x32xf32> to vector<8x32xf32>
    %427 = arith.mulf %425, %426 : vector<8x32xf32>
    %428 = vector.broadcast %25 : vector<1x32xf32> to vector<8x32xf32>
    %429 = arith.addf %427, %428 : vector<8x32xf32>
    %cst_264 = arith.constant 0.000000e+00 : f32
    %430 = vector.broadcast %cst_264 : f32 to vector<8x32xf32>
    %431 = arith.maximumf %429, %430 : vector<8x32xf32>
    %c0_265 = arith.constant 0 : index
    %c0_266 = arith.constant 0 : index
    %432 = vector.load %arg14[%c0_265, %c0_266] : memref<8x32xf32, #tpu.memory_space<vmem>>, vector<8x32xf32>
    tpu.vector_store %arg14[%c0_265, %c0_266], %431 {strides = array<i32>} : memref<8x32xf32, #tpu.memory_space<vmem>>, vector<8x32xf32>,
    %c1_267 = arith.constant 1 : index
    %c0_268 = arith.constant 0 : index
    %c0_269 = arith.constant 0 : index
    %433 = vector.load %arg5[%c1_267, %c0_268, %c0_269] : memref<2x160x64xbf16, #tpu.memory_space<vmem>>, vector<1x160x64xbf16>
    %434 = vector.shape_cast %433 : vector<1x160x64xbf16> to vector<160x64xbf16>
    %c1_270 = arith.constant 1 : index
    %c0_271 = arith.constant 0 : index
    %c0_272 = arith.constant 0 : index
    %435 = vector.load %arg6[%c1_270, %c0_271, %c0_272] : memref<2x128x32xbf16, #tpu.memory_space<vmem>>, vector<1x128x32xbf16>
    %436 = vector.shape_cast %435 : vector<1x128x32xbf16> to vector<128x32xbf16>
    %c1_273 = arith.constant 1 : index
    %c0_274 = arith.constant 0 : index
    %c0_275 = arith.constant 0 : index
    %437 = vector.load %arg7[%c1_273, %c0_274, %c0_275] : memref<2x4x64xf32, #tpu.memory_space<vmem>>, vector<1x1x64xf32>
    %438 = vector.shape_cast %437 : vector<1x1x64xf32> to vector<1x64xf32>
    %c1_276 = arith.constant 1 : index
    %c1_277 = arith.constant 1 : index
    %c0_278 = arith.constant 0 : index
    %439 = vector.load %arg7[%c1_276, %c1_277, %c0_278] : memref<2x4x64xf32, #tpu.memory_space<vmem>>, vector<1x1x64xf32>
    %440 = vector.shape_cast %439 : vector<1x1x64xf32> to vector<1x64xf32>
    %c1_279 = arith.constant 1 : index
    %c2_280 = arith.constant 2 : index
    %c0_281 = arith.constant 0 : index
    %441 = vector.load %arg7[%c1_279, %c2_280, %c0_281] : memref<2x4x64xf32, #tpu.memory_space<vmem>>, vector<1x1x64xf32>
    %442 = vector.shape_cast %441 : vector<1x1x64xf32> to vector<1x64xf32>
    %c1_282 = arith.constant 1 : index
    %c3_283 = arith.constant 3 : index
    %c0_284 = arith.constant 0 : index
    %443 = vector.load %arg7[%c1_282, %c3_283, %c0_284] : memref<2x4x64xf32, #tpu.memory_space<vmem>>, vector<1x1x64xf32>
    %444 = vector.shape_cast %443 : vector<1x1x64xf32> to vector<1x64xf32>
    %c1_285 = arith.constant 1 : index
    %c0_286 = arith.constant 0 : index
    %c0_287 = arith.constant 0 : index
    %445 = vector.load %arg8[%c1_285, %c0_286, %c0_287] : memref<2x4x32xf32, #tpu.memory_space<vmem>>, vector<1x1x32xf32>
    %446 = vector.shape_cast %445 : vector<1x1x32xf32> to vector<1x32xf32>
    %c1_288 = arith.constant 1 : index
    %c1_289 = arith.constant 1 : index
    %c0_290 = arith.constant 0 : index
    %447 = vector.load %arg8[%c1_288, %c1_289, %c0_290] : memref<2x4x32xf32, #tpu.memory_space<vmem>>, vector<1x1x32xf32>
    %448 = vector.shape_cast %447 : vector<1x1x32xf32> to vector<1x32xf32>
    %c1_291 = arith.constant 1 : index
    %c2_292 = arith.constant 2 : index
    %c0_293 = arith.constant 0 : index
    %449 = vector.load %arg8[%c1_291, %c2_292, %c0_293] : memref<2x4x32xf32, #tpu.memory_space<vmem>>, vector<1x1x32xf32>
    %450 = vector.shape_cast %449 : vector<1x1x32xf32> to vector<1x32xf32>
    %c1_294 = arith.constant 1 : index
    %c3_295 = arith.constant 3 : index
    %c0_296 = arith.constant 0 : index
    %451 = vector.load %arg8[%c1_294, %c3_295, %c0_296] : memref<2x4x32xf32, #tpu.memory_space<vmem>>, vector<1x1x32xf32>
    %452 = vector.shape_cast %451 : vector<1x1x32xf32> to vector<1x32xf32>
    %c0_297 = arith.constant 0 : index
    %453 = memref.load %arg0[%c0_297] : memref<32xi32, #tpu.memory_space<smem>>
    %454 = arith.index_cast %453 : i32 to index
    %c0_298 = arith.constant 0 : index
    %455 = vector.load %arg14[%454, %c0_298] : memref<8x32xf32, #tpu.memory_space<vmem>>, vector<1x32xf32>
    %c0_299 = arith.constant 0 : index
    %c0_300 = arith.constant 0 : index
    %456 = vector.load %arg15[%c0_299, %c0_300] : memref<32x32xf32, #tpu.memory_space<vmem>>, vector<1x32xf32>
    tpu.vector_store %arg15[%c0_299, %c0_300], %455 {strides = array<i32>} : memref<32x32xf32, #tpu.memory_space<vmem>>, vector<1x32xf32>,
    %c1_301 = arith.constant 1 : index
    %457 = memref.load %arg0[%c1_301] : memref<32xi32, #tpu.memory_space<smem>>
    %458 = arith.index_cast %457 : i32 to index
    %c0_302 = arith.constant 0 : index
    %459 = vector.load %arg14[%458, %c0_302] : memref<8x32xf32, #tpu.memory_space<vmem>>, vector<1x32xf32>
    %c1_303 = arith.constant 1 : index
    %c0_304 = arith.constant 0 : index
    %460 = vector.load %arg15[%c1_303, %c0_304] : memref<32x32xf32, #tpu.memory_space<vmem>>, vector<1x32xf32>
    tpu.vector_store %arg15[%c1_303, %c0_304], %459 {strides = array<i32>} : memref<32x32xf32, #tpu.memory_space<vmem>>, vector<1x32xf32>,
    %c2_305 = arith.constant 2 : index
    %461 = memref.load %arg0[%c2_305] : memref<32xi32, #tpu.memory_space<smem>>
    %462 = arith.index_cast %461 : i32 to index
    %c0_306 = arith.constant 0 : index
    %463 = vector.load %arg14[%462, %c0_306] : memref<8x32xf32, #tpu.memory_space<vmem>>, vector<1x32xf32>
    %c2_307 = arith.constant 2 : index
    %c0_308 = arith.constant 0 : index
    %464 = vector.load %arg15[%c2_307, %c0_308] : memref<32x32xf32, #tpu.memory_space<vmem>>, vector<1x32xf32>
    tpu.vector_store %arg15[%c2_307, %c0_308], %463 {strides = array<i32>} : memref<32x32xf32, #tpu.memory_space<vmem>>, vector<1x32xf32>,
    %c3_309 = arith.constant 3 : index
    %465 = memref.load %arg0[%c3_309] : memref<32xi32, #tpu.memory_space<smem>>
    %466 = arith.index_cast %465 : i32 to index
    %c0_310 = arith.constant 0 : index
    %467 = vector.load %arg14[%466, %c0_310] : memref<8x32xf32, #tpu.memory_space<vmem>>, vector<1x32xf32>
    %c3_311 = arith.constant 3 : index
    %c0_312 = arith.constant 0 : index
    %468 = vector.load %arg15[%c3_311, %c0_312] : memref<32x32xf32, #tpu.memory_space<vmem>>, vector<1x32xf32>
    tpu.vector_store %arg15[%c3_311, %c0_312], %467 {strides = array<i32>} : memref<32x32xf32, #tpu.memory_space<vmem>>, vector<1x32xf32>,
    %c4_313 = arith.constant 4 : index
    %469 = memref.load %arg0[%c4_313] : memref<32xi32, #tpu.memory_space<smem>>
    %470 = arith.index_cast %469 : i32 to index
    %c0_314 = arith.constant 0 : index
    %471 = vector.load %arg14[%470, %c0_314] : memref<8x32xf32, #tpu.memory_space<vmem>>, vector<1x32xf32>
    %c4_315 = arith.constant 4 : index
    %c0_316 = arith.constant 0 : index
    %472 = vector.load %arg15[%c4_315, %c0_316] : memref<32x32xf32, #tpu.memory_space<vmem>>, vector<1x32xf32>
    tpu.vector_store %arg15[%c4_315, %c0_316], %471 {strides = array<i32>} : memref<32x32xf32, #tpu.memory_space<vmem>>, vector<1x32xf32>,
    %c5_317 = arith.constant 5 : index
    %473 = memref.load %arg0[%c5_317] : memref<32xi32, #tpu.memory_space<smem>>
    %474 = arith.index_cast %473 : i32 to index
    %c0_318 = arith.constant 0 : index
    %475 = vector.load %arg14[%474, %c0_318] : memref<8x32xf32, #tpu.memory_space<vmem>>, vector<1x32xf32>
    %c5_319 = arith.constant 5 : index
    %c0_320 = arith.constant 0 : index
    %476 = vector.load %arg15[%c5_319, %c0_320] : memref<32x32xf32, #tpu.memory_space<vmem>>, vector<1x32xf32>
    tpu.vector_store %arg15[%c5_319, %c0_320], %475 {strides = array<i32>} : memref<32x32xf32, #tpu.memory_space<vmem>>, vector<1x32xf32>,
    %c6_321 = arith.constant 6 : index
    %477 = memref.load %arg0[%c6_321] : memref<32xi32, #tpu.memory_space<smem>>
    %478 = arith.index_cast %477 : i32 to index
    %c0_322 = arith.constant 0 : index
    %479 = vector.load %arg14[%478, %c0_322] : memref<8x32xf32, #tpu.memory_space<vmem>>, vector<1x32xf32>
    %c6_323 = arith.constant 6 : index
    %c0_324 = arith.constant 0 : index
    %480 = vector.load %arg15[%c6_323, %c0_324] : memref<32x32xf32, #tpu.memory_space<vmem>>, vector<1x32xf32>
    tpu.vector_store %arg15[%c6_323, %c0_324], %479 {strides = array<i32>} : memref<32x32xf32, #tpu.memory_space<vmem>>, vector<1x32xf32>,
    %c7_325 = arith.constant 7 : index
    %481 = memref.load %arg0[%c7_325] : memref<32xi32, #tpu.memory_space<smem>>
    %482 = arith.index_cast %481 : i32 to index
    %c0_326 = arith.constant 0 : index
    %483 = vector.load %arg14[%482, %c0_326] : memref<8x32xf32, #tpu.memory_space<vmem>>, vector<1x32xf32>
    %c7_327 = arith.constant 7 : index
    %c0_328 = arith.constant 0 : index
    %484 = vector.load %arg15[%c7_327, %c0_328] : memref<32x32xf32, #tpu.memory_space<vmem>>, vector<1x32xf32>
    tpu.vector_store %arg15[%c7_327, %c0_328], %483 {strides = array<i32>} : memref<32x32xf32, #tpu.memory_space<vmem>>, vector<1x32xf32>,
    %c8_329 = arith.constant 8 : index
    %485 = memref.load %arg0[%c8_329] : memref<32xi32, #tpu.memory_space<smem>>
    %486 = arith.index_cast %485 : i32 to index
    %c0_330 = arith.constant 0 : index
    %487 = vector.load %arg14[%486, %c0_330] : memref<8x32xf32, #tpu.memory_space<vmem>>, vector<1x32xf32>
    %c8_331 = arith.constant 8 : index
    %c0_332 = arith.constant 0 : index
    %488 = vector.load %arg15[%c8_331, %c0_332] : memref<32x32xf32, #tpu.memory_space<vmem>>, vector<1x32xf32>
    tpu.vector_store %arg15[%c8_331, %c0_332], %487 {strides = array<i32>} : memref<32x32xf32, #tpu.memory_space<vmem>>, vector<1x32xf32>,
    %c9_333 = arith.constant 9 : index
    %489 = memref.load %arg0[%c9_333] : memref<32xi32, #tpu.memory_space<smem>>
    %490 = arith.index_cast %489 : i32 to index
    %c0_334 = arith.constant 0 : index
    %491 = vector.load %arg14[%490, %c0_334] : memref<8x32xf32, #tpu.memory_space<vmem>>, vector<1x32xf32>
    %c9_335 = arith.constant 9 : index
    %c0_336 = arith.constant 0 : index
    %492 = vector.load %arg15[%c9_335, %c0_336] : memref<32x32xf32, #tpu.memory_space<vmem>>, vector<1x32xf32>
    tpu.vector_store %arg15[%c9_335, %c0_336], %491 {strides = array<i32>} : memref<32x32xf32, #tpu.memory_space<vmem>>, vector<1x32xf32>,
    %c10_337 = arith.constant 10 : index
    %493 = memref.load %arg0[%c10_337] : memref<32xi32, #tpu.memory_space<smem>>
    %494 = arith.index_cast %493 : i32 to index
    %c0_338 = arith.constant 0 : index
    %495 = vector.load %arg14[%494, %c0_338] : memref<8x32xf32, #tpu.memory_space<vmem>>, vector<1x32xf32>
    %c10_339 = arith.constant 10 : index
    %c0_340 = arith.constant 0 : index
    %496 = vector.load %arg15[%c10_339, %c0_340] : memref<32x32xf32, #tpu.memory_space<vmem>>, vector<1x32xf32>
    tpu.vector_store %arg15[%c10_339, %c0_340], %495 {strides = array<i32>} : memref<32x32xf32, #tpu.memory_space<vmem>>, vector<1x32xf32>,
    %c11_341 = arith.constant 11 : index
    %497 = memref.load %arg0[%c11_341] : memref<32xi32, #tpu.memory_space<smem>>
    %498 = arith.index_cast %497 : i32 to index
    %c0_342 = arith.constant 0 : index
    %499 = vector.load %arg14[%498, %c0_342] : memref<8x32xf32, #tpu.memory_space<vmem>>, vector<1x32xf32>
    %c11_343 = arith.constant 11 : index
    %c0_344 = arith.constant 0 : index
    %500 = vector.load %arg15[%c11_343, %c0_344] : memref<32x32xf32, #tpu.memory_space<vmem>>, vector<1x32xf32>
    tpu.vector_store %arg15[%c11_343, %c0_344], %499 {strides = array<i32>} : memref<32x32xf32, #tpu.memory_space<vmem>>, vector<1x32xf32>,
    %c12_345 = arith.constant 12 : index
    %501 = memref.load %arg0[%c12_345] : memref<32xi32, #tpu.memory_space<smem>>
    %502 = arith.index_cast %501 : i32 to index
    %c0_346 = arith.constant 0 : index
    %503 = vector.load %arg14[%502, %c0_346] : memref<8x32xf32, #tpu.memory_space<vmem>>, vector<1x32xf32>
    %c12_347 = arith.constant 12 : index
    %c0_348 = arith.constant 0 : index
    %504 = vector.load %arg15[%c12_347, %c0_348] : memref<32x32xf32, #tpu.memory_space<vmem>>, vector<1x32xf32>
    tpu.vector_store %arg15[%c12_347, %c0_348], %503 {strides = array<i32>} : memref<32x32xf32, #tpu.memory_space<vmem>>, vector<1x32xf32>,
    %c13_349 = arith.constant 13 : index
    %505 = memref.load %arg0[%c13_349] : memref<32xi32, #tpu.memory_space<smem>>
    %506 = arith.index_cast %505 : i32 to index
    %c0_350 = arith.constant 0 : index
    %507 = vector.load %arg14[%506, %c0_350] : memref<8x32xf32, #tpu.memory_space<vmem>>, vector<1x32xf32>
    %c13_351 = arith.constant 13 : index
    %c0_352 = arith.constant 0 : index
    %508 = vector.load %arg15[%c13_351, %c0_352] : memref<32x32xf32, #tpu.memory_space<vmem>>, vector<1x32xf32>
    tpu.vector_store %arg15[%c13_351, %c0_352], %507 {strides = array<i32>} : memref<32x32xf32, #tpu.memory_space<vmem>>, vector<1x32xf32>,
    %c14_353 = arith.constant 14 : index
    %509 = memref.load %arg0[%c14_353] : memref<32xi32, #tpu.memory_space<smem>>
    %510 = arith.index_cast %509 : i32 to index
    %c0_354 = arith.constant 0 : index
    %511 = vector.load %arg14[%510, %c0_354] : memref<8x32xf32, #tpu.memory_space<vmem>>, vector<1x32xf32>
    %c14_355 = arith.constant 14 : index
    %c0_356 = arith.constant 0 : index
    %512 = vector.load %arg15[%c14_355, %c0_356] : memref<32x32xf32, #tpu.memory_space<vmem>>, vector<1x32xf32>
    tpu.vector_store %arg15[%c14_355, %c0_356], %511 {strides = array<i32>} : memref<32x32xf32, #tpu.memory_space<vmem>>, vector<1x32xf32>,
    %c15_357 = arith.constant 15 : index
    %513 = memref.load %arg0[%c15_357] : memref<32xi32, #tpu.memory_space<smem>>
    %514 = arith.index_cast %513 : i32 to index
    %c0_358 = arith.constant 0 : index
    %515 = vector.load %arg14[%514, %c0_358] : memref<8x32xf32, #tpu.memory_space<vmem>>, vector<1x32xf32>
    %c15_359 = arith.constant 15 : index
    %c0_360 = arith.constant 0 : index
    %516 = vector.load %arg15[%c15_359, %c0_360] : memref<32x32xf32, #tpu.memory_space<vmem>>, vector<1x32xf32>
    tpu.vector_store %arg15[%c15_359, %c0_360], %515 {strides = array<i32>} : memref<32x32xf32, #tpu.memory_space<vmem>>, vector<1x32xf32>,
    %c16_361 = arith.constant 16 : index
    %517 = memref.load %arg0[%c16_361] : memref<32xi32, #tpu.memory_space<smem>>
    %518 = arith.index_cast %517 : i32 to index
    %c0_362 = arith.constant 0 : index
    %519 = vector.load %arg14[%518, %c0_362] : memref<8x32xf32, #tpu.memory_space<vmem>>, vector<1x32xf32>
    %c16_363 = arith.constant 16 : index
    %c0_364 = arith.constant 0 : index
    %520 = vector.load %arg15[%c16_363, %c0_364] : memref<32x32xf32, #tpu.memory_space<vmem>>, vector<1x32xf32>
    tpu.vector_store %arg15[%c16_363, %c0_364], %519 {strides = array<i32>} : memref<32x32xf32, #tpu.memory_space<vmem>>, vector<1x32xf32>,
    %c17_365 = arith.constant 17 : index
    %521 = memref.load %arg0[%c17_365] : memref<32xi32, #tpu.memory_space<smem>>
    %522 = arith.index_cast %521 : i32 to index
    %c0_366 = arith.constant 0 : index
    %523 = vector.load %arg14[%522, %c0_366] : memref<8x32xf32, #tpu.memory_space<vmem>>, vector<1x32xf32>
    %c17_367 = arith.constant 17 : index
    %c0_368 = arith.constant 0 : index
    %524 = vector.load %arg15[%c17_367, %c0_368] : memref<32x32xf32, #tpu.memory_space<vmem>>, vector<1x32xf32>
    tpu.vector_store %arg15[%c17_367, %c0_368], %523 {strides = array<i32>} : memref<32x32xf32, #tpu.memory_space<vmem>>, vector<1x32xf32>,
    %c18_369 = arith.constant 18 : index
    %525 = memref.load %arg0[%c18_369] : memref<32xi32, #tpu.memory_space<smem>>
    %526 = arith.index_cast %525 : i32 to index
    %c0_370 = arith.constant 0 : index
    %527 = vector.load %arg14[%526, %c0_370] : memref<8x32xf32, #tpu.memory_space<vmem>>, vector<1x32xf32>
    %c18_371 = arith.constant 18 : index
    %c0_372 = arith.constant 0 : index
    %528 = vector.load %arg15[%c18_371, %c0_372] : memref<32x32xf32, #tpu.memory_space<vmem>>, vector<1x32xf32>
    tpu.vector_store %arg15[%c18_371, %c0_372], %527 {strides = array<i32>} : memref<32x32xf32, #tpu.memory_space<vmem>>, vector<1x32xf32>,
    %c19_373 = arith.constant 19 : index
    %529 = memref.load %arg0[%c19_373] : memref<32xi32, #tpu.memory_space<smem>>
    %530 = arith.index_cast %529 : i32 to index
    %c0_374 = arith.constant 0 : index
    %531 = vector.load %arg14[%530, %c0_374] : memref<8x32xf32, #tpu.memory_space<vmem>>, vector<1x32xf32>
    %c19_375 = arith.constant 19 : index
    %c0_376 = arith.constant 0 : index
    %532 = vector.load %arg15[%c19_375, %c0_376] : memref<32x32xf32, #tpu.memory_space<vmem>>, vector<1x32xf32>
    tpu.vector_store %arg15[%c19_375, %c0_376], %531 {strides = array<i32>} : memref<32x32xf32, #tpu.memory_space<vmem>>, vector<1x32xf32>,
    %c20_377 = arith.constant 20 : index
    %533 = memref.load %arg0[%c20_377] : memref<32xi32, #tpu.memory_space<smem>>
    %534 = arith.index_cast %533 : i32 to index
    %c0_378 = arith.constant 0 : index
    %535 = vector.load %arg14[%534, %c0_378] : memref<8x32xf32, #tpu.memory_space<vmem>>, vector<1x32xf32>
    %c20_379 = arith.constant 20 : index
    %c0_380 = arith.constant 0 : index
    %536 = vector.load %arg15[%c20_379, %c0_380] : memref<32x32xf32, #tpu.memory_space<vmem>>, vector<1x32xf32>
    tpu.vector_store %arg15[%c20_379, %c0_380], %535 {strides = array<i32>} : memref<32x32xf32, #tpu.memory_space<vmem>>, vector<1x32xf32>,
    %c21_381 = arith.constant 21 : index
    %537 = memref.load %arg0[%c21_381] : memref<32xi32, #tpu.memory_space<smem>>
    %538 = arith.index_cast %537 : i32 to index
    %c0_382 = arith.constant 0 : index
    %539 = vector.load %arg14[%538, %c0_382] : memref<8x32xf32, #tpu.memory_space<vmem>>, vector<1x32xf32>
    %c21_383 = arith.constant 21 : index
    %c0_384 = arith.constant 0 : index
    %540 = vector.load %arg15[%c21_383, %c0_384] : memref<32x32xf32, #tpu.memory_space<vmem>>, vector<1x32xf32>
    tpu.vector_store %arg15[%c21_383, %c0_384], %539 {strides = array<i32>} : memref<32x32xf32, #tpu.memory_space<vmem>>, vector<1x32xf32>,
    %c22_385 = arith.constant 22 : index
    %541 = memref.load %arg0[%c22_385] : memref<32xi32, #tpu.memory_space<smem>>
    %542 = arith.index_cast %541 : i32 to index
    %c0_386 = arith.constant 0 : index
    %543 = vector.load %arg14[%542, %c0_386] : memref<8x32xf32, #tpu.memory_space<vmem>>, vector<1x32xf32>
    %c22_387 = arith.constant 22 : index
    %c0_388 = arith.constant 0 : index
    %544 = vector.load %arg15[%c22_387, %c0_388] : memref<32x32xf32, #tpu.memory_space<vmem>>, vector<1x32xf32>
    tpu.vector_store %arg15[%c22_387, %c0_388], %543 {strides = array<i32>} : memref<32x32xf32, #tpu.memory_space<vmem>>, vector<1x32xf32>,
    %c23_389 = arith.constant 23 : index
    %545 = memref.load %arg0[%c23_389] : memref<32xi32, #tpu.memory_space<smem>>
    %546 = arith.index_cast %545 : i32 to index
    %c0_390 = arith.constant 0 : index
    %547 = vector.load %arg14[%546, %c0_390] : memref<8x32xf32, #tpu.memory_space<vmem>>, vector<1x32xf32>
    %c23_391 = arith.constant 23 : index
    %c0_392 = arith.constant 0 : index
    %548 = vector.load %arg15[%c23_391, %c0_392] : memref<32x32xf32, #tpu.memory_space<vmem>>, vector<1x32xf32>
    tpu.vector_store %arg15[%c23_391, %c0_392], %547 {strides = array<i32>} : memref<32x32xf32, #tpu.memory_space<vmem>>, vector<1x32xf32>,
    %c24_393 = arith.constant 24 : index
    %549 = memref.load %arg0[%c24_393] : memref<32xi32, #tpu.memory_space<smem>>
    %550 = arith.index_cast %549 : i32 to index
    %c0_394 = arith.constant 0 : index
    %551 = vector.load %arg14[%550, %c0_394] : memref<8x32xf32, #tpu.memory_space<vmem>>, vector<1x32xf32>
    %c24_395 = arith.constant 24 : index
    %c0_396 = arith.constant 0 : index
    %552 = vector.load %arg15[%c24_395, %c0_396] : memref<32x32xf32, #tpu.memory_space<vmem>>, vector<1x32xf32>
    tpu.vector_store %arg15[%c24_395, %c0_396], %551 {strides = array<i32>} : memref<32x32xf32, #tpu.memory_space<vmem>>, vector<1x32xf32>,
    %c25_397 = arith.constant 25 : index
    %553 = memref.load %arg0[%c25_397] : memref<32xi32, #tpu.memory_space<smem>>
    %554 = arith.index_cast %553 : i32 to index
    %c0_398 = arith.constant 0 : index
    %555 = vector.load %arg14[%554, %c0_398] : memref<8x32xf32, #tpu.memory_space<vmem>>, vector<1x32xf32>
    %c25_399 = arith.constant 25 : index
    %c0_400 = arith.constant 0 : index
    %556 = vector.load %arg15[%c25_399, %c0_400] : memref<32x32xf32, #tpu.memory_space<vmem>>, vector<1x32xf32>
    tpu.vector_store %arg15[%c25_399, %c0_400], %555 {strides = array<i32>} : memref<32x32xf32, #tpu.memory_space<vmem>>, vector<1x32xf32>,
    %c26_401 = arith.constant 26 : index
    %557 = memref.load %arg0[%c26_401] : memref<32xi32, #tpu.memory_space<smem>>
    %558 = arith.index_cast %557 : i32 to index
    %c0_402 = arith.constant 0 : index
    %559 = vector.load %arg14[%558, %c0_402] : memref<8x32xf32, #tpu.memory_space<vmem>>, vector<1x32xf32>
    %c26_403 = arith.constant 26 : index
    %c0_404 = arith.constant 0 : index
    %560 = vector.load %arg15[%c26_403, %c0_404] : memref<32x32xf32, #tpu.memory_space<vmem>>, vector<1x32xf32>
    tpu.vector_store %arg15[%c26_403, %c0_404], %559 {strides = array<i32>} : memref<32x32xf32, #tpu.memory_space<vmem>>, vector<1x32xf32>,
    %c27_405 = arith.constant 27 : index
    %561 = memref.load %arg0[%c27_405] : memref<32xi32, #tpu.memory_space<smem>>
    %562 = arith.index_cast %561 : i32 to index
    %c0_406 = arith.constant 0 : index
    %563 = vector.load %arg14[%562, %c0_406] : memref<8x32xf32, #tpu.memory_space<vmem>>, vector<1x32xf32>
    %c27_407 = arith.constant 27 : index
    %c0_408 = arith.constant 0 : index
    %564 = vector.load %arg15[%c27_407, %c0_408] : memref<32x32xf32, #tpu.memory_space<vmem>>, vector<1x32xf32>
    tpu.vector_store %arg15[%c27_407, %c0_408], %563 {strides = array<i32>} : memref<32x32xf32, #tpu.memory_space<vmem>>, vector<1x32xf32>,
    %c28_409 = arith.constant 28 : index
    %565 = memref.load %arg0[%c28_409] : memref<32xi32, #tpu.memory_space<smem>>
    %566 = arith.index_cast %565 : i32 to index
    %c0_410 = arith.constant 0 : index
    %567 = vector.load %arg14[%566, %c0_410] : memref<8x32xf32, #tpu.memory_space<vmem>>, vector<1x32xf32>
    %c28_411 = arith.constant 28 : index
    %c0_412 = arith.constant 0 : index
    %568 = vector.load %arg15[%c28_411, %c0_412] : memref<32x32xf32, #tpu.memory_space<vmem>>, vector<1x32xf32>
    tpu.vector_store %arg15[%c28_411, %c0_412], %567 {strides = array<i32>} : memref<32x32xf32, #tpu.memory_space<vmem>>, vector<1x32xf32>,
    %c29_413 = arith.constant 29 : index
    %569 = memref.load %arg0[%c29_413] : memref<32xi32, #tpu.memory_space<smem>>
    %570 = arith.index_cast %569 : i32 to index
    %c0_414 = arith.constant 0 : index
    %571 = vector.load %arg14[%570, %c0_414] : memref<8x32xf32, #tpu.memory_space<vmem>>, vector<1x32xf32>
    %c29_415 = arith.constant 29 : index
    %c0_416 = arith.constant 0 : index
    %572 = vector.load %arg15[%c29_415, %c0_416] : memref<32x32xf32, #tpu.memory_space<vmem>>, vector<1x32xf32>
    tpu.vector_store %arg15[%c29_415, %c0_416], %571 {strides = array<i32>} : memref<32x32xf32, #tpu.memory_space<vmem>>, vector<1x32xf32>,
    %c30_417 = arith.constant 30 : index
    %573 = memref.load %arg0[%c30_417] : memref<32xi32, #tpu.memory_space<smem>>
    %574 = arith.index_cast %573 : i32 to index
    %c0_418 = arith.constant 0 : index
    %575 = vector.load %arg14[%574, %c0_418] : memref<8x32xf32, #tpu.memory_space<vmem>>, vector<1x32xf32>
    %c30_419 = arith.constant 30 : index
    %c0_420 = arith.constant 0 : index
    %576 = vector.load %arg15[%c30_419, %c0_420] : memref<32x32xf32, #tpu.memory_space<vmem>>, vector<1x32xf32>
    tpu.vector_store %arg15[%c30_419, %c0_420], %575 {strides = array<i32>} : memref<32x32xf32, #tpu.memory_space<vmem>>, vector<1x32xf32>,
    %c31_421 = arith.constant 31 : index
    %577 = memref.load %arg0[%c31_421] : memref<32xi32, #tpu.memory_space<smem>>
    %578 = arith.index_cast %577 : i32 to index
    %c0_422 = arith.constant 0 : index
    %579 = vector.load %arg14[%578, %c0_422] : memref<8x32xf32, #tpu.memory_space<vmem>>, vector<1x32xf32>
    %c31_423 = arith.constant 31 : index
    %c0_424 = arith.constant 0 : index
    %580 = vector.load %arg15[%c31_423, %c0_424] : memref<32x32xf32, #tpu.memory_space<vmem>>, vector<1x32xf32>
    tpu.vector_store %arg15[%c31_423, %c0_424], %579 {strides = array<i32>} : memref<32x32xf32, #tpu.memory_space<vmem>>, vector<1x32xf32>,
    %c0_425 = arith.constant 0 : index
    %c0_426 = arith.constant 0 : index
    %581 = vector.load %arg15[%c0_425, %c0_426] : memref<32x32xf32, #tpu.memory_space<vmem>>, vector<32x32xf32>
    %c16_i32_427 = arith.constant 16 : i32
    %582 = tpu.dynamic_rotate %581 by %c16_i32_427 dim 0 : vector<32x32xf32>, i32 -> vector<32x32xf32>
    %583 = arith.addf %581, %582 : vector<32x32xf32>
    %584 = vector.extract_strided_slice %434 {offsets = [0, 0], sizes = [32, 64], strides = [1, 1]} : vector<160x64xbf16> to vector<32x64xbf16>
    %585 = arith.truncf %223 : vector<32x32xf32> to vector<32x32xbf16>
    %cst_428 = arith.constant dense<0.000000e+00> : vector<32x64xf32>
    %586 = tpu.matmul %585, %584, %cst_428 {dimension_numbers = #tpu.dot_dimension_numbers<[1], [0], [0], [1], [0, 0, 1, 1], [], []>} : vector<32x32xbf16>, vector<32x64xbf16>, vector<32x64xf32> -> vector<32x64xf32>
    %587 = vector.extract_strided_slice %434 {offsets = [32, 0], sizes = [32, 64], strides = [1, 1]} : vector<160x64xbf16> to vector<32x64xbf16>
    %588 = arith.truncf %581 : vector<32x32xf32> to vector<32x32xbf16>
    %cst_429 = arith.constant dense<0.000000e+00> : vector<32x64xf32>
    %589 = tpu.matmul %588, %587, %cst_429 {dimension_numbers = #tpu.dot_dimension_numbers<[1], [0], [0], [1], [0, 0, 1, 1], [], []>} : vector<32x32xbf16>, vector<32x64xbf16>, vector<32x64xf32> -> vector<32x64xf32>
    %590 = arith.addf %586, %589 : vector<32x64xf32>
    %591 = vector.extract_strided_slice %434 {offsets = [64, 0], sizes = [32, 64], strides = [1, 1]} : vector<160x64xbf16> to vector<32x64xbf16>
    %592 = arith.truncf %583 : vector<32x32xf32> to vector<32x32xbf16>
    %cst_430 = arith.constant dense<0.000000e+00> : vector<32x64xf32>
    %593 = tpu.matmul %592, %591, %cst_430 {dimension_numbers = #tpu.dot_dimension_numbers<[1], [0], [0], [1], [0, 0, 1, 1], [], []>} : vector<32x32xbf16>, vector<32x64xbf16>, vector<32x64xf32> -> vector<32x64xf32>
    %594 = arith.addf %590, %593 : vector<32x64xf32>
    %cst_431 = arith.constant dense<0.000000e+00> : vector<64xf32>
    %595 = vector.multi_reduction <add>, %594, %cst_431 [0] : vector<32x64xf32> to vector<64xf32>
    %596 = vector.shape_cast %595 : vector<64xf32> to vector<1x64xf32>
    %597 = arith.mulf %594, %594 : vector<32x64xf32>
    %cst_432 = arith.constant dense<0.000000e+00> : vector<64xf32>
    %598 = vector.multi_reduction <add>, %597, %cst_432 [0] : vector<32x64xf32> to vector<64xf32>
    %599 = vector.shape_cast %598 : vector<64xf32> to vector<1x64xf32>
    %cst_433 = arith.constant 3.125000e-02 : f32
    %600 = vector.broadcast %cst_433 : f32 to vector<1x64xf32>
    %601 = arith.mulf %596, %600 : vector<1x64xf32>
    %cst_434 = arith.constant 3.125000e-02 : f32
    %602 = vector.broadcast %cst_434 : f32 to vector<1x64xf32>
    %603 = arith.mulf %599, %602 : vector<1x64xf32>
    %604 = arith.mulf %601, %601 : vector<1x64xf32>
    %605 = arith.subf %603, %604 : vector<1x64xf32>
    %cst_435 = arith.constant 0.000000e+00 : f32
    %606 = vector.broadcast %cst_435 : f32 to vector<1x64xf32>
    %607 = arith.maximumf %605, %606 : vector<1x64xf32>
    %608 = vector.broadcast %601 : vector<1x64xf32> to vector<32x64xf32>
    %609 = arith.subf %594, %608 : vector<32x64xf32>
    %cst_436 = arith.constant 9.99999974E-6 : f32
    %610 = vector.broadcast %cst_436 : f32 to vector<1x64xf32>
    %611 = arith.addf %607, %610 : vector<1x64xf32>
    %612 = math.rsqrt %611 : vector<1x64xf32>
    %613 = vector.broadcast %612 : vector<1x64xf32> to vector<32x64xf32>
    %614 = arith.mulf %609, %613 : vector<32x64xf32>
    %615 = vector.broadcast %438 : vector<1x64xf32> to vector<32x64xf32>
    %616 = arith.mulf %614, %615 : vector<32x64xf32>
    %617 = vector.broadcast %440 : vector<1x64xf32> to vector<32x64xf32>
    %618 = arith.addf %616, %617 : vector<32x64xf32>
    %cst_437 = arith.constant 0.000000e+00 : f32
    %619 = vector.broadcast %cst_437 : f32 to vector<32x64xf32>
    %620 = arith.maximumf %618, %619 : vector<32x64xf32>
    %621 = vector.extract_strided_slice %436 {offsets = [0, 0], sizes = [64, 32], strides = [1, 1]} : vector<128x32xbf16> to vector<64x32xbf16>
    %622 = arith.truncf %620 : vector<32x64xf32> to vector<32x64xbf16>
    %cst_438 = arith.constant dense<0.000000e+00> : vector<32x32xf32>
    %623 = tpu.matmul %622, %621, %cst_438 {dimension_numbers = #tpu.dot_dimension_numbers<[1], [0], [0], [1], [0, 0, 1, 1], [], []>} : vector<32x64xbf16>, vector<64x32xbf16>, vector<32x32xf32> -> vector<32x32xf32>
    %cst_439 = arith.constant dense<0.000000e+00> : vector<32xf32>
    %624 = vector.multi_reduction <add>, %623, %cst_439 [0] : vector<32x32xf32> to vector<32xf32>
    %625 = vector.shape_cast %624 : vector<32xf32> to vector<1x32xf32>
    %626 = arith.mulf %623, %623 : vector<32x32xf32>
    %cst_440 = arith.constant dense<0.000000e+00> : vector<32xf32>
    %627 = vector.multi_reduction <add>, %626, %cst_440 [0] : vector<32x32xf32> to vector<32xf32>
    %628 = vector.shape_cast %627 : vector<32xf32> to vector<1x32xf32>
    %cst_441 = arith.constant 3.125000e-02 : f32
    %629 = vector.broadcast %cst_441 : f32 to vector<1x32xf32>
    %630 = arith.mulf %625, %629 : vector<1x32xf32>
    %cst_442 = arith.constant 3.125000e-02 : f32
    %631 = vector.broadcast %cst_442 : f32 to vector<1x32xf32>
    %632 = arith.mulf %628, %631 : vector<1x32xf32>
    %633 = arith.mulf %630, %630 : vector<1x32xf32>
    %634 = arith.subf %632, %633 : vector<1x32xf32>
    %cst_443 = arith.constant 0.000000e+00 : f32
    %635 = vector.broadcast %cst_443 : f32 to vector<1x32xf32>
    %636 = arith.maximumf %634, %635 : vector<1x32xf32>
    %637 = vector.broadcast %630 : vector<1x32xf32> to vector<32x32xf32>
    %638 = arith.subf %623, %637 : vector<32x32xf32>
    %cst_444 = arith.constant 9.99999974E-6 : f32
    %639 = vector.broadcast %cst_444 : f32 to vector<1x32xf32>
    %640 = arith.addf %636, %639 : vector<1x32xf32>
    %641 = math.rsqrt %640 : vector<1x32xf32>
    %642 = vector.broadcast %641 : vector<1x32xf32> to vector<32x32xf32>
    %643 = arith.mulf %638, %642 : vector<32x32xf32>
    %644 = vector.broadcast %446 : vector<1x32xf32> to vector<32x32xf32>
    %645 = arith.mulf %643, %644 : vector<32x32xf32>
    %646 = vector.broadcast %448 : vector<1x32xf32> to vector<32x32xf32>
    %647 = arith.addf %645, %646 : vector<32x32xf32>
    %cst_445 = arith.constant 0.000000e+00 : f32
    %648 = vector.broadcast %cst_445 : f32 to vector<32x32xf32>
    %649 = arith.maximumf %647, %648 : vector<32x32xf32>
    %c0_446 = arith.constant 0 : index
    %c0_447 = arith.constant 0 : index
    %650 = vector.load %arg16[%c0_446, %c0_447] : memref<40x32xf32, #tpu.memory_space<vmem>>, vector<32x32xf32>
    tpu.vector_store %arg16[%c0_446, %c0_447], %649 {strides = array<i32>} : memref<40x32xf32, #tpu.memory_space<vmem>>, vector<32x32xf32>,
    %cst_448 = arith.constant 0.000000e+00 : f32
    %651 = vector.broadcast %cst_448 : f32 to vector<1x32xf32>
    %c0_449 = arith.constant 0 : index
    %652 = memref.load %arg1[%c0_449] : memref<32xi32, #tpu.memory_space<smem>>
    %653 = arith.index_cast %652 : i32 to index
    %c0_450 = arith.constant 0 : index
    %654 = vector.load %arg16[%653, %c0_450] : memref<40x32xf32, #tpu.memory_space<vmem>>, vector<1x32xf32>
    %655 = arith.addf %651, %654 : vector<1x32xf32>
    %c1_451 = arith.constant 1 : index
    %656 = memref.load %arg1[%c1_451] : memref<32xi32, #tpu.memory_space<smem>>
    %657 = arith.index_cast %656 : i32 to index
    %c0_452 = arith.constant 0 : index
    %658 = vector.load %arg16[%657, %c0_452] : memref<40x32xf32, #tpu.memory_space<vmem>>, vector<1x32xf32>
    %659 = arith.addf %655, %658 : vector<1x32xf32>
    %c2_453 = arith.constant 2 : index
    %660 = memref.load %arg1[%c2_453] : memref<32xi32, #tpu.memory_space<smem>>
    %661 = arith.index_cast %660 : i32 to index
    %c0_454 = arith.constant 0 : index
    %662 = vector.load %arg16[%661, %c0_454] : memref<40x32xf32, #tpu.memory_space<vmem>>, vector<1x32xf32>
    %663 = arith.addf %659, %662 : vector<1x32xf32>
    %c3_455 = arith.constant 3 : index
    %664 = memref.load %arg1[%c3_455] : memref<32xi32, #tpu.memory_space<smem>>
    %665 = arith.index_cast %664 : i32 to index
    %c0_456 = arith.constant 0 : index
    %666 = vector.load %arg16[%665, %c0_456] : memref<40x32xf32, #tpu.memory_space<vmem>>, vector<1x32xf32>
    %667 = arith.addf %663, %666 : vector<1x32xf32>
    %c0_457 = arith.constant 0 : index
    %c0_458 = arith.constant 0 : index
    %668 = vector.load %arg17[%c0_457, %c0_458] : memref<8x32xf32, #tpu.memory_space<vmem>>, vector<1x32xf32>
    tpu.vector_store %arg17[%c0_457, %c0_458], %667 {strides = array<i32>} : memref<8x32xf32, #tpu.memory_space<vmem>>, vector<1x32xf32>,
    %cst_459 = arith.constant 0.000000e+00 : f32
    %669 = vector.broadcast %cst_459 : f32 to vector<1x32xf32>
    %c4_460 = arith.constant 4 : index
    %670 = memref.load %arg1[%c4_460] : memref<32xi32, #tpu.memory_space<smem>>
    %671 = arith.index_cast %670 : i32 to index
    %c0_461 = arith.constant 0 : index
    %672 = vector.load %arg16[%671, %c0_461] : memref<40x32xf32, #tpu.memory_space<vmem>>, vector<1x32xf32>
    %673 = arith.addf %669, %672 : vector<1x32xf32>
    %c5_462 = arith.constant 5 : index
    %674 = memref.load %arg1[%c5_462] : memref<32xi32, #tpu.memory_space<smem>>
    %675 = arith.index_cast %674 : i32 to index
    %c0_463 = arith.constant 0 : index
    %676 = vector.load %arg16[%675, %c0_463] : memref<40x32xf32, #tpu.memory_space<vmem>>, vector<1x32xf32>
    %677 = arith.addf %673, %676 : vector<1x32xf32>
    %c6_464 = arith.constant 6 : index
    %678 = memref.load %arg1[%c6_464] : memref<32xi32, #tpu.memory_space<smem>>
    %679 = arith.index_cast %678 : i32 to index
    %c0_465 = arith.constant 0 : index
    %680 = vector.load %arg16[%679, %c0_465] : memref<40x32xf32, #tpu.memory_space<vmem>>, vector<1x32xf32>
    %681 = arith.addf %677, %680 : vector<1x32xf32>
    %c7_466 = arith.constant 7 : index
    %682 = memref.load %arg1[%c7_466] : memref<32xi32, #tpu.memory_space<smem>>
    %683 = arith.index_cast %682 : i32 to index
    %c0_467 = arith.constant 0 : index
    %684 = vector.load %arg16[%683, %c0_467] : memref<40x32xf32, #tpu.memory_space<vmem>>, vector<1x32xf32>
    %685 = arith.addf %681, %684 : vector<1x32xf32>
    %c1_468 = arith.constant 1 : index
    %c0_469 = arith.constant 0 : index
    %686 = vector.load %arg17[%c1_468, %c0_469] : memref<8x32xf32, #tpu.memory_space<vmem>>, vector<1x32xf32>
    tpu.vector_store %arg17[%c1_468, %c0_469], %685 {strides = array<i32>} : memref<8x32xf32, #tpu.memory_space<vmem>>, vector<1x32xf32>,
    %cst_470 = arith.constant 0.000000e+00 : f32
    %687 = vector.broadcast %cst_470 : f32 to vector<1x32xf32>
    %c8_471 = arith.constant 8 : index
    %688 = memref.load %arg1[%c8_471] : memref<32xi32, #tpu.memory_space<smem>>
    %689 = arith.index_cast %688 : i32 to index
    %c0_472 = arith.constant 0 : index
    %690 = vector.load %arg16[%689, %c0_472] : memref<40x32xf32, #tpu.memory_space<vmem>>, vector<1x32xf32>
    %691 = arith.addf %687, %690 : vector<1x32xf32>
    %c9_473 = arith.constant 9 : index
    %692 = memref.load %arg1[%c9_473] : memref<32xi32, #tpu.memory_space<smem>>
    %693 = arith.index_cast %692 : i32 to index
    %c0_474 = arith.constant 0 : index
    %694 = vector.load %arg16[%693, %c0_474] : memref<40x32xf32, #tpu.memory_space<vmem>>, vector<1x32xf32>
    %695 = arith.addf %691, %694 : vector<1x32xf32>
    %c10_475 = arith.constant 10 : index
    %696 = memref.load %arg1[%c10_475] : memref<32xi32, #tpu.memory_space<smem>>
    %697 = arith.index_cast %696 : i32 to index
    %c0_476 = arith.constant 0 : index
    %698 = vector.load %arg16[%697, %c0_476] : memref<40x32xf32, #tpu.memory_space<vmem>>, vector<1x32xf32>
    %699 = arith.addf %695, %698 : vector<1x32xf32>
    %c11_477 = arith.constant 11 : index
    %700 = memref.load %arg1[%c11_477] : memref<32xi32, #tpu.memory_space<smem>>
    %701 = arith.index_cast %700 : i32 to index
    %c0_478 = arith.constant 0 : index
    %702 = vector.load %arg16[%701, %c0_478] : memref<40x32xf32, #tpu.memory_space<vmem>>, vector<1x32xf32>
    %703 = arith.addf %699, %702 : vector<1x32xf32>
    %c2_479 = arith.constant 2 : index
    %c0_480 = arith.constant 0 : index
    %704 = vector.load %arg17[%c2_479, %c0_480] : memref<8x32xf32, #tpu.memory_space<vmem>>, vector<1x32xf32>
    tpu.vector_store %arg17[%c2_479, %c0_480], %703 {strides = array<i32>} : memref<8x32xf32, #tpu.memory_space<vmem>>, vector<1x32xf32>,
    %cst_481 = arith.constant 0.000000e+00 : f32
    %705 = vector.broadcast %cst_481 : f32 to vector<1x32xf32>
    %c12_482 = arith.constant 12 : index
    %706 = memref.load %arg1[%c12_482] : memref<32xi32, #tpu.memory_space<smem>>
    %707 = arith.index_cast %706 : i32 to index
    %c0_483 = arith.constant 0 : index
    %708 = vector.load %arg16[%707, %c0_483] : memref<40x32xf32, #tpu.memory_space<vmem>>, vector<1x32xf32>
    %709 = arith.addf %705, %708 : vector<1x32xf32>
    %c13_484 = arith.constant 13 : index
    %710 = memref.load %arg1[%c13_484] : memref<32xi32, #tpu.memory_space<smem>>
    %711 = arith.index_cast %710 : i32 to index
    %c0_485 = arith.constant 0 : index
    %712 = vector.load %arg16[%711, %c0_485] : memref<40x32xf32, #tpu.memory_space<vmem>>, vector<1x32xf32>
    %713 = arith.addf %709, %712 : vector<1x32xf32>
    %c14_486 = arith.constant 14 : index
    %714 = memref.load %arg1[%c14_486] : memref<32xi32, #tpu.memory_space<smem>>
    %715 = arith.index_cast %714 : i32 to index
    %c0_487 = arith.constant 0 : index
    %716 = vector.load %arg16[%715, %c0_487] : memref<40x32xf32, #tpu.memory_space<vmem>>, vector<1x32xf32>
    %717 = arith.addf %713, %716 : vector<1x32xf32>
    %c15_488 = arith.constant 15 : index
    %718 = memref.load %arg1[%c15_488] : memref<32xi32, #tpu.memory_space<smem>>
    %719 = arith.index_cast %718 : i32 to index
    %c0_489 = arith.constant 0 : index
    %720 = vector.load %arg16[%719, %c0_489] : memref<40x32xf32, #tpu.memory_space<vmem>>, vector<1x32xf32>
    %721 = arith.addf %717, %720 : vector<1x32xf32>
    %c3_490 = arith.constant 3 : index
    %c0_491 = arith.constant 0 : index
    %722 = vector.load %arg17[%c3_490, %c0_491] : memref<8x32xf32, #tpu.memory_space<vmem>>, vector<1x32xf32>
    tpu.vector_store %arg17[%c3_490, %c0_491], %721 {strides = array<i32>} : memref<8x32xf32, #tpu.memory_space<vmem>>, vector<1x32xf32>,
    %cst_492 = arith.constant 0.000000e+00 : f32
    %723 = vector.broadcast %cst_492 : f32 to vector<1x32xf32>
    %c16_493 = arith.constant 16 : index
    %724 = memref.load %arg1[%c16_493] : memref<32xi32, #tpu.memory_space<smem>>
    %725 = arith.index_cast %724 : i32 to index
    %c0_494 = arith.constant 0 : index
    %726 = vector.load %arg16[%725, %c0_494] : memref<40x32xf32, #tpu.memory_space<vmem>>, vector<1x32xf32>
    %727 = arith.addf %723, %726 : vector<1x32xf32>
    %c17_495 = arith.constant 17 : index
    %728 = memref.load %arg1[%c17_495] : memref<32xi32, #tpu.memory_space<smem>>
    %729 = arith.index_cast %728 : i32 to index
    %c0_496 = arith.constant 0 : index
    %730 = vector.load %arg16[%729, %c0_496] : memref<40x32xf32, #tpu.memory_space<vmem>>, vector<1x32xf32>
    %731 = arith.addf %727, %730 : vector<1x32xf32>
    %c18_497 = arith.constant 18 : index
    %732 = memref.load %arg1[%c18_497] : memref<32xi32, #tpu.memory_space<smem>>
    %733 = arith.index_cast %732 : i32 to index
    %c0_498 = arith.constant 0 : index
    %734 = vector.load %arg16[%733, %c0_498] : memref<40x32xf32, #tpu.memory_space<vmem>>, vector<1x32xf32>
    %735 = arith.addf %731, %734 : vector<1x32xf32>
    %c19_499 = arith.constant 19 : index
    %736 = memref.load %arg1[%c19_499] : memref<32xi32, #tpu.memory_space<smem>>
    %737 = arith.index_cast %736 : i32 to index
    %c0_500 = arith.constant 0 : index
    %738 = vector.load %arg16[%737, %c0_500] : memref<40x32xf32, #tpu.memory_space<vmem>>, vector<1x32xf32>
    %739 = arith.addf %735, %738 : vector<1x32xf32>
    %c4_501 = arith.constant 4 : index
    %c0_502 = arith.constant 0 : index
    %740 = vector.load %arg17[%c4_501, %c0_502] : memref<8x32xf32, #tpu.memory_space<vmem>>, vector<1x32xf32>
    tpu.vector_store %arg17[%c4_501, %c0_502], %739 {strides = array<i32>} : memref<8x32xf32, #tpu.memory_space<vmem>>, vector<1x32xf32>,
    %cst_503 = arith.constant 0.000000e+00 : f32
    %741 = vector.broadcast %cst_503 : f32 to vector<1x32xf32>
    %c20_504 = arith.constant 20 : index
    %742 = memref.load %arg1[%c20_504] : memref<32xi32, #tpu.memory_space<smem>>
    %743 = arith.index_cast %742 : i32 to index
    %c0_505 = arith.constant 0 : index
    %744 = vector.load %arg16[%743, %c0_505] : memref<40x32xf32, #tpu.memory_space<vmem>>, vector<1x32xf32>
    %745 = arith.addf %741, %744 : vector<1x32xf32>
    %c21_506 = arith.constant 21 : index
    %746 = memref.load %arg1[%c21_506] : memref<32xi32, #tpu.memory_space<smem>>
    %747 = arith.index_cast %746 : i32 to index
    %c0_507 = arith.constant 0 : index
    %748 = vector.load %arg16[%747, %c0_507] : memref<40x32xf32, #tpu.memory_space<vmem>>, vector<1x32xf32>
    %749 = arith.addf %745, %748 : vector<1x32xf32>
    %c22_508 = arith.constant 22 : index
    %750 = memref.load %arg1[%c22_508] : memref<32xi32, #tpu.memory_space<smem>>
    %751 = arith.index_cast %750 : i32 to index
    %c0_509 = arith.constant 0 : index
    %752 = vector.load %arg16[%751, %c0_509] : memref<40x32xf32, #tpu.memory_space<vmem>>, vector<1x32xf32>
    %753 = arith.addf %749, %752 : vector<1x32xf32>
    %c23_510 = arith.constant 23 : index
    %754 = memref.load %arg1[%c23_510] : memref<32xi32, #tpu.memory_space<smem>>
    %755 = arith.index_cast %754 : i32 to index
    %c0_511 = arith.constant 0 : index
    %756 = vector.load %arg16[%755, %c0_511] : memref<40x32xf32, #tpu.memory_space<vmem>>, vector<1x32xf32>
    %757 = arith.addf %753, %756 : vector<1x32xf32>
    %c5_512 = arith.constant 5 : index
    %c0_513 = arith.constant 0 : index
    %758 = vector.load %arg17[%c5_512, %c0_513] : memref<8x32xf32, #tpu.memory_space<vmem>>, vector<1x32xf32>
    tpu.vector_store %arg17[%c5_512, %c0_513], %757 {strides = array<i32>} : memref<8x32xf32, #tpu.memory_space<vmem>>, vector<1x32xf32>,
    %cst_514 = arith.constant 0.000000e+00 : f32
    %759 = vector.broadcast %cst_514 : f32 to vector<1x32xf32>
    %c24_515 = arith.constant 24 : index
    %760 = memref.load %arg1[%c24_515] : memref<32xi32, #tpu.memory_space<smem>>
    %761 = arith.index_cast %760 : i32 to index
    %c0_516 = arith.constant 0 : index
    %762 = vector.load %arg16[%761, %c0_516] : memref<40x32xf32, #tpu.memory_space<vmem>>, vector<1x32xf32>
    %763 = arith.addf %759, %762 : vector<1x32xf32>
    %c25_517 = arith.constant 25 : index
    %764 = memref.load %arg1[%c25_517] : memref<32xi32, #tpu.memory_space<smem>>
    %765 = arith.index_cast %764 : i32 to index
    %c0_518 = arith.constant 0 : index
    %766 = vector.load %arg16[%765, %c0_518] : memref<40x32xf32, #tpu.memory_space<vmem>>, vector<1x32xf32>
    %767 = arith.addf %763, %766 : vector<1x32xf32>
    %c26_519 = arith.constant 26 : index
    %768 = memref.load %arg1[%c26_519] : memref<32xi32, #tpu.memory_space<smem>>
    %769 = arith.index_cast %768 : i32 to index
    %c0_520 = arith.constant 0 : index
    %770 = vector.load %arg16[%769, %c0_520] : memref<40x32xf32, #tpu.memory_space<vmem>>, vector<1x32xf32>
    %771 = arith.addf %767, %770 : vector<1x32xf32>
    %c27_521 = arith.constant 27 : index
    %772 = memref.load %arg1[%c27_521] : memref<32xi32, #tpu.memory_space<smem>>
    %773 = arith.index_cast %772 : i32 to index
    %c0_522 = arith.constant 0 : index
    %774 = vector.load %arg16[%773, %c0_522] : memref<40x32xf32, #tpu.memory_space<vmem>>, vector<1x32xf32>
    %775 = arith.addf %771, %774 : vector<1x32xf32>
    %c6_523 = arith.constant 6 : index
    %c0_524 = arith.constant 0 : index
    %776 = vector.load %arg17[%c6_523, %c0_524] : memref<8x32xf32, #tpu.memory_space<vmem>>, vector<1x32xf32>
    tpu.vector_store %arg17[%c6_523, %c0_524], %775 {strides = array<i32>} : memref<8x32xf32, #tpu.memory_space<vmem>>, vector<1x32xf32>,
    %cst_525 = arith.constant 0.000000e+00 : f32
    %777 = vector.broadcast %cst_525 : f32 to vector<1x32xf32>
    %c28_526 = arith.constant 28 : index
    %778 = memref.load %arg1[%c28_526] : memref<32xi32, #tpu.memory_space<smem>>
    %779 = arith.index_cast %778 : i32 to index
    %c0_527 = arith.constant 0 : index
    %780 = vector.load %arg16[%779, %c0_527] : memref<40x32xf32, #tpu.memory_space<vmem>>, vector<1x32xf32>
    %781 = arith.addf %777, %780 : vector<1x32xf32>
    %c29_528 = arith.constant 29 : index
    %782 = memref.load %arg1[%c29_528] : memref<32xi32, #tpu.memory_space<smem>>
    %783 = arith.index_cast %782 : i32 to index
    %c0_529 = arith.constant 0 : index
    %784 = vector.load %arg16[%783, %c0_529] : memref<40x32xf32, #tpu.memory_space<vmem>>, vector<1x32xf32>
    %785 = arith.addf %781, %784 : vector<1x32xf32>
    %c30_530 = arith.constant 30 : index
    %786 = memref.load %arg1[%c30_530] : memref<32xi32, #tpu.memory_space<smem>>
    %787 = arith.index_cast %786 : i32 to index
    %c0_531 = arith.constant 0 : index
    %788 = vector.load %arg16[%787, %c0_531] : memref<40x32xf32, #tpu.memory_space<vmem>>, vector<1x32xf32>
    %789 = arith.addf %785, %788 : vector<1x32xf32>
    %c31_532 = arith.constant 31 : index
    %790 = memref.load %arg1[%c31_532] : memref<32xi32, #tpu.memory_space<smem>>
    %791 = arith.index_cast %790 : i32 to index
    %c0_533 = arith.constant 0 : index
    %792 = vector.load %arg16[%791, %c0_533] : memref<40x32xf32, #tpu.memory_space<vmem>>, vector<1x32xf32>
    %793 = arith.addf %789, %792 : vector<1x32xf32>
    %c7_534 = arith.constant 7 : index
    %c0_535 = arith.constant 0 : index
    %794 = vector.load %arg17[%c7_534, %c0_535] : memref<8x32xf32, #tpu.memory_space<vmem>>, vector<1x32xf32>
    tpu.vector_store %arg17[%c7_534, %c0_535], %793 {strides = array<i32>} : memref<8x32xf32, #tpu.memory_space<vmem>>, vector<1x32xf32>,
    %c0_536 = arith.constant 0 : index
    %c0_537 = arith.constant 0 : index
    %795 = vector.load %arg17[%c0_536, %c0_537] : memref<8x32xf32, #tpu.memory_space<vmem>>, vector<8x32xf32>
    %796 = vector.extract_strided_slice %434 {offsets = [96, 0], sizes = [32, 64], strides = [1, 1]} : vector<160x64xbf16> to vector<32x64xbf16>
    %797 = arith.truncf %431 : vector<8x32xf32> to vector<8x32xbf16>
    %cst_538 = arith.constant dense<0.000000e+00> : vector<8x64xf32>
    %798 = tpu.matmul %797, %796, %cst_538 {dimension_numbers = #tpu.dot_dimension_numbers<[1], [0], [0], [1], [0, 0, 1, 1], [], []>} : vector<8x32xbf16>, vector<32x64xbf16>, vector<8x64xf32> -> vector<8x64xf32>
    %799 = vector.extract_strided_slice %434 {offsets = [128, 0], sizes = [32, 64], strides = [1, 1]} : vector<160x64xbf16> to vector<32x64xbf16>
    %800 = arith.truncf %795 : vector<8x32xf32> to vector<8x32xbf16>
    %cst_539 = arith.constant dense<0.000000e+00> : vector<8x64xf32>
    %801 = tpu.matmul %800, %799, %cst_539 {dimension_numbers = #tpu.dot_dimension_numbers<[1], [0], [0], [1], [0, 0, 1, 1], [], []>} : vector<8x32xbf16>, vector<32x64xbf16>, vector<8x64xf32> -> vector<8x64xf32>
    %802 = arith.addf %798, %801 : vector<8x64xf32>
    %cst_540 = arith.constant dense<0.000000e+00> : vector<64xf32>
    %803 = vector.multi_reduction <add>, %802, %cst_540 [0] : vector<8x64xf32> to vector<64xf32>
    %804 = vector.shape_cast %803 : vector<64xf32> to vector<1x64xf32>
    %805 = arith.mulf %802, %802 : vector<8x64xf32>
    %cst_541 = arith.constant dense<0.000000e+00> : vector<64xf32>
    %806 = vector.multi_reduction <add>, %805, %cst_541 [0] : vector<8x64xf32> to vector<64xf32>
    %807 = vector.shape_cast %806 : vector<64xf32> to vector<1x64xf32>
    %cst_542 = arith.constant 1.250000e-01 : f32
    %808 = vector.broadcast %cst_542 : f32 to vector<1x64xf32>
    %809 = arith.mulf %804, %808 : vector<1x64xf32>
    %cst_543 = arith.constant 1.250000e-01 : f32
    %810 = vector.broadcast %cst_543 : f32 to vector<1x64xf32>
    %811 = arith.mulf %807, %810 : vector<1x64xf32>
    %812 = arith.mulf %809, %809 : vector<1x64xf32>
    %813 = arith.subf %811, %812 : vector<1x64xf32>
    %cst_544 = arith.constant 0.000000e+00 : f32
    %814 = vector.broadcast %cst_544 : f32 to vector<1x64xf32>
    %815 = arith.maximumf %813, %814 : vector<1x64xf32>
    %816 = vector.broadcast %809 : vector<1x64xf32> to vector<8x64xf32>
    %817 = arith.subf %802, %816 : vector<8x64xf32>
    %cst_545 = arith.constant 9.99999974E-6 : f32
    %818 = vector.broadcast %cst_545 : f32 to vector<1x64xf32>
    %819 = arith.addf %815, %818 : vector<1x64xf32>
    %820 = math.rsqrt %819 : vector<1x64xf32>
    %821 = vector.broadcast %820 : vector<1x64xf32> to vector<8x64xf32>
    %822 = arith.mulf %817, %821 : vector<8x64xf32>
    %823 = vector.broadcast %442 : vector<1x64xf32> to vector<8x64xf32>
    %824 = arith.mulf %822, %823 : vector<8x64xf32>
    %825 = vector.broadcast %444 : vector<1x64xf32> to vector<8x64xf32>
    %826 = arith.addf %824, %825 : vector<8x64xf32>
    %cst_546 = arith.constant 0.000000e+00 : f32
    %827 = vector.broadcast %cst_546 : f32 to vector<8x64xf32>
    %828 = arith.maximumf %826, %827 : vector<8x64xf32>
    %829 = vector.extract_strided_slice %436 {offsets = [64, 0], sizes = [64, 32], strides = [1, 1]} : vector<128x32xbf16> to vector<64x32xbf16>
    %830 = arith.truncf %828 : vector<8x64xf32> to vector<8x64xbf16>
    %cst_547 = arith.constant dense<0.000000e+00> : vector<8x32xf32>
    %831 = tpu.matmul %830, %829, %cst_547 {dimension_numbers = #tpu.dot_dimension_numbers<[1], [0], [0], [1], [0, 0, 1, 1], [], []>} : vector<8x64xbf16>, vector<64x32xbf16>, vector<8x32xf32> -> vector<8x32xf32>
    %cst_548 = arith.constant dense<0.000000e+00> : vector<32xf32>
    %832 = vector.multi_reduction <add>, %831, %cst_548 [0] : vector<8x32xf32> to vector<32xf32>
    %833 = vector.shape_cast %832 : vector<32xf32> to vector<1x32xf32>
    %834 = arith.mulf %831, %831 : vector<8x32xf32>
    %cst_549 = arith.constant dense<0.000000e+00> : vector<32xf32>
    %835 = vector.multi_reduction <add>, %834, %cst_549 [0] : vector<8x32xf32> to vector<32xf32>
    %836 = vector.shape_cast %835 : vector<32xf32> to vector<1x32xf32>
    %cst_550 = arith.constant 1.250000e-01 : f32
    %837 = vector.broadcast %cst_550 : f32 to vector<1x32xf32>
    %838 = arith.mulf %833, %837 : vector<1x32xf32>
    %cst_551 = arith.constant 1.250000e-01 : f32
    %839 = vector.broadcast %cst_551 : f32 to vector<1x32xf32>
    %840 = arith.mulf %836, %839 : vector<1x32xf32>
    %841 = arith.mulf %838, %838 : vector<1x32xf32>
    %842 = arith.subf %840, %841 : vector<1x32xf32>
    %cst_552 = arith.constant 0.000000e+00 : f32
    %843 = vector.broadcast %cst_552 : f32 to vector<1x32xf32>
    %844 = arith.maximumf %842, %843 : vector<1x32xf32>
    %845 = vector.broadcast %838 : vector<1x32xf32> to vector<8x32xf32>
    %846 = arith.subf %831, %845 : vector<8x32xf32>
    %cst_553 = arith.constant 9.99999974E-6 : f32
    %847 = vector.broadcast %cst_553 : f32 to vector<1x32xf32>
    %848 = arith.addf %844, %847 : vector<1x32xf32>
    %849 = math.rsqrt %848 : vector<1x32xf32>
    %850 = vector.broadcast %849 : vector<1x32xf32> to vector<8x32xf32>
    %851 = arith.mulf %846, %850 : vector<8x32xf32>
    %852 = vector.broadcast %450 : vector<1x32xf32> to vector<8x32xf32>
    %853 = arith.mulf %851, %852 : vector<8x32xf32>
    %854 = vector.broadcast %452 : vector<1x32xf32> to vector<8x32xf32>
    %855 = arith.addf %853, %854 : vector<8x32xf32>
    %cst_554 = arith.constant 0.000000e+00 : f32
    %856 = vector.broadcast %cst_554 : f32 to vector<8x32xf32>
    %857 = arith.maximumf %855, %856 : vector<8x32xf32>
    %c0_555 = arith.constant 0 : index
    %c0_556 = arith.constant 0 : index
    %858 = vector.load %arg14[%c0_555, %c0_556] : memref<8x32xf32, #tpu.memory_space<vmem>>, vector<8x32xf32>
    tpu.vector_store %arg14[%c0_555, %c0_556], %857 {strides = array<i32>} : memref<8x32xf32, #tpu.memory_space<vmem>>, vector<8x32xf32>,
    %c0_557 = arith.constant 0 : index
    %c0_558 = arith.constant 0 : index
    %859 = vector.load %arg4[%c0_557, %c0_558] : memref<2x8xbf16, #tpu.memory_space<vmem>>, vector<2x8xbf16>
    %860 = arith.truncf %857 : vector<8x32xf32> to vector<8x32xbf16>
    %cst_559 = arith.constant dense<0.000000e+00> : vector<2x32xf32>
    %861 = tpu.matmul %859, %860, %cst_559 {dimension_numbers = #tpu.dot_dimension_numbers<[1], [0], [0], [1], [0, 0, 1, 1], [], []>} : vector<2x8xbf16>, vector<8x32xbf16>, vector<2x32xf32> -> vector<2x32xf32>
    %862 = arith.truncf %795 : vector<8x32xf32> to vector<8x32xbf16>
    %cst_560 = arith.constant dense<0.000000e+00> : vector<2x32xf32>
    %863 = tpu.matmul %859, %862, %cst_560 {dimension_numbers = #tpu.dot_dimension_numbers<[1], [0], [0], [1], [0, 0, 1, 1], [], []>} : vector<2x8xbf16>, vector<8x32xbf16>, vector<2x32xf32> -> vector<2x32xf32>
    %c0_561 = arith.constant 0 : index
    %c0_562 = arith.constant 0 : index
    %864 = vector.load %arg9[%c0_561, %c0_562] : memref<128x64xbf16, #tpu.memory_space<vmem>>, vector<128x64xbf16>
    %865 = vector.extract_strided_slice %864 {offsets = [0, 0], sizes = [32, 64], strides = [1, 1]} : vector<128x64xbf16> to vector<32x64xbf16>
    %866 = arith.truncf %861 : vector<2x32xf32> to vector<2x32xbf16>
    %cst_563 = arith.constant dense<0.000000e+00> : vector<2x64xf32>
    %867 = tpu.matmul %866, %865, %cst_563 {dimension_numbers = #tpu.dot_dimension_numbers<[1], [0], [0], [1], [0, 0, 1, 1], [], []>} : vector<2x32xbf16>, vector<32x64xbf16>, vector<2x64xf32> -> vector<2x64xf32>
    %868 = vector.extract_strided_slice %864 {offsets = [32, 0], sizes = [32, 64], strides = [1, 1]} : vector<128x64xbf16> to vector<32x64xbf16>
    %869 = arith.truncf %863 : vector<2x32xf32> to vector<2x32xbf16>
    %cst_564 = arith.constant dense<0.000000e+00> : vector<2x64xf32>
    %870 = tpu.matmul %869, %868, %cst_564 {dimension_numbers = #tpu.dot_dimension_numbers<[1], [0], [0], [1], [0, 0, 1, 1], [], []>} : vector<2x32xbf16>, vector<32x64xbf16>, vector<2x64xf32> -> vector<2x64xf32>
    %871 = arith.addf %867, %870 : vector<2x64xf32>
    %c0_565 = arith.constant 0 : index
    %c0_566 = arith.constant 0 : index
    %872 = vector.load %arg10[%c0_565, %c0_566] : memref<4x64xf32, #tpu.memory_space<vmem>>, vector<1x64xf32>
    %c1_567 = arith.constant 1 : index
    %c0_568 = arith.constant 0 : index
    %873 = vector.load %arg10[%c1_567, %c0_568] : memref<4x64xf32, #tpu.memory_space<vmem>>, vector<1x64xf32>
    %cst_569 = arith.constant dense<0.000000e+00> : vector<64xf32>
    %874 = vector.multi_reduction <add>, %871, %cst_569 [0] : vector<2x64xf32> to vector<64xf32>
    %875 = vector.shape_cast %874 : vector<64xf32> to vector<1x64xf32>
    %876 = arith.mulf %871, %871 : vector<2x64xf32>
    %cst_570 = arith.constant dense<0.000000e+00> : vector<64xf32>
    %877 = vector.multi_reduction <add>, %876, %cst_570 [0] : vector<2x64xf32> to vector<64xf32>
    %878 = vector.shape_cast %877 : vector<64xf32> to vector<1x64xf32>
    %cst_571 = arith.constant 5.000000e-01 : f32
    %879 = vector.broadcast %cst_571 : f32 to vector<1x64xf32>
    %880 = arith.mulf %875, %879 : vector<1x64xf32>
    %cst_572 = arith.constant 5.000000e-01 : f32
    %881 = vector.broadcast %cst_572 : f32 to vector<1x64xf32>
    %882 = arith.mulf %878, %881 : vector<1x64xf32>
    %883 = arith.mulf %880, %880 : vector<1x64xf32>
    %884 = arith.subf %882, %883 : vector<1x64xf32>
    %cst_573 = arith.constant 0.000000e+00 : f32
    %885 = vector.broadcast %cst_573 : f32 to vector<1x64xf32>
    %886 = arith.maximumf %884, %885 : vector<1x64xf32>
    %887 = vector.broadcast %880 : vector<1x64xf32> to vector<2x64xf32>
    %888 = arith.subf %871, %887 : vector<2x64xf32>
    %cst_574 = arith.constant 9.99999974E-6 : f32
    %889 = vector.broadcast %cst_574 : f32 to vector<1x64xf32>
    %890 = arith.addf %886, %889 : vector<1x64xf32>
    %891 = math.rsqrt %890 : vector<1x64xf32>
    %892 = vector.broadcast %891 : vector<1x64xf32> to vector<2x64xf32>
    %893 = arith.mulf %888, %892 : vector<2x64xf32>
    %894 = vector.broadcast %872 : vector<1x64xf32> to vector<2x64xf32>
    %895 = arith.mulf %893, %894 : vector<2x64xf32>
    %896 = vector.broadcast %873 : vector<1x64xf32> to vector<2x64xf32>
    %897 = arith.addf %895, %896 : vector<2x64xf32>
    %cst_575 = arith.constant 0.000000e+00 : f32
    %898 = vector.broadcast %cst_575 : f32 to vector<2x64xf32>
    %899 = arith.maximumf %897, %898 : vector<2x64xf32>
    %900 = vector.extract_strided_slice %864 {offsets = [64, 0], sizes = [64, 64], strides = [1, 1]} : vector<128x64xbf16> to vector<64x64xbf16>
    %901 = arith.truncf %899 : vector<2x64xf32> to vector<2x64xbf16>
    %cst_576 = arith.constant dense<0.000000e+00> : vector<2x64xf32>
    %902 = tpu.matmul %901, %900, %cst_576 {dimension_numbers = #tpu.dot_dimension_numbers<[1], [0], [0], [1], [0, 0, 1, 1], [], []>} : vector<2x64xbf16>, vector<64x64xbf16>, vector<2x64xf32> -> vector<2x64xf32>
    %c2_577 = arith.constant 2 : index
    %c0_578 = arith.constant 0 : index
    %903 = vector.load %arg10[%c2_577, %c0_578] : memref<4x64xf32, #tpu.memory_space<vmem>>, vector<1x64xf32>
    %c3_579 = arith.constant 3 : index
    %c0_580 = arith.constant 0 : index
    %904 = vector.load %arg10[%c3_579, %c0_580] : memref<4x64xf32, #tpu.memory_space<vmem>>, vector<1x64xf32>
    %cst_581 = arith.constant dense<0.000000e+00> : vector<64xf32>
    %905 = vector.multi_reduction <add>, %902, %cst_581 [0] : vector<2x64xf32> to vector<64xf32>
    %906 = vector.shape_cast %905 : vector<64xf32> to vector<1x64xf32>
    %907 = arith.mulf %902, %902 : vector<2x64xf32>
    %cst_582 = arith.constant dense<0.000000e+00> : vector<64xf32>
    %908 = vector.multi_reduction <add>, %907, %cst_582 [0] : vector<2x64xf32> to vector<64xf32>
    %909 = vector.shape_cast %908 : vector<64xf32> to vector<1x64xf32>
    %cst_583 = arith.constant 5.000000e-01 : f32
    %910 = vector.broadcast %cst_583 : f32 to vector<1x64xf32>
    %911 = arith.mulf %906, %910 : vector<1x64xf32>
    %cst_584 = arith.constant 5.000000e-01 : f32
    %912 = vector.broadcast %cst_584 : f32 to vector<1x64xf32>
    %913 = arith.mulf %909, %912 : vector<1x64xf32>
    %914 = arith.mulf %911, %911 : vector<1x64xf32>
    %915 = arith.subf %913, %914 : vector<1x64xf32>
    %cst_585 = arith.constant 0.000000e+00 : f32
    %916 = vector.broadcast %cst_585 : f32 to vector<1x64xf32>
    %917 = arith.maximumf %915, %916 : vector<1x64xf32>
    %918 = vector.broadcast %911 : vector<1x64xf32> to vector<2x64xf32>
    %919 = arith.subf %902, %918 : vector<2x64xf32>
    %cst_586 = arith.constant 9.99999974E-6 : f32
    %920 = vector.broadcast %cst_586 : f32 to vector<1x64xf32>
    %921 = arith.addf %917, %920 : vector<1x64xf32>
    %922 = math.rsqrt %921 : vector<1x64xf32>
    %923 = vector.broadcast %922 : vector<1x64xf32> to vector<2x64xf32>
    %924 = arith.mulf %919, %923 : vector<2x64xf32>
    %925 = vector.broadcast %903 : vector<1x64xf32> to vector<2x64xf32>
    %926 = arith.mulf %924, %925 : vector<2x64xf32>
    %927 = vector.broadcast %904 : vector<1x64xf32> to vector<2x64xf32>
    %928 = arith.addf %926, %927 : vector<2x64xf32>
    %cst_587 = arith.constant 0.000000e+00 : f32
    %929 = vector.broadcast %cst_587 : f32 to vector<2x64xf32>
    %930 = arith.maximumf %928, %929 : vector<2x64xf32>
    %c0_588 = arith.constant 0 : index
    %c0_589 = arith.constant 0 : index
    %931 = vector.load %arg11[%c0_588, %c0_589] : memref<64x8xbf16, #tpu.memory_space<vmem>>, vector<64x8xbf16>
    %932 = arith.truncf %930 : vector<2x64xf32> to vector<2x64xbf16>
    %cst_590 = arith.constant dense<0.000000e+00> : vector<2x8xf32>
    %933 = tpu.matmul %932, %931, %cst_590 {dimension_numbers = #tpu.dot_dimension_numbers<[1], [0], [0], [1], [0, 0, 1, 1], [], []>} : vector<2x64xbf16>, vector<64x8xbf16>, vector<2x8xf32> -> vector<2x8xf32>
    %c0_591 = arith.constant 0 : index
    %c0_592 = arith.constant 0 : index
    %934 = vector.load %arg12[%c0_591, %c0_592] : memref<1x8xf32, #tpu.memory_space<vmem>>, vector<1x8xf32>
    %935 = vector.broadcast %934 : vector<1x8xf32> to vector<2x8xf32>
    %936 = arith.addf %933, %935 : vector<2x8xf32>
    %c0_593 = arith.constant 0 : index
    %c0_594 = arith.constant 0 : index
    %937 = vector.load %arg13[%c0_593, %c0_594] : memref<2x8xf32, #tpu.memory_space<vmem>>, vector<2x8xf32>
    tpu.vector_store %arg13[%c0_593, %c0_594], %936 {strides = array<i32>} : memref<2x8xf32, #tpu.memory_space<vmem>>, vector<2x8xf32>,
    return
  }
}

</mosaic_0001>

<bundles_post_ra>
// kernel: tpu_custom_call.1
= control target key start
LH: loop header
LB: loop body
LE: loop exit
PB: predicated region body
PF: predicated region fallthrough
CT: control target
= control target key end

     0   :  { %s3504_s0 = inlined_call_operand.vmem [shape: s32[32], index: 0, kind: input, shape index: {}]   ;;  %s3505_s1 = inlined_call_operand.vmem [shape: s32[32], index: 1, kind: input, shape index: {}]   ;;  %s3506_s2 = inlined_call_operand.vmem [shape: f32[8,32], index: 2, kind: input, shape index: {}]   ;;  %s3507_s3 = inlined_call_operand.vmem [shape: f32[16,32], index: 3, kind: input, shape index: {}]   ;;  %s3508_s4 = inlined_call_operand.vmem [shape: bf16[2,8], index: 4, kind: input, shape index: {}]   ;;  %s3509_s5 = inlined_call_operand.vmem [shape: bf16[2,160,64], index: 5, kind: input, shape index: {}]   ;;  %s3510_s6 = inlined_call_operand.vmem [shape: bf16[2,128,32], index: 6, kind: input, shape index: {}]   ;;  %s3511_s7 = inlined_call_operand.vmem [shape: f32[2,4,64], index: 7, kind: input, shape index: {}]   ;;  %s3512_s8 = inlined_call_operand.vmem [shape: f32[2,4,32], index: 8, kind: input, shape index: {}]   ;;  %s3513_s9 = inlined_call_operand.vmem [shape: bf16[128,64], index: 9, kind: input, shape index: {}]   ;;  %s3514_s10 = inlined_call_operand.vmem [shape: f32[4,64], index: 10, kind: input, shape index: {}]   ;;  %s3515_s11 = inlined_call_operand.vmem [shape: bf16[64,8], index: 11, kind: input, shape index: {}]   ;;  %s3516_s12 = inlined_call_operand.vmem [shape: f32[1,8], index: 12, kind: input, shape index: {}]   ;;  %s3517_s13 = inlined_call_operand.hbm [shape: f32[2,8], index: 13, kind: output, shape index: {}]  }
   0x1   :  { %3530 = sst [smem:[#allocation25_spill]] %s3508_s4 }
   0x2   :  { %3531 = sst [smem:[#allocation26_spill]] %s3510_s6 }
   0x3   :  { %3532 = sst [smem:[#allocation27_spill]] %s3511_s7 }
   0x4   :  { %3533 = sst [smem:[#allocation28_spill]] %s3512_s8 }
   0x5   :  { %3534 = sst [smem:[#allocation29_spill]] %s3513_s9 }
   0x6   :  { %3535 = sst [smem:[#allocation30_spill]] %s3514_s10 }
   0x7   :  { %3536 = sst [smem:[#allocation31_spill]] %s3515_s11 }
   0x8   :  { %3537 = sst [smem:[#allocation32_spill]] %s3516_s12 }
   0x9   :  { %3538 = sst [smem:[#allocation33_spill]] %s3517_s13 }
   0xa   :  { %18 = vsyncpa [#allocation8], 0 }
   0xb   :  { %19 = vsyncpa [#allocation10], 0 }
   0xc   :  { %20 = vsyncpa [#allocation7], 0  ;;  %s26_s27 = sshll.u32 %s3504_s0, 4  ;;  %s35_s30 = sshll.u32 %s3505_s1, 4  ;;  %s27_s27 = int_to_ptr.vmem [resolvable:$true] %s26_s27  ;;  %s36_s30 = int_to_ptr.vmem [resolvable:$true] %s35_s30 }
   0xd   :  { %s2650_s14 = smov [#allocation6]   ;;  %s2651_s15 = smov [#allocation9]  }
   0xe   :  { %29 = dma.vmem_to_smem %s27_s27, 16, %s2650_s14, [#allocation8]  }
   0xf   :  { %38 = dma.vmem_to_smem %s36_s30, 16, %s2651_s15, [#allocation10]  }
  0x10   :  { %2644 = dma.done.wait [#allocation8], 16  }
  0x11   :  { %2645 = vsyncadd [#allocation8], 4294967280 }
  0x12   :  { %2646 = dma.done.wait [#allocation10], 16  }
  0x13   :  { %2647 = vsyncadd [#allocation10], 4294967280 }
  0x14   :  { %69 = sfence }
  0x15   :  { %v2504_v0 = vld [vmem:[%s3509_s5 + $0x8] sm:$0xff]  ;;  %v2506_v1 = vld [vmem:[%s3509_s5 + $0x18] sm:$0xff]  ;;  %vm71_vm0 = vcmask 261120   ;;  %s126_s20 = sld [smem:[#allocation6]]  ;;  %v2503_v3 = vld [vmem:[%s3509_s5] sm:$0xff]  ;;  %vm129_vm1 = vcmask 253952  }
  0x16   :  { %v2508_v2 = vld [vmem:[%s3509_s5 + $0x28] sm:$0xff]  ;;  %v2505_v4 = vld [vmem:[%s3509_s5 + $0x10] sm:$0xff]  ;;  %s2116_s25 = sld [smem:[#allocation6 + $0x1]]  ;;  %283 = vmatpush.bf16.msra.mxu0 %v2504_v0  ;;  %317 = vmatpush.bf16.msra.mxu1 %v2506_v1  ;;  %v79_v5 = vld [vmem:[%s3507_s3] sm:$0xff]  ;;  %vm373_vm2 = vcmask 523264  }
  0x17   :  { %v80_v6 = vld [vmem:[%s3507_s3 + $0x8] sm:$0xff]  ;;  %v2754_v7 = vld [vmem:[%s3506_s2] sm:$0xff]  ;;  %s2117_s15 = sld [smem:[#allocation6 + $0x2]]  ;;  %356 = vmatpush.bf16.msra.mxu2 %v2508_v2 }
  0x18   :  { %v2507_v8 = vld [vmem:[%s3509_s5 + $0x20] sm:$0xff]  ;;  %78 = vst.msk [vmem:[#allocation2] sm:$0xff] %vm71_vm0, %v2754_v7  ;;  %s2118_s0 = sld [smem:[#allocation6 + $0x3]]  ;;  %v261_v9 = vpack.c.bf16 %v80_v6, %v79_v5 }
  0x19   :  { %s2119_s18 = sld [smem:[#allocation6 + $0x4]] }
  0x1a   :  { %s2120_s19 = sld [smem:[#allocation6 + $0x5]]  ;;  %284 = vmatpush.bf16.msra.mxu0 %v2503_v3  ;;  %318 = vmatpush.bf16.msra.mxu1 %v2505_v4 }
  0x1b   :  { %s2121_s3 = sld [smem:[#allocation6 + $0x6]]  ;;  %357 = vmatpush.bf16.msra.mxu2 %v2507_v8  ;;  %s127_s22 = scalar_lea.vmem [#allocation2], %s126_s20 }
  0x1c   :  { %s2122_s1 = sld [smem:[#allocation6 + $0x7]]  ;;  %s132_s23 = scalar_lea.vmem [#allocation2], %s2116_s25 }
  0x1d   :  { %s2123_s2 = sld [smem:[#allocation6 + $0x8]]  ;;  %2155 = vmatmul.msk.bf16.vlgmr.msra.gmra.mxu0 %vm71_vm0, %v261_v9  ;;  %s136_s24 = scalar_lea.vmem [#allocation2], %s2117_s15 }
  0x1e   :  { %s2124_s21 = sld [smem:[#allocation6 + $0x9]]  ;;  %s140_s26 = scalar_lea.vmem [#allocation2], %s2118_s0 }
  0x1f   :  { %v128_v10 = vld [vmem:[%s127_s22] sm:$0x1]  ;;  %s144_s27 = scalar_lea.vmem [#allocation2], %s2119_s18  ;;  %s2125_s14 = sld [smem:[#allocation6 + $0xa]] }
  0x20   :  { %v133_v11 = vld [vmem:[%s132_s23] sm:$0x1]  ;;  %130 = vst.msk [vmem:[#allocation3] sm:$0x1] %vm129_vm1, %v128_v10  ;;  %s148_s28 = scalar_lea.vmem [#allocation2], %s2120_s19  ;;  %s2126_s15 = sld [smem:[#allocation6 + $0xb]] }
  0x21   :  { %v137_v12 = vld [vmem:[%s136_s24] sm:$0x1]  ;;  %134 = vst.msk [vmem:[#allocation3 + $0x1] sm:$0x1] %vm129_vm1, %v133_v11  ;;  %s152_s20 = scalar_lea.vmem [#allocation2], %s2121_s3  ;;  %s2127_s16 = sld [smem:[#allocation6 + $0xc]] }
  0x22   :  { %v141_v13 = vld [vmem:[%s140_s26] sm:$0x1]  ;;  %138 = vst.msk [vmem:[#allocation3 + $0x2] sm:$0x1] %vm129_vm1, %v137_v12  ;;  %s156_s25 = scalar_lea.vmem [#allocation2], %s2122_s1  ;;  %s2128_s17 = sld [smem:[#allocation6 + $0xd]] }
  0x23   :  { %v145_v14 = vld [vmem:[%s144_s27] sm:$0x1]  ;;  %142 = vst.msk [vmem:[#allocation3 + $0x3] sm:$0x1] %vm129_vm1, %v141_v13  ;;  %s160_s29 = scalar_lea.vmem [#allocation2], %s2123_s2  ;;  %s2129_s0 = sld [smem:[#allocation6 + $0xe]] }
  0x24   :  { %v149_v15 = vld [vmem:[%s148_s28] sm:$0x1]  ;;  %146 = vst.msk [vmem:[#allocation3 + $0x4] sm:$0x1] %vm129_vm1, %v145_v14  ;;  %s164_s30 = scalar_lea.vmem [#allocation2], %s2124_s21  ;;  %s2130_s18 = sld [smem:[#allocation6 + $0xf]] }
  0x25   :  { %v153_v16 = vld [vmem:[%s152_s20] sm:$0x1]  ;;  %150 = vst.msk [vmem:[#allocation3 + $0x5] sm:$0x1] %vm129_vm1, %v149_v15  ;;  %s2131_s19 = sld [smem:[#allocation6 + $0x10]]  ;;  %s168_s3 = scalar_lea.vmem [#allocation2], %s2125_s14 }
  0x26   :  { %v157_v17 = vld [vmem:[%s156_s25] sm:$0x1]  ;;  %154 = vst.msk [vmem:[#allocation3 + $0x6] sm:$0x1] %vm129_vm1, %v153_v16  ;;  %s2132_s1 = sld [smem:[#allocation6 + $0x11]]  ;;  %s172_s2 = scalar_lea.vmem [#allocation2], %s2126_s15 }
  0x27   :  { %v161_v18 = vld [vmem:[%s160_s29] sm:$0x1]  ;;  %158 = vst.msk [vmem:[#allocation3 + $0x7] sm:$0x1] %vm129_vm1, %v157_v17  ;;  %s176_s21 = scalar_lea.vmem [#allocation2], %s2127_s16  ;;  %s2133_s28 = sld [smem:[#allocation6 + $0x12]] }
  0x28   :  { %v165_v19 = vld [vmem:[%s164_s30] sm:$0x1]  ;;  %162 = vst.msk [vmem:[#allocation3 + $0x8] sm:$0x1] %vm129_vm1, %v161_v18  ;;  %s180_s22 = scalar_lea.vmem [#allocation2], %s2128_s17  ;;  %s2134_s20 = sld [smem:[#allocation6 + $0x13]] }
  0x29   :  { %166 = vst.msk [vmem:[#allocation3 + $0x9] sm:$0x1] %vm129_vm1, %v165_v19  ;;  %v169_v20 = vld [vmem:[%s168_s3] sm:$0x1]  ;;  %s184_s23 = scalar_lea.vmem [#allocation2], %s2129_s0  ;;  %s2135_s25 = sld [smem:[#allocation6 + $0x14]] }
  0x2a   :  { %170 = vst.msk [vmem:[#allocation3 + $0xa] sm:$0x1] %vm129_vm1, %v169_v20  ;;  %v173_v21 = vld [vmem:[%s172_s2] sm:$0x1]  ;;  %s188_s24 = scalar_lea.vmem [#allocation2], %s2130_s18  ;;  %s2136_s29 = sld [smem:[#allocation6 + $0x15]] }
  0x2b   :  { %174 = vst.msk [vmem:[#allocation3 + $0xb] sm:$0x1] %vm129_vm1, %v173_v21  ;;  %v177_v22 = vld [vmem:[%s176_s21] sm:$0x1]  ;;  %s192_s26 = scalar_lea.vmem [#allocation2], %s2131_s19  ;;  %s2137_s30 = sld [smem:[#allocation6 + $0x16]] }
  0x2c   :  { %178 = vst.msk [vmem:[#allocation3 + $0xc] sm:$0x1] %vm129_vm1, %v177_v22  ;;  %v181_v23 = vld [vmem:[%s180_s22] sm:$0x1]  ;;  %s196_s27 = scalar_lea.vmem [#allocation2], %s2132_s1  ;;  %s2138_s14 = sld [smem:[#allocation6 + $0x17]] }
  0x2d   :  { %182 = vst.msk [vmem:[#allocation3 + $0xd] sm:$0x1] %vm129_vm1, %v181_v23  ;;  %v185_v24 = vld [vmem:[%s184_s23] sm:$0x1]  ;;  %s2139_s15 = sld [smem:[#allocation6 + $0x18]]  ;;  %s200_s16 = scalar_lea.vmem [#allocation2], %s2133_s28 }
  0x2e   :  { %186 = vst.msk [vmem:[#allocation3 + $0xe] sm:$0x1] %vm129_vm1, %v185_v24  ;;  %v189_v25 = vld [vmem:[%s188_s24] sm:$0x1]  ;;  %v255_v28 = vld [vmem:[#allocation3] sm:$0xff]  ;;  %s2140_s17 = sld [smem:[#allocation6 + $0x19]] }
  0x2f   :  { %190 = vst.msk [vmem:[#allocation3 + $0xf] sm:$0x1] %vm129_vm1, %v189_v25  ;;  %v193_v26 = vld [vmem:[%s192_s26] sm:$0x1]  ;;  %s204_s0 = scalar_lea.vmem [#allocation2], %s2134_s20  ;;  %s208_s18 = scalar_lea.vmem [#allocation2], %s2135_s25 }
  0x30   :  { %194 = vst.msk [vmem:[#allocation3 + $0x10] sm:$0x1] %vm129_vm1, %v193_v26  ;;  %v197_v27 = vld [vmem:[%s196_s27] sm:$0x1]  ;;  %s212_s19 = scalar_lea.vmem [#allocation2], %s2136_s29  ;;  %s2141_s22 = sld [smem:[#allocation6 + $0x1a]] }
  0x31   :  { %198 = vst.msk [vmem:[#allocation3 + $0x11] sm:$0x1] %vm129_vm1, %v197_v27  ;;  %v201_v31 = vld [vmem:[%s200_s16] sm:$0x1]  ;;  %s216_s3 = scalar_lea.vmem [#allocation2], %s2137_s30  ;;  %s2142_s23 = sld [smem:[#allocation6 + $0x1b]] }
  0x32   :  { %202 = vst.msk [vmem:[#allocation3 + $0x12] sm:$0x1] %vm129_vm1, %v201_v31  ;;  %v205_v32 = vld [vmem:[%s204_s0] sm:$0x1]  ;;  %s220_s1 = scalar_lea.vmem [#allocation2], %s2138_s14  ;;  %s2143_s24 = sld [smem:[#allocation6 + $0x1c]] }
  0x33   :  { %206 = vst.msk [vmem:[#allocation3 + $0x13] sm:$0x1] %vm129_vm1, %v205_v32  ;;  %v209_v33 = vld [vmem:[%s208_s18] sm:$0x1]  ;;  %s224_s2 = scalar_lea.vmem [#allocation2], %s2139_s15  ;;  %s2144_s26 = sld [smem:[#allocation6 + $0x1d]] }
  0x34   :  { %210 = vst.msk [vmem:[#allocation3 + $0x14] sm:$0x1] %vm129_vm1, %v209_v33  ;;  %v213_v34 = vld [vmem:[%s212_s19] sm:$0x1]  ;;  %s228_s21 = scalar_lea.vmem [#allocation2], %s2140_s17  ;;  %s2145_s27 = sld [smem:[#allocation6 + $0x1e]] }
  0x35   :  { %214 = vst.msk [vmem:[#allocation3 + $0x15] sm:$0x1] %vm129_vm1, %v213_v34  ;;  %v217_v35 = vld [vmem:[%s216_s3] sm:$0x1]  ;;  %s2146_s28 = sld [smem:[#allocation6 + $0x1f]]  ;;  %v2516_v25 = vld [vmem:[%s3510_s6 + $0x18] sm:$0xff] }
  0x36   :  { %v256_v29 = vld [vmem:[#allocation3 + $0x8] sm:$0xff]  ;;  %218 = vst.msk [vmem:[#allocation3 + $0x16] sm:$0x1] %vm129_vm1, %v217_v35  ;;  %v221_v36 = vld [vmem:[%s220_s1] sm:$0x1]  ;;  %s232_s20 = scalar_lea.vmem [#allocation2], %s2141_s22  ;;  %478 = vmatpush.bf16.msra.mxu3 %v2516_v25 }
  0x37   :  { %v291_v30 = vpack.c.bf16 %v256_v29, %v255_v28  ;;  %222 = vst.msk [vmem:[#allocation3 + $0x17] sm:$0x1] %vm129_vm1, %v221_v36  ;;  %v225_v37 = vld [vmem:[%s224_s2] sm:$0x1]  ;;  %s236_s25 = scalar_lea.vmem [#allocation2], %s2142_s23  ;;  %v2514_v35 = vld [vmem:[%s3510_s6 + $0x8] sm:$0xff] }
  0x38   :  { %226 = vst.msk [vmem:[#allocation3 + $0x18] sm:$0x1] %vm129_vm1, %v225_v37  ;;  %v229_v38 = vld [vmem:[%s228_s21] sm:$0x1]  ;;  %s240_s29 = scalar_lea.vmem [#allocation2], %s2143_s24  ;;  %s2892_s16 = sld [smem:[#allocation9 + $0x3]] }
  0x39   :  { %2164 = vmatmul.msk.bf16.vlgmr.msra.gmra.mxu1 %vm71_vm0, %v291_v30  ;;  %230 = vst.msk [vmem:[#allocation3 + $0x19] sm:$0x1] %vm129_vm1, %v229_v38  ;;  %v233_v39 = vld [vmem:[%s232_s20] sm:$0x1]  ;;  %s244_s30 = scalar_lea.vmem [#allocation2], %s2144_s26  ;;  %v2515_v30 = vld [vmem:[%s3510_s6 + $0x10] sm:$0xff] }
  0x3a   :  { %234 = vst.msk [vmem:[#allocation3 + $0x1a] sm:$0x1] %vm129_vm1, %v233_v39  ;;  %v237_v40 = vld [vmem:[%s236_s25] sm:$0x1]  ;;  %s248_s14 = scalar_lea.vmem [#allocation2], %s2145_s27  ;;  %479 = vmatpush.bf16.msra.mxu3 %v2515_v30  ;;  %s2894_s17 = sld [smem:[#allocation9 + $0x4]] }
  0x3b   :  { %238 = vst.msk [vmem:[#allocation3 + $0x1b] sm:$0x1] %vm129_vm1, %v237_v40  ;;  %v241_v41 = vld [vmem:[%s240_s29] sm:$0x1]  ;;  %s252_s15 = scalar_lea.vmem [#allocation2], %s2146_s28  ;;  %s2896_s0 = sld [smem:[#allocation9 + $0x5]] }
  0x3c   :  { %242 = vst.msk [vmem:[#allocation3 + $0x1c] sm:$0x1] %vm129_vm1, %v241_v41  ;;  %v245_v42 = vld [vmem:[%s244_s30] sm:$0x1]  ;;  %s2886_s30 = sld [smem:[#allocation9]] }
  0x3d   :  { %246 = vst.msk [vmem:[#allocation3 + $0x1d] sm:$0x1] %vm129_vm1, %v245_v42  ;;  %v249_v43 = vld [vmem:[%s248_s14] sm:$0x1]  ;;  %s2888_s14 = sld [smem:[#allocation9 + $0x1]] }
  0x3e   :  { %250 = vst.msk [vmem:[#allocation3 + $0x1e] sm:$0x1] %vm129_vm1, %v249_v43  ;;  %v253_v44 = vld [vmem:[%s252_s15] sm:$0x1]  ;;  %v257_v45 = vld [vmem:[#allocation3 + $0x10] sm:$0xff]  ;;  %480 = vmatpush.bf16.msra.mxu3 %v2514_v35  ;;  %s2890_s15 = sld [smem:[#allocation9 + $0x2]] }
  0x3f   :  { %254 = vst.msk [vmem:[#allocation3 + $0x1f] sm:$0x1] %vm129_vm1, %v253_v44  ;;  %v259_v46 = vadd.f32 %v257_v45, %v255_v28  ;;  %v2513_v38 = vld [vmem:[%s3510_s6] sm:$0xff]  ;;  %s2898_s18 = sld [smem:[#allocation9 + $0x6]] }
  0x40   :  { %s2900_s19 = sld [smem:[#allocation9 + $0x7]] }
  0x41   :  { %s2902_s3 = sld [smem:[#allocation9 + $0x8]] }
  0x42   :  { %481 = vmatpush.bf16.msra.mxu3 %v2513_v38  ;;  %s2904_s1 = sld [smem:[#allocation9 + $0x9]] }
  0x43   :  { %s2906_s2 = sld [smem:[#allocation9 + $0xa]] }
  0x44   :  { %s2908_s21 = sld [smem:[#allocation9 + $0xb]] }
  0x45   :  { %s2910_s22 = sld [smem:[#allocation9 + $0xc]] }
  0x46   :  { %v258_v47 = vld [vmem:[#allocation3 + $0x18] sm:$0xff]  ;;  %s2915_s26 = sld [smem:[#allocation9 + $0xd]] }
  0x47   :  { %v260_v48 = vadd.f32 %v258_v47, %v256_v29  ;;  %v292_v49 = vpack.c.bf16 %v258_v47, %v257_v45  ;;  %s2917_s27 = sld [smem:[#allocation9 + $0xe]] }
  0x48   :  { %s2919_s28 = sld [smem:[#allocation9 + $0xf]] }
  0x49   :  { %v334_v50 = vpack.c.bf16 %v260_v48, %v259_v46  ;;  %2165 = vmatmul.msk.bf16.gmra.mxu1 %vm71_vm0, %v292_v49  ;;  %s2921_s20 = sld [smem:[#allocation9 + $0x10]] }
  0x4a   :  { %s2930_s23 = sld [smem:[#allocation9 + $0x11]] }
  0x4b   :  { %2174 = vmatmul.msk.bf16.vlgmr.msra.gmra.mxu2 %vm71_vm0, %v334_v50  ;;  %s2932_s24 = sld [smem:[#allocation9 + $0x12]] }
  0x4c   :  { %s2937_s11 = sld [smem:[#allocation9 + $0x13]] }
  0x4d   :  { %s2939_s10 = sld [smem:[#allocation9 + $0x14]] }
  0x4e   :  { %s2941_s25 = sld [smem:[#allocation9 + $0x15]] }
  0x4f   :  { %s2943_s29 = sld [smem:[#allocation9 + $0x16]] }
  0x50   :  { %s2947_s12 = sld [smem:[#allocation9 + $0x17]] }
  0x51   :  { %s2949_s13 = sld [smem:[#allocation9 + $0x18]] }
  0x52   :  { %3539 = sst [smem:[#allocation15_spill]] %s2937_s11  ;;  %s566_s11 = scalar_lea.vmem [#allocation4], %s2886_s30 }
  0x53   :  { %s2952_s9 = sld [smem:[#allocation9 + $0x19]]  ;;  %s617_s30 = scalar_lea.vmem [#allocation4], %s2910_s22 }
  0x54   :  { %s2954_s4 = sld [smem:[#allocation9 + $0x1a]]  ;;  %s655_s22 = scalar_lea.vmem [#allocation4], %s2941_s25 }
  0x55   :  { %3540 = sst [smem:[#allocation16_spill]] %s2943_s29 }
  0x56   :  { %3541 = sst [smem:[#allocation17_spill]] %s2947_s12 }
  0x57   :  { %s2964_s6 = sld [smem:[#allocation9 + $0x1d]] }
  0x58   :  { %s2969_s12 = sld [smem:[#allocation9 + $0x1f]] }
  0x59   :  { %3542 = sst [smem:[#allocation18_spill]] %s2952_s9  ;;  %s578_s9 = scalar_lea.vmem [#allocation4], %s2892_s16 }
  0x5a   :  { %3543 = sst [smem:[#allocation19_spill]] %s2954_s4  ;;  %s634_s16 = scalar_lea.vmem [#allocation4], %s2921_s20 }
  0x5b   :  { %2175 = vmatmul.msk.bf16.gmra.mxu2 %vm71_vm0, %v334_v50  ;;  %s2967_s4 = sld [smem:[#allocation9 + $0x1e]]  ;;  %s668_s20 = scalar_lea.vmem [#allocation4], %s2949_s13 }
  0x5c   :  { %s3555_s25 = sld [smem:[#allocation19_spill]] }
  0x5d   :  { %3546 = sst [smem:[#allocation22_spill]] %s2964_s6  ;;  %s570_s6 = scalar_lea.vmem [#allocation4], %s2888_s14 }
  0x5e   :  { %3548 = sst [smem:[#allocation24_spill]] %s2969_s12  ;;  %s587_s12 = scalar_lea.vmem [#allocation4], %s2896_s0 }
  0x5f   :  { %s621_s14 = scalar_lea.vmem [#allocation4], %s2915_s26  ;;  %s612_s0 = scalar_lea.vmem [#allocation4], %s2908_s21 }
  0x60   :  { %s3551_s26 = sld [smem:[#allocation18_spill]]  ;;  %s629_s21 = scalar_lea.vmem [#allocation4], %s2919_s28 }
  0x61   :  { %3547 = sst [smem:[#allocation23_spill]] %s2967_s4  ;;  %s583_s4 = scalar_lea.vmem [#allocation4], %s2894_s17 }
  0x62   :  { %s638_s17 = scalar_lea.vmem [#allocation4], %s2930_s23  ;;  %s3554_s23 = sld [smem:[#allocation17_spill]] }
  0x63   :  { %s3556_s28 = sld [smem:[#allocation23_spill]] }
  0x9a   :  { %v286_v52 = vpop.f32.mrf.mxu0 }
  0xa2   :  { %v288_v56 = vpop.f32.mrf.mxu0 }
  0xb6   :  { %v320_v51 = vpop.f32.mrf.mxu1 }
  0xb7   :  { %v330_v58 = vadd.f32 %v320_v51, %v286_v52 }
  0xbe   :  { %v322_v53 = vpop.f32.mrf.mxu1 }
  0xbf   :  { %v331_v59 = vadd.f32 %v322_v53, %v288_v56 }
  0xc6   :  { %v325_v57 = vpop.f32.mrf.mxu1 }
  0xc7   :  { %v332_v60 = vadd.f32 %v325_v57, %v286_v52 }
  0xce   :  { %v359_v54 = vpop.f32.mrf.mxu2  ;;  %v327_v2 = vpop.f32.mrf.mxu1 }
  0xcf   :  { %v2800_v63 = vadd.f32 %v359_v54, %v330_v58  ;;  %v333_v9 = vadd.f32 %v327_v2, %v288_v56  ;;  %v2555_v54 = vld [vmem:[%s3511_s7] ss:$0 sm:$0xff]  ;;  %v2556_v58 = vld [vmem:[%s3511_s7 + $0x1] ss:$0 sm:$0xff]  ;;  %s2960_s7 = sld [smem:[#allocation9 + $0x1c]] }
  0xd1   :  { %v387_v3 = vmul.f32 %v2800_v63, %v2800_v63  ;;  %v374_v6 = vsel %vm373_vm2, %v2800_v63, 0.0 }
  0xd3   :  { %v391_v13 = vsel %vm373_vm2, %v387_v3, 0.0 }
  0xd5   :  { %3545 = sst [smem:[#allocation21_spill]] %s2960_s7  ;;  %s600_s7 = scalar_lea.vmem [#allocation4], %s2902_s3 }
  0xd6   :  { %v361_v55 = vpop.f32.mrf.mxu2  ;;  %s3549_s3 = sld [smem:[#allocation15_spill]] }
  0xd7   :  { %v2798_v61 = vadd.f32 %v361_v55, %v331_v59 }
  0xd9   :  { %v388_v1 = vmul.f32 %v2798_v61, %v2798_v61  ;;  %v375_v4 = vsel %vm373_vm2, %v2798_v61, 0.0 }
  0xda   :  { %v376_v11 = vadd.f32 %v375_v4, %v374_v6 }
  0xdb   :  { %v392_v8 = vsel %vm373_vm2, %v388_v1, 0.0 }
  0xdc   :  { %v393_v16 = vadd.f32 %v392_v8, %v391_v13 }
  0xde   :  { %v364_v62 = vpop.f32.mrf.mxu2 }
  0xdf   :  { %v2802_v0 = vadd.f32 %v364_v62, %v332_v60 }
  0xe1   :  { %v389_v5 = vmul.f32 %v2802_v0, %v2802_v0  ;;  %v377_v10 = vsel %vm373_vm2, %v2802_v0, 0.0 }
  0xe2   :  { %v378_v17 = vadd.f32 %v377_v10, %v376_v11 }
  0xe3   :  { %v394_v14 = vsel %vm373_vm2, %v389_v5, 0.0 }
  0xe4   :  { %v395_v20 = vadd.f32 %v394_v14, %v393_v16 }
  0xe6   :  { %v366_v12 = vpop.f32.mrf.mxu2 }
  0xe7   :  { %v372_v15 = vadd.f32 %v366_v12, %v333_v9 }
  0xe9   :  { %v379_v18 = vsel %vm373_vm2, %v372_v15, 0.0  ;;  %v390_v19 = vmul.f32 %v372_v15, %v372_v15 }
  0xea   :  { %v380_v21 = vadd.f32 %v379_v18, %v378_v17 }
  0xeb   :  { %v396_v22 = vsel %vm373_vm2, %v390_v19, 0.0 }
  0xec   :  { %v381_v23 = vrot.slane %v380_v21, 4  ;;  %v397_v24 = vadd.f32 %v396_v22, %v395_v20 }
  0xee   :  { %v382_v26 = vadd.f32 %v381_v23, %v380_v21  ;;  %v398_v27 = vrot.slane %v397_v24, 4 }
  0xf0   :  { %v383_v28 = vrot.slane %v382_v26, 2  ;;  %v399_v29 = vadd.f32 %v398_v27, %v397_v24 }
  0xf2   :  { %v384_v31 = vadd.f32 %v383_v28, %v382_v26  ;;  %v400_v32 = vrot.slane %v399_v29, 2 }
  0xf4   :  { %v385_v33 = vrot.slane %v384_v31, 1  ;;  %v401_v34 = vadd.f32 %v400_v32, %v399_v29 }
  0xf6   :  { %v386_v36 = vadd.f32 %v385_v33, %v384_v31  ;;  %v402_v37 = vrot.slane %v401_v34, 1 }
  0xf8   :  { %v403_v39 = vadd.f32 %v402_v37, %v401_v34  ;;  %v404_v40 = vmul.f32 0.03125, %v386_v36 }
  0xfa   :  { %v405_v41 = vmul.f32 0.03125, %v403_v39  ;;  %v406_v42 = vmul.f32 %v404_v40, %v404_v40  ;;  %v409_v52 = vsub.f32 %v2800_v63, %v404_v40  ;;  %v410_v53 = vsub.f32 %v2798_v61, %v404_v40 }
  0xfb   :  { %v412_v2 = vsub.f32 %v372_v15, %v404_v40  ;;  %v411_v61 = vsub.f32 %v2802_v0, %v404_v40 }
  0xfc   :  { %v407_v43 = vsub.f32 %v405_v41, %v406_v42 }
  0xfe   :  { %v408_v44 = vmax.f32 %v407_v43, 0.0 }
 0x100   :  { %v413_v45 = vadd.f32 1e-05, %v408_v44 }
 0x102   :  { %2576 = vrsqrt.f32 %v413_v45  ;;  %vm420_vm4 = vweird.f32 %v413_v45 }
 0x108   :  { %v2577_v46 = vpop.eup %2576 }
 0x109   :  { %v415_v47 = vmul.f32 %v2577_v46, %v413_v45  ;;  %vm421_vm3 = vweird.f32 %v2577_v46 }
 0x10a   :  { %vm422_vm5 = vmor %vm420_vm4, %vm421_vm3 }
 0x10b   :  { %v416_v48 = vmul.f32 %v2577_v46, %v415_v47  ;;  %v2522_v47 = vld [vmem:[%s3509_s5 + $0x58] sm:$0xff] }
 0x10c   :  { %1125 = vmatpush.bf16.msrb.mxu3 %v2522_v47 }
 0x10d   :  { %v417_v49 = vmul.f32 0.5, %v416_v48  ;;  %v2652_v48 = vmov 0.0  }
 0x10e   :  { %72 = vst.msk [vmem:[#allocation4] sm:$0xff] %vm71_vm0, %v2652_v48 }
 0x10f   :  { %v418_v50 = vsub.f32 1.5, %v417_v49  ;;  %73 = vst.msk [vmem:[#allocation4 + $0x8] sm:$0xff] %vm71_vm0, %v2652_v48 }
 0x110   :  { %74 = vst.msk [vmem:[#allocation4 + $0x10] sm:$0xff] %vm71_vm0, %v2652_v48 }
 0x111   :  { %v419_v51 = vmul.f32 %v2577_v46, %v418_v50  ;;  %75 = vst.msk [vmem:[#allocation4 + $0x18] sm:$0xff] %vm71_vm0, %v2652_v48 }
 0x112   :  { %76 = vst.msk [vmem:[#allocation4 + $0x20] sm:$0xff] %vm71_vm0, %v2652_v48 }
 0x113   :  { %v423_v55 = vsel %vm422_vm5, %v2577_v46, %v419_v51  ;;  %v2521_v51 = vld [vmem:[%s3509_s5 + $0x50] sm:$0xff] }
 0x114   :  { %v424_v56 = vmul.f32 %v423_v55, %v409_v52  ;;  %v425_v57 = vmul.f32 %v423_v55, %v410_v53  ;;  %v427_v4 = vmul.f32 %v423_v55, %v412_v2  ;;  %v426_v6 = vmul.f32 %v423_v55, %v411_v61  ;;  %1126 = vmatpush.bf16.msrb.mxu3 %v2521_v51 }
 0x116   :  { %v429_v59 = vmul.f32 %v2555_v54, %v424_v56  ;;  %v430_v60 = vmul.f32 %v2555_v54, %v425_v57  ;;  %v431_v8 = vmul.f32 %v2555_v54, %v426_v6  ;;  %v432_v9 = vmul.f32 %v2555_v54, %v427_v4  ;;  %v2512_v56 = vld [vmem:[%s3509_s5 + $0x48] sm:$0xff] }
 0x117   :  { %725 = vmatpush.bf16.msrb.mxu0 %v2512_v56 }
 0x118   :  { %v434_v62 = vadd.f32 %v2556_v58, %v429_v59  ;;  %v435_v1 = vadd.f32 %v2556_v58, %v430_v60  ;;  %v436_v10 = vadd.f32 %v2556_v58, %v431_v8  ;;  %v437_v11 = vadd.f32 %v2556_v58, %v432_v9 }
 0x11a   :  { %v438_v3 = vmax.f32 %v434_v62, 0.0  ;;  %v439_v63 = vmax.f32 %v435_v1, 0.0  ;;  %v440_v12 = vmax.f32 %v436_v10, 0.0  ;;  %v441_v13 = vmax.f32 %v437_v11, 0.0  ;;  %v2511_v1 = vld [vmem:[%s3509_s5 + $0x40] sm:$0xff] }
 0x11b   :  { %726 = vmatpush.bf16.msrb.mxu0 %v2511_v1 }
 0x11c   :  { %v442_v5 = vpack.c.bf16 %v439_v63, %v438_v3  ;;  %v443_v14 = vpack.c.bf16 %v441_v13, %v440_v12  ;;  %v2558_v12 = vld [vmem:[%s3512_s8 + $0x1] ss:$0 sm:$0xff] }
 0x11e   :  { %2192 = vmatmul.msk.bf16.vlgmr.msra.gmra.mxu3 %vm373_vm2, %v442_v5  ;;  %v2557_v5 = vld [vmem:[%s3512_s8] ss:$0 sm:$0xff]  ;;  %s2957_s8 = sld [smem:[#allocation9 + $0x1b]] }
 0x124   :  { %3544 = sst [smem:[#allocation20_spill]] %s2957_s8  ;;  %s574_s8 = scalar_lea.vmem [#allocation4], %s2890_s15 }
 0x125   :  { %s608_s15 = scalar_lea.vmem [#allocation4], %s2906_s2  ;;  %s3550_s2 = sld [smem:[#allocation16_spill]] }
 0x12b   :  { %s659_s29 = scalar_lea.vmem [#allocation4], %s3550_s2 }
 0x12e   :  { %2193 = vmatmul.msk.bf16.gmra.mxu3 %vm373_vm2, %v443_v14 }
 0x1a1   :  { %v2844_v16 = vpop.f32.mrf.mxu3 }
 0x1a2   :  { %v506_v18 = vmul.f32 %v2844_v16, %v2844_v16  ;;  %v493_v21 = vsel %vm71_vm0, %v2844_v16, 0.0 }
 0x1a4   :  { %v510_v25 = vsel %vm71_vm0, %v506_v18, 0.0 }
 0x1a9   :  { %v2846_v15 = vpop.f32.mrf.mxu3 }
 0x1aa   :  { %v507_v0 = vmul.f32 %v2846_v15, %v2846_v15  ;;  %v494_v19 = vsel %vm71_vm0, %v2846_v15, 0.0 }
 0x1ab   :  { %v495_v24 = vadd.f32 %v494_v19, %v493_v21 }
 0x1ac   :  { %v511_v22 = vsel %vm71_vm0, %v507_v0, 0.0 }
 0x1ad   :  { %v512_v27 = vadd.f32 %v511_v22, %v510_v25 }
 0x1b1   :  { %v2848_v17 = vpop.f32.mrf.mxu3 }
 0x1b2   :  { %v508_v20 = vmul.f32 %v2848_v17, %v2848_v17  ;;  %v496_v23 = vsel %vm71_vm0, %v2848_v17, 0.0 }
 0x1b3   :  { %v497_v28 = vadd.f32 %v496_v23, %v495_v24 }
 0x1b4   :  { %v513_v26 = vsel %vm71_vm0, %v508_v20, 0.0 }
 0x1b5   :  { %v514_v32 = vadd.f32 %v513_v26, %v512_v27  ;;  %v2510_v26 = vld [vmem:[%s3509_s5 + $0x38] sm:$0xff]  ;;  %v2509_v27 = vld [vmem:[%s3509_s5 + $0x30] sm:$0xff] }
 0x1b6   :  { %753 = vmatpush.bf16.msra.mxu0 %v2510_v26 }
 0x1b9   :  { %v2865_v29 = vpop.f32.mrf.mxu3 }
 0x1ba   :  { %v498_v30 = vsel %vm71_vm0, %v2865_v29, 0.0  ;;  %v509_v31 = vmul.f32 %v2865_v29, %v2865_v29  ;;  %754 = vmatpush.bf16.msra.mxu0 %v2509_v27 }
 0x1bb   :  { %v499_v33 = vadd.f32 %v498_v30, %v497_v28 }
 0x1bc   :  { %v515_v34 = vsel %vm71_vm0, %v509_v31, 0.0 }
 0x1bd   :  { %v500_v35 = vrot.slane %v499_v33, 4  ;;  %v516_v36 = vadd.f32 %v515_v34, %v514_v32 }
 0x1bf   :  { %v501_v37 = vadd.f32 %v500_v35, %v499_v33  ;;  %v517_v38 = vrot.slane %v516_v36, 4 }
 0x1c1   :  { %v502_v39 = vrot.slane %v501_v37, 2  ;;  %v518_v40 = vadd.f32 %v517_v38, %v516_v36 }
 0x1c3   :  { %v503_v41 = vadd.f32 %v502_v39, %v501_v37  ;;  %v519_v42 = vrot.slane %v518_v40, 2 }
 0x1c5   :  { %v504_v43 = vrot.slane %v503_v41, 1  ;;  %v520_v44 = vadd.f32 %v519_v42, %v518_v40 }
 0x1c7   :  { %v505_v45 = vadd.f32 %v504_v43, %v503_v41  ;;  %v521_v46 = vrot.slane %v520_v44, 1 }
 0x1c9   :  { %v522_v49 = vadd.f32 %v521_v46, %v520_v44  ;;  %v523_v50 = vmul.f32 0.03125, %v505_v45 }
 0x1cb   :  { %v524_v52 = vmul.f32 0.03125, %v522_v49  ;;  %v525_v53 = vmul.f32 %v523_v50, %v523_v50  ;;  %v528_v63 = vsub.f32 %v2844_v16, %v523_v50  ;;  %v529_v61 = vsub.f32 %v2846_v15, %v523_v50 }
 0x1cc   :  { %v531_v4 = vsub.f32 %v2865_v29, %v523_v50  ;;  %v530_v6 = vsub.f32 %v2848_v17, %v523_v50 }
 0x1cd   :  { %v526_v54 = vsub.f32 %v524_v52, %v525_v53 }
 0x1cf   :  { %v527_v55 = vmax.f32 %v526_v54, 0.0 }
 0x1d1   :  { %v532_v57 = vadd.f32 1e-05, %v527_v55 }
 0x1d3   :  { %2578 = vrsqrt.f32 %v532_v57  ;;  %vm539_vm7 = vweird.f32 %v532_v57 }
 0x1d9   :  { %v2579_v58 = vpop.eup %2578 }
 0x1da   :  { %v534_v59 = vmul.f32 %v2579_v58, %v532_v57  ;;  %vm540_vm6 = vweird.f32 %v2579_v58 }
 0x1db   :  { %vm541_vm8 = vmor %vm539_vm7, %vm540_vm6 }
 0x1dc   :  { %v535_v60 = vmul.f32 %v2579_v58, %v534_v59 }
 0x1de   :  { %v536_v62 = vmul.f32 0.5, %v535_v60 }
 0x1e0   :  { %v537_v2 = vsub.f32 1.5, %v536_v62 }
 0x1e2   :  { %v538_v3 = vmul.f32 %v2579_v58, %v537_v2 }
 0x1e4   :  { %v542_v8 = vsel %vm541_vm8, %v2579_v58, %v538_v3  ;;  %vm1687_vm8 = vcmask 1043456  }
 0x1e5   :  { %v543_v9 = vmul.f32 %v542_v8, %v528_v63  ;;  %v544_v10 = vmul.f32 %v542_v8, %v529_v61  ;;  %v546_v11 = vmul.f32 %v542_v8, %v531_v4  ;;  %v545_v13 = vmul.f32 %v542_v8, %v530_v6 }
 0x1e7   :  { %v551_v14 = vmul.f32 %v2557_v5, %v546_v11  ;;  %v548_v16 = vmul.f32 %v2557_v5, %v543_v9  ;;  %v549_v15 = vmul.f32 %v2557_v5, %v544_v10  ;;  %v550_v17 = vmul.f32 %v2557_v5, %v545_v13 }
 0x1e9   :  { %v553_v0 = vadd.f32 %v2558_v12, %v548_v16  ;;  %v554_v18 = vadd.f32 %v2558_v12, %v549_v15  ;;  %v2945_v19 = vadd.f32 %v2558_v12, %v550_v17  ;;  %v556_v20 = vadd.f32 %v2558_v12, %v551_v14 }
 0x1eb   :  { %v557_v21 = vmax.f32 %v553_v0, 0.0  ;;  %v558_v22 = vmax.f32 %v554_v18, 0.0  ;;  %v559_v23 = vmax.f32 %v2945_v19, 0.0  ;;  %v560_v24 = vmax.f32 %v556_v20, 0.0 }
 0x1ed   :  { %561 = vst.msk [vmem:[#allocation4] sm:$0xff] %vm71_vm0, %v557_v21  ;;  %v1060_v25 = vpack.c.bf16 %v558_v22, %v557_v21  ;;  %v1061_v50 = vpack.c.bf16 %v560_v24, %v559_v23 }
 0x1ee   :  { %562 = vst.msk [vmem:[#allocation4 + $0x8] sm:$0xff] %vm71_vm0, %v558_v22 }
 0x1ef   :  { %2353 = vmatmul.msk.bf16.vlgmr.msrb.gmra.mxu3 %vm71_vm0, %v1060_v25  ;;  %563 = vst.msk [vmem:[#allocation4 + $0x10] sm:$0xff] %vm71_vm0, %v559_v23 }
 0x1f0   :  { %564 = vst.msk [vmem:[#allocation4 + $0x18] sm:$0xff] %vm71_vm0, %v560_v24  ;;  %v702_v24 = vpack.c.bf16 %v2754_v7, %v2754_v7 }
 0x1f7   :  { %v567_v28 = vld [vmem:[%s566_s11] sm:$0x1]  ;;  %s604_s11 = scalar_lea.vmem [#allocation4], %s2904_s1  ;;  %s642_s1 = scalar_lea.vmem [#allocation4], %s2932_s24 }
 0x1f8   :  { %v571_v29 = vld [vmem:[%s570_s6] sm:$0x1]  ;;  %s591_s6 = scalar_lea.vmem [#allocation4], %s2898_s18  ;;  %s625_s18 = scalar_lea.vmem [#allocation4], %s2917_s27 }
 0x1f9   :  { %v572_v30 = vadd.f32 %v571_v29, %v567_v28  ;;  %v584_v31 = vld [vmem:[%s583_s4] sm:$0x1]  ;;  %s595_s4 = scalar_lea.vmem [#allocation4], %s2900_s19  ;;  %s651_s19 = scalar_lea.vmem [#allocation4], %s2939_s10 }
 0x1fa   :  { %v588_v32 = vld [vmem:[%s587_s12] sm:$0x1]  ;;  %s3552_s27 = sld [smem:[#allocation21_spill]]  ;;  %s646_s24 = scalar_lea.vmem [#allocation4], %s3549_s3 }
 0x1fb   :  { %v575_v33 = vld [vmem:[%s574_s8] sm:$0x1]  ;;  %v589_v34 = vadd.f32 %v588_v32, %v584_v31  ;;  %s3553_s10 = sld [smem:[#allocation22_spill]]  ;;  %s672_s12 = scalar_lea.vmem [#allocation4], %s3551_s26 }
 0x1fc   :  { %v601_v35 = vld [vmem:[%s600_s7] sm:$0x1]  ;;  %v576_v36 = vadd.f32 %v575_v33, %v572_v30  ;;  %s3557_s8 = sld [smem:[#allocation20_spill]] }
 0x1fd   :  { %v579_v37 = vld [vmem:[%s578_s9] sm:$0x1]  ;;  %s3558_s9 = sld [smem:[#allocation24_spill]] }
 0x1fe   :  { %v592_v38 = vld [vmem:[%s591_s6] sm:$0x1]  ;;  %v580_v45 = vadd.f32 %v579_v37, %v576_v36  ;;  %s663_s6 = scalar_lea.vmem [#allocation4], %s3554_s23  ;;  %s3078_s3 = sld [smem:[#allocation6 + $0x6]] }
 0x1ff   :  { %v605_v39 = vld [vmem:[%s604_s11] sm:$0x1]  ;;  %v593_v40 = vadd.f32 %v592_v38, %v589_v34  ;;  %2354 = vmatmul.msk.bf16.gmra.mxu3 %vm71_vm0, %v1061_v50  ;;  %s676_s11 = scalar_lea.vmem [#allocation4], %s3555_s25  ;;  %s3085_s26 = sld [smem:[#allocation6 + $0x8]] }
 0x200   :  { %v596_v41 = vld [vmem:[%s595_s4] sm:$0x1]  ;;  %v606_v42 = vadd.f32 %v605_v39, %v601_v35  ;;  %581 = vst.msk [vmem:[#allocation5] sm:$0x1] %vm129_vm1, %v580_v45  ;;  %s685_s7 = scalar_lea.vmem [#allocation4], %s3552_s27  ;;  %s693_s4 = scalar_lea.vmem [#allocation4], %s3556_s28 }
 0x201   :  { %v618_v43 = vld [vmem:[%s617_s30] sm:$0x1]  ;;  %v597_v51 = vadd.f32 %v596_v41, %v593_v40  ;;  %s689_s13 = scalar_lea.vmem [#allocation4], %s3553_s10  ;;  %s3087_s27 = sld [smem:[#allocation6 + $0x9]] }
 0x202   :  { %v622_v44 = vld [vmem:[%s621_s14] sm:$0x1]  ;;  %s680_s30 = scalar_lea.vmem [#allocation4], %s3557_s8  ;;  %s3089_s10 = sld [smem:[#allocation6 + $0xa]] }
 0x203   :  { %v609_v46 = vld [vmem:[%s608_s15] sm:$0x1]  ;;  %v623_v47 = vadd.f32 %v622_v44, %v618_v43  ;;  %598 = vst.msk [vmem:[#allocation5 + $0x1] sm:$0x1] %vm129_vm1, %v597_v51  ;;  %s697_s14 = scalar_lea.vmem [#allocation4], %s3558_s9  ;;  %s3071_s15 = sld [smem:[#allocation6 + $0x4]] }
 0x204   :  { %v635_v48 = vld [vmem:[%s634_s16] sm:$0x1]  ;;  %v610_v52 = vadd.f32 %v609_v46, %v606_v42  ;;  %s3093_s23 = sld [smem:[#allocation6 + $0xc]] }
 0x205   :  { %v639_v49 = vld [vmem:[%s638_s17] sm:$0x1]  ;;  %s3559_s17 = sld [smem:[#allocation26_spill]]  ;;  %s959_s2 = scalar_lea.vmem [#allocation2], %s3085_s26 }
 0x206   :  { %v613_v53 = vld [vmem:[%s612_s0] sm:$0x1]  ;;  %v640_v55 = vadd.f32 %v639_v49, %v635_v48  ;;  %s3098_s25 = sld [smem:[#allocation6 + $0xe]] }
 0x207   :  { %v626_v54 = vld [vmem:[%s625_s18] sm:$0x1]  ;;  %v614_v60 = vadd.f32 %v613_v53, %v610_v52  ;;  %s3561_s18 = sld [smem:[#allocation28_spill]] }
 0x208   :  { %v652_v56 = vld [vmem:[%s651_s19] sm:$0x1]  ;;  %v627_v57 = vadd.f32 %v626_v54, %v623_v47  ;;  %s3076_s19 = sld [smem:[#allocation6 + $0x5]] }
 0x209   :  { %v643_v58 = vld [vmem:[%s642_s1] sm:$0x1]  ;;  %615 = vst.msk [vmem:[#allocation5 + $0x2] sm:$0x1] %vm129_vm1, %v614_v60  ;;  %s3105_s28 = sld [smem:[#allocation6 + $0x11]]  ;;  %s943_s0 = scalar_lea.vmem [#allocation2], %s3071_s15 }
 0x20a   :  { %v656_v59 = vld [vmem:[%s655_s22] sm:$0x1]  ;;  %v644_v1 = vadd.f32 %v643_v58, %v640_v55  ;;  %s3083_s22 = sld [smem:[#allocation6 + $0x7]]  ;;  %s975_s26 = scalar_lea.vmem [#allocation2], %s3093_s23 }
 0x20b   :  { %v630_v62 = vld [vmem:[%s629_s21] sm:$0x1]  ;;  %v657_v2 = vadd.f32 %v656_v59, %v652_v56  ;;  %v2520_v35 = vld [vmem:[%s3559_s17 + $0x38] sm:$0xff]  ;;  %v2519_v40 = vld [vmem:[%s3559_s17 + $0x30] sm:$0xff]  ;;  %s3560_s21 = sld [smem:[#allocation27_spill]] }
 0x20c   :  { %v669_v3 = vld [vmem:[%s668_s20] sm:$0x1]  ;;  %v631_v63 = vadd.f32 %v630_v62, %v627_v57  ;;  %830 = vmatpush.bf16.msrb.mxu1 %v2520_v35  ;;  %v2518_v45 = vld [vmem:[%s3559_s17 + $0x28] sm:$0xff]  ;;  %s3091_s20 = sld [smem:[#allocation6 + $0xb]] }
 0x20d   :  { %v647_v61 = vld [vmem:[%s646_s24] sm:$0x1]  ;;  %s3095_s24 = sld [smem:[#allocation6 + $0xd]] }
 0x20e   :  { %v660_v4 = vld [vmem:[%s659_s29] sm:$0x1]  ;;  %v648_v6 = vadd.f32 %v647_v61, %v644_v1  ;;  %632 = vst.msk [vmem:[#allocation5 + $0x3] sm:$0x1] %vm129_vm1, %v631_v63  ;;  %s3101_s29 = sld [smem:[#allocation6 + $0xf]] }
 0x20f   :  { %v673_v5 = vld [vmem:[%s672_s12] sm:$0x1]  ;;  %v661_v8 = vadd.f32 %v660_v4, %v657_v2  ;;  %s3103_s12 = sld [smem:[#allocation6 + $0x10]] }
 0x210   :  { %v674_v9 = vadd.f32 %v673_v5, %v669_v3  ;;  %v686_v10 = vld [vmem:[%s685_s7] sm:$0x1]  ;;  %649 = vst.msk [vmem:[#allocation5 + $0x4] sm:$0x1] %vm129_vm1, %v648_v6  ;;  %831 = vmatpush.bf16.msrb.mxu1 %v2519_v40  ;;  %s3107_s8 = sld [smem:[#allocation6 + $0x12]] }
 0x211   :  { %v690_v11 = vld [vmem:[%s689_s13] sm:$0x1]  ;;  %v2559_v62 = vld [vmem:[%s3560_s21 + $0x2] ss:$0 sm:$0xff]  ;;  %v2560_v3 = vld [vmem:[%s3560_s21 + $0x3] ss:$0 sm:$0xff] }
 0x212   :  { %v664_v12 = vld [vmem:[%s663_s6] sm:$0x1]  ;;  %v691_v14 = vadd.f32 %v690_v11, %v686_v10  ;;  %s3114_s16 = sld [smem:[#allocation6 + $0x13]] }
 0x213   :  { %v677_v13 = vld [vmem:[%s676_s11] sm:$0x1]  ;;  %v665_v16 = vadd.f32 %v664_v12, %v661_v8  ;;  %s3063_s11 = sld [smem:[#allocation6]] }
 0x214   :  { %v678_v15 = vadd.f32 %v677_v13, %v674_v9  ;;  %v694_v17 = vld [vmem:[%s693_s4] sm:$0x1]  ;;  %832 = vmatpush.bf16.msrb.mxu1 %v2518_v45  ;;  %s3065_s4 = sld [smem:[#allocation6 + $0x1]] }
 0x215   :  { %v681_v0 = vld [vmem:[%s680_s30] sm:$0x1]  ;;  %v695_v18 = vadd.f32 %v694_v17, %v691_v14  ;;  %666 = vst.msk [vmem:[#allocation5 + $0x5] sm:$0x1] %vm129_vm1, %v665_v16  ;;  %s3067_s30 = sld [smem:[#allocation6 + $0x2]] }
 0x216   :  { %v682_v19 = vadd.f32 %v681_v0, %v678_v15  ;;  %v698_v20 = vld [vmem:[%s697_s14] sm:$0x1]  ;;  %s3069_s14 = sld [smem:[#allocation6 + $0x3]] }
 0x217   :  { %v699_v21 = vadd.f32 %v698_v20, %v695_v18  ;;  %v2517_v48 = vld [vmem:[%s3559_s17 + $0x20] sm:$0xff]  ;;  %s3118_s1 = sld [smem:[#allocation6 + $0x14]] }
 0x218   :  { %683 = vst.msk [vmem:[#allocation5 + $0x6] sm:$0x1] %vm129_vm1, %v682_v19  ;;  %833 = vmatpush.bf16.msrb.mxu1 %v2517_v48  ;;  %s3128_s15 = sld [smem:[#allocation6 + $0x16]] }
 0x219   :  { %700 = vst.msk [vmem:[#allocation5 + $0x7] sm:$0x1] %vm129_vm1, %v699_v21  ;;  %s927_s7 = scalar_lea.vmem [#allocation2], %s3063_s11  ;;  %s947_s11 = scalar_lea.vmem [#allocation2], %s3076_s19 }
 0x21a   :  { %s931_s13 = scalar_lea.vmem [#allocation2], %s3065_s4  ;;  %s951_s4 = scalar_lea.vmem [#allocation2], %s3078_s3 }
 0x21b   :  { %s935_s9 = scalar_lea.vmem [#allocation2], %s3067_s30  ;;  %s3124_s30 = sld [smem:[#allocation6 + $0x15]] }
 0x21c   :  { %s939_s6 = scalar_lea.vmem [#allocation2], %s3069_s14  ;;  %s955_s14 = scalar_lea.vmem [#allocation2], %s3083_s22 }
 0x21d   :  { %s963_s19 = scalar_lea.vmem [#allocation2], %s3087_s27  ;;  %s3134_s3 = sld [smem:[#allocation6 + $0x17]] }
 0x21e   :  { %s3138_s22 = sld [smem:[#allocation6 + $0x18]] }
 0x21f   :  { %s3144_s27 = sld [smem:[#allocation6 + $0x19]] }
 0x220   :  { %v701_v22 = vld [vmem:[#allocation5] sm:$0xff]  ;;  %s3154_s23 = sld [smem:[#allocation6 + $0x1b]] }
 0x221   :  { %v703_v23 = vpack.c.bf16 %v701_v22, %v701_v22  ;;  %v2528_v22 = vld [vmem:[%s3509_s5 + $0x88] sm:$0xff] }
 0x222   :  { %1556 = vmatpush.bf16.msra.mxu3 %v2528_v22 }
 0x223   :  { %2233 = vmatmul.msk.bf16.vlgmr.msrb.gmra.mxu0 %vm71_vm0, %v703_v23 }
 0x233   :  { %2242 = vmatmul.msk.bf16.vlgmr.msra.gmra.mxu0 %vm71_vm0, %v702_v24 }
 0x2a0   :  { %v728_v25 = vpop.f32.mrf.mxu0 }
 0x2a8   :  { %v730_v26 = vpop.f32.mrf.mxu0 }
 0x2b0   :  { %v756_v27 = vpop.f32.mrf.mxu0 }
 0x2b1   :  { %v757_v28 = vadd.f32 %v756_v27, %v728_v25  ;;  %v2527_v27 = vld [vmem:[%s3509_s5 + $0x80] sm:$0xff] }
 0x2b2   :  { %1557 = vmatpush.bf16.msra.mxu3 %v2527_v27  ;;  %v1128_v27 = vpop.f32.mrf.mxu3 }
 0x2b3   :  { %v760_v29 = vsel %vm373_vm2, %v757_v28, 0.0  ;;  %v767_v30 = vmul.f32 %v757_v28, %v757_v28 }
 0x2b4   :  { %v761_v31 = vrot.slane %v760_v29, 4 }
 0x2b5   :  { %v768_v32 = vsel %vm373_vm2, %v767_v30, 0.0  ;;  %v2524_v30 = vld [vmem:[%s3509_s5 + $0x68] sm:$0xff] }
 0x2b6   :  { %v762_v33 = vadd.f32 %v761_v31, %v760_v29  ;;  %v769_v34 = vrot.slane %v768_v32, 4  ;;  %v2526_v31 = vld [vmem:[%s3509_s5 + $0x78] sm:$0xff]  ;;  %1088 = vmatpush.bf16.msrb.mxu2 %v2524_v30 }
 0x2b7   :  { %1160 = vmatpush.bf16.msrb.mxu0 %v2526_v31 }
 0x2b8   :  { %v763_v36 = vrot.slane %v762_v33, 2  ;;  %v770_v7 = vadd.f32 %v769_v34, %v768_v32  ;;  %v758_v37 = vpop.f32.mrf.mxu0  ;;  %v2525_v34 = vld [vmem:[%s3509_s5 + $0x70] sm:$0xff] }
 0x2ba   :  { %v764_v38 = vadd.f32 %v763_v36, %v762_v33  ;;  %v771_v39 = vrot.slane %v770_v7, 2  ;;  %v2523_v33 = vld [vmem:[%s3509_s5 + $0x60] sm:$0xff] }
 0x2bb   :  { %1089 = vmatpush.bf16.msrb.mxu2 %v2523_v33  ;;  %1161 = vmatpush.bf16.msrb.mxu0 %v2525_v34 }
 0x2bc   :  { %v765_v41 = vrot.slane %v764_v38, 1  ;;  %v772_v42 = vadd.f32 %v771_v39, %v770_v7 }
 0x2be   :  { %v766_v43 = vadd.f32 %v765_v41, %v764_v38  ;;  %v773_v44 = vrot.slane %v772_v42, 1  ;;  %v2561_v41 = vld [vmem:[%s3561_s18 + $0x2] ss:$0 sm:$0xff] }
 0x2c0   :  { %v774_v46 = vadd.f32 %v773_v44, %v772_v42  ;;  %v775_v47 = vmul.f32 0.125, %v766_v43  ;;  %v2562_v44 = vld [vmem:[%s3561_s18 + $0x3] ss:$0 sm:$0xff] }
 0x2c2   :  { %v776_v49 = vmul.f32 0.125, %v774_v46  ;;  %v777_v50 = vmul.f32 %v775_v47, %v775_v47  ;;  %v780_v60 = vsub.f32 %v757_v28, %v775_v47 }
 0x2c4   :  { %v778_v51 = vsub.f32 %v776_v49, %v777_v50 }
 0x2c6   :  { %v779_v52 = vmax.f32 %v778_v51, 0.0 }
 0x2c8   :  { %v781_v53 = vadd.f32 1e-05, %v779_v52 }
 0x2ca   :  { %2580 = vrsqrt.f32 %v781_v53  ;;  %vm788_vm10 = vweird.f32 %v781_v53 }
 0x2d0   :  { %v2581_v54 = vpop.eup %2580 }
 0x2d1   :  { %v783_v55 = vmul.f32 %v2581_v54, %v781_v53  ;;  %vm789_vm9 = vweird.f32 %v2581_v54 }
 0x2d2   :  { %vm790_vm11 = vmor %vm788_vm10, %vm789_vm9 }
 0x2d3   :  { %v784_v56 = vmul.f32 %v2581_v54, %v783_v55 }
 0x2d5   :  { %v785_v57 = vmul.f32 0.5, %v784_v56 }
 0x2d7   :  { %v786_v58 = vsub.f32 1.5, %v785_v57 }
 0x2d9   :  { %v787_v59 = vmul.f32 %v2581_v54, %v786_v58 }
 0x2db   :  { %v791_v1 = vsel %vm790_vm11, %v2581_v54, %v787_v59  ;;  %vm1683_vm11 = vcmask 64512  }
 0x2dc   :  { %v792_v2 = vmul.f32 %v791_v1, %v780_v60 }
 0x2de   :  { %v794_v63 = vmul.f32 %v2559_v62, %v792_v2 }
 0x2e0   :  { %v796_v61 = vadd.f32 %v2560_v3, %v794_v63 }
 0x2e2   :  { %v797_v4 = vmax.f32 %v796_v61, 0.0 }
 0x2e4   :  { %v798_v5 = vpack.c.bf16 %v797_v4, %v797_v4 }
 0x2e6   :  { %2259 = vmatmul.msk.bf16.vlgmr.msrb.gmra.mxu1 %vm373_vm2, %v798_v5 }
 0x363   :  { %v835_v6 = vpop.f32.mrf.mxu1 }
 0x364   :  { %v839_v8 = vsel %vm71_vm0, %v835_v6, 0.0  ;;  %v846_v9 = vmul.f32 %v835_v6, %v835_v6 }
 0x365   :  { %v840_v10 = vrot.slane %v839_v8, 4 }
 0x366   :  { %v847_v11 = vsel %vm71_vm0, %v846_v9, 0.0 }
 0x367   :  { %v841_v12 = vadd.f32 %v840_v10, %v839_v8  ;;  %v848_v13 = vrot.slane %v847_v11, 4 }
 0x369   :  { %v842_v14 = vrot.slane %v841_v12, 2  ;;  %v849_v16 = vadd.f32 %v848_v13, %v847_v11 }
 0x36b   :  { %v843_v15 = vadd.f32 %v842_v14, %v841_v12  ;;  %v850_v17 = vrot.slane %v849_v16, 2  ;;  %v837_v0 = vpop.f32.mrf.mxu1 }
 0x36d   :  { %v844_v18 = vrot.slane %v843_v15, 1  ;;  %v851_v19 = vadd.f32 %v850_v17, %v849_v16 }
 0x36f   :  { %v845_v20 = vadd.f32 %v844_v18, %v843_v15  ;;  %v852_v21 = vrot.slane %v851_v19, 1 }
 0x371   :  { %v853_v23 = vadd.f32 %v852_v21, %v851_v19  ;;  %v854_v24 = vmul.f32 0.125, %v845_v20 }
 0x373   :  { %v855_v25 = vmul.f32 0.125, %v853_v23  ;;  %v856_v26 = vmul.f32 %v854_v24, %v854_v24  ;;  %v859_v40 = vsub.f32 %v835_v6, %v854_v24 }
 0x375   :  { %v857_v28 = vsub.f32 %v855_v25, %v856_v26 }
 0x377   :  { %v858_v29 = vmax.f32 %v857_v28, 0.0  ;;  %v1130_v28 = vpop.f32.mrf.mxu3 }
 0x379   :  { %v860_v32 = vadd.f32 1e-05, %v858_v29 }
 0x37b   :  { %2582 = vrsqrt.f32 %v860_v32  ;;  %vm867_vm13 = vweird.f32 %v860_v32 }
 0x37f   :  { %v1133_v29 = vpop.f32.mrf.mxu3 }
 0x381   :  { %v2583_v35 = vpop.eup %2582 }
 0x382   :  { %v862_v36 = vmul.f32 %v2583_v35, %v860_v32  ;;  %vm868_vm12 = vweird.f32 %v2583_v35 }
 0x383   :  { %vm869_vm14 = vmor %vm867_vm13, %vm868_vm12 }
 0x384   :  { %v863_v7 = vmul.f32 %v2583_v35, %v862_v36 }
 0x386   :  { %v864_v37 = vmul.f32 0.5, %v863_v7 }
 0x387   :  { %v1135_v30 = vpop.f32.mrf.mxu3 }
 0x388   :  { %v865_v38 = vsub.f32 1.5, %v864_v37 }
 0x38a   :  { %v866_v39 = vmul.f32 %v2583_v35, %v865_v38 }
 0x38c   :  { %v870_v42 = vsel %vm869_vm14, %v2583_v35, %v866_v39 }
 0x38d   :  { %v871_v43 = vmul.f32 %v870_v42, %v859_v40 }
 0x38f   :  { %v873_v45 = vmul.f32 %v2561_v41, %v871_v43 }
 0x391   :  { %v875_v46 = vadd.f32 %v2562_v44, %v873_v45 }
 0x393   :  { %v876_v47 = vmax.f32 %v875_v46, 0.0 }
 0x395   :  { %877 = vst.msk [vmem:[#allocation2] sm:$0xff] %vm71_vm0, %v876_v47  ;;  %v1505_v48 = vpack.c.bf16 %v876_v47, %v876_v47 }
 0x397   :  { %2431 = vmatmul.msk.bf16.vlgmr.msra.gmra.mxu3 %vm71_vm0, %v1505_v48 }
 0x39c   :  { %v928_v49 = vld [vmem:[%s927_s7] sm:$0x1]  ;;  %s967_s7 = scalar_lea.vmem [#allocation2], %s3089_s10  ;;  %s3148_s10 = sld [smem:[#allocation6 + $0x1a]] }
 0x39d   :  { %v932_v50 = vld [vmem:[%s931_s13] sm:$0x1]  ;;  %929 = vst.msk [vmem:[#allocation3] sm:$0x1] %vm129_vm1, %v928_v49  ;;  %s971_s13 = scalar_lea.vmem [#allocation2], %s3091_s20  ;;  %s987_s20 = scalar_lea.vmem [#allocation2], %s3101_s29 }
 0x39e   :  { %v936_v51 = vld [vmem:[%s935_s9] sm:$0x1]  ;;  %933 = vst.msk [vmem:[#allocation3 + $0x1] sm:$0x1] %vm129_vm1, %v932_v50  ;;  %s979_s9 = scalar_lea.vmem [#allocation2], %s3095_s24  ;;  %s3158_s24 = sld [smem:[#allocation6 + $0x1c]] }
 0x39f   :  { %v940_v52 = vld [vmem:[%s939_s6] sm:$0x1]  ;;  %937 = vst.msk [vmem:[#allocation3 + $0x2] sm:$0x1] %vm129_vm1, %v936_v51  ;;  %s983_s6 = scalar_lea.vmem [#allocation2], %s3098_s25  ;;  %s999_s25 = scalar_lea.vmem [#allocation2], %s3107_s8 }
 0x3a0   :  { %v944_v53 = vld [vmem:[%s943_s0] sm:$0x1]  ;;  %941 = vst.msk [vmem:[#allocation3 + $0x3] sm:$0x1] %vm129_vm1, %v940_v52  ;;  %s991_s0 = scalar_lea.vmem [#allocation2], %s3103_s12  ;;  %s3164_s29 = sld [smem:[#allocation6 + $0x1d]] }
 0x3a1   :  { %v948_v54 = vld [vmem:[%s947_s11] sm:$0x1]  ;;  %945 = vst.msk [vmem:[#allocation3 + $0x4] sm:$0x1] %vm129_vm1, %v944_v53  ;;  %s995_s11 = scalar_lea.vmem [#allocation2], %s3105_s28  ;;  %s3168_s12 = sld [smem:[#allocation6 + $0x1e]] }
 0x3a2   :  { %v952_v55 = vld [vmem:[%s951_s4] sm:$0x1]  ;;  %949 = vst.msk [vmem:[#allocation3 + $0x5] sm:$0x1] %vm129_vm1, %v948_v54  ;;  %s1003_s4 = scalar_lea.vmem [#allocation2], %s3114_s16  ;;  %s3172_s28 = sld [smem:[#allocation6 + $0x1f]] }
 0x3a3   :  { %v956_v56 = vld [vmem:[%s955_s14] sm:$0x1]  ;;  %953 = vst.msk [vmem:[#allocation3 + $0x6] sm:$0x1] %vm129_vm1, %v952_v55  ;;  %s1007_s14 = scalar_lea.vmem [#allocation2], %s3118_s1  ;;  %s1011_s8 = scalar_lea.vmem [#allocation2], %s3124_s30 }
 0x3a4   :  { %v960_v57 = vld [vmem:[%s959_s2] sm:$0x1]  ;;  %957 = vst.msk [vmem:[#allocation3 + $0x7] sm:$0x1] %vm129_vm1, %v956_v56  ;;  %s1015_s2 = scalar_lea.vmem [#allocation2], %s3128_s15  ;;  %s1019_s16 = scalar_lea.vmem [#allocation2], %s3134_s3 }
 0x3a5   :  { %v964_v58 = vld [vmem:[%s963_s19] sm:$0x1]  ;;  %961 = vst.msk [vmem:[#allocation3 + $0x8] sm:$0x1] %vm129_vm1, %v960_v57  ;;  %s1023_s1 = scalar_lea.vmem [#allocation2], %s3138_s22  ;;  %s1027_s30 = scalar_lea.vmem [#allocation2], %s3144_s27 }
 0x3a6   :  { %v968_v59 = vld [vmem:[%s967_s7] sm:$0x1]  ;;  %965 = vst.msk [vmem:[#allocation3 + $0x9] sm:$0x1] %vm129_vm1, %v964_v58  ;;  %s1031_s15 = scalar_lea.vmem [#allocation2], %s3148_s10  ;;  %s1035_s19 = scalar_lea.vmem [#allocation2], %s3154_s23 }
 0x3a7   :  { %v972_v60 = vld [vmem:[%s971_s13] sm:$0x1]  ;;  %969 = vst.msk [vmem:[#allocation3 + $0xa] sm:$0x1] %vm129_vm1, %v968_v59  ;;  %s1039_s3 = scalar_lea.vmem [#allocation2], %s3158_s24  ;;  %s1043_s7 = scalar_lea.vmem [#allocation2], %s3164_s29 }
 0x3a8   :  { %v976_v62 = vld [vmem:[%s975_s26] sm:$0x1]  ;;  %973 = vst.msk [vmem:[#allocation3 + $0xb] sm:$0x1] %vm129_vm1, %v972_v60  ;;  %s1047_s22 = scalar_lea.vmem [#allocation2], %s3168_s12  ;;  %s1051_s13 = scalar_lea.vmem [#allocation2], %s3172_s28 }
 0x3a9   :  { %v980_v1 = vld [vmem:[%s979_s9] sm:$0x1]  ;;  %977 = vst.msk [vmem:[#allocation3 + $0xc] sm:$0x1] %vm129_vm1, %v976_v62  ;;  %s3309_s26 = sld [smem:[#allocation9 + $0xc]] }
 0x3aa   :  { %v984_v2 = vld [vmem:[%s983_s6] sm:$0x1]  ;;  %981 = vst.msk [vmem:[#allocation3 + $0xd] sm:$0x1] %vm129_vm1, %v980_v1  ;;  %s3311_s27 = sld [smem:[#allocation9 + $0xd]] }
 0x3ab   :  { %v988_v3 = vld [vmem:[%s987_s20] sm:$0x1]  ;;  %985 = vst.msk [vmem:[#allocation3 + $0xe] sm:$0x1] %vm129_vm1, %v984_v2  ;;  %v1054_v11 = vld [vmem:[#allocation3] sm:$0xff]  ;;  %s3313_s9 = sld [smem:[#allocation9 + $0xe]] }
 0x3ac   :  { %v992_v63 = vld [vmem:[%s991_s0] sm:$0x1]  ;;  %989 = vst.msk [vmem:[#allocation3 + $0xf] sm:$0x1] %vm129_vm1, %v988_v3  ;;  %s3315_s10 = sld [smem:[#allocation9 + $0xf]] }
 0x3ad   :  { %v996_v61 = vld [vmem:[%s995_s11] sm:$0x1]  ;;  %993 = vst.msk [vmem:[#allocation3 + $0x10] sm:$0x1] %vm129_vm1, %v992_v63  ;;  %s3317_s6 = sld [smem:[#allocation9 + $0x10]] }
 0x3ae   :  { %v1000_v4 = vld [vmem:[%s999_s25] sm:$0x1]  ;;  %997 = vst.msk [vmem:[#allocation3 + $0x11] sm:$0x1] %vm129_vm1, %v996_v61  ;;  %s3326_s0 = sld [smem:[#allocation9 + $0x11]] }
 0x3af   :  { %v1004_v5 = vld [vmem:[%s1003_s4] sm:$0x1]  ;;  %1001 = vst.msk [vmem:[#allocation3 + $0x12] sm:$0x1] %vm129_vm1, %v1000_v4  ;;  %s3328_s24 = sld [smem:[#allocation9 + $0x12]] }
 0x3b0   :  { %v1008_v6 = vld [vmem:[%s1007_s14] sm:$0x1]  ;;  %1005 = vst.msk [vmem:[#allocation3 + $0x13] sm:$0x1] %vm129_vm1, %v1004_v5  ;;  %s3333_s29 = sld [smem:[#allocation9 + $0x13]] }
 0x3b1   :  { %v1012_v8 = vld [vmem:[%s1011_s8] sm:$0x1]  ;;  %1009 = vst.msk [vmem:[#allocation3 + $0x14] sm:$0x1] %vm129_vm1, %v1008_v6  ;;  %s3285_s8 = sld [smem:[#allocation9]] }
 0x3b2   :  { %v1016_v9 = vld [vmem:[%s1015_s2] sm:$0x1]  ;;  %1013 = vst.msk [vmem:[#allocation3 + $0x15] sm:$0x1] %vm129_vm1, %v1012_v8  ;;  %s3287_s2 = sld [smem:[#allocation9 + $0x1]] }
 0x3b3   :  { %v1020_v10 = vld [vmem:[%s1019_s16] sm:$0x1]  ;;  %1017 = vst.msk [vmem:[#allocation3 + $0x16] sm:$0x1] %vm129_vm1, %v1016_v9  ;;  %v1055_v14 = vld [vmem:[#allocation3 + $0x8] sm:$0xff]  ;;  %s3289_s16 = sld [smem:[#allocation9 + $0x2]] }
 0x3b4   :  { %v1024_v12 = vld [vmem:[%s1023_s1] sm:$0x1]  ;;  %1021 = vst.msk [vmem:[#allocation3 + $0x17] sm:$0x1] %vm129_vm1, %v1020_v10  ;;  %v1062_v15 = vpack.c.bf16 %v1055_v14, %v1054_v11  ;;  %s3291_s1 = sld [smem:[#allocation9 + $0x3]] }
 0x3b5   :  { %v1028_v13 = vld [vmem:[%s1027_s30] sm:$0x1]  ;;  %1025 = vst.msk [vmem:[#allocation3 + $0x18] sm:$0x1] %vm129_vm1, %v1024_v12  ;;  %s3293_s30 = sld [smem:[#allocation9 + $0x4]] }
 0x3b6   :  { %v1032_v16 = vld [vmem:[%s1031_s15] sm:$0x1]  ;;  %1029 = vst.msk [vmem:[#allocation3 + $0x19] sm:$0x1] %vm129_vm1, %v1028_v13  ;;  %2343 = vmatmul.msk.bf16.vlgmr.msrb.gmra.mxu2 %vm71_vm0, %v1062_v15  ;;  %s3295_s15 = sld [smem:[#allocation9 + $0x5]] }
 0x3b7   :  { %v1036_v17 = vld [vmem:[%s1035_s19] sm:$0x1]  ;;  %1033 = vst.msk [vmem:[#allocation3 + $0x1a] sm:$0x1] %vm129_vm1, %v1032_v16  ;;  %s3297_s19 = sld [smem:[#allocation9 + $0x6]] }
 0x3b8   :  { %v1040_v0 = vld [vmem:[%s1039_s3] sm:$0x1]  ;;  %1037 = vst.msk [vmem:[#allocation3 + $0x1b] sm:$0x1] %vm129_vm1, %v1036_v17  ;;  %s3299_s3 = sld [smem:[#allocation9 + $0x7]] }
 0x3b9   :  { %v1044_v18 = vld [vmem:[%s1043_s7] sm:$0x1]  ;;  %1041 = vst.msk [vmem:[#allocation3 + $0x1c] sm:$0x1] %vm129_vm1, %v1040_v0  ;;  %s3303_s7 = sld [smem:[#allocation9 + $0x9]] }
 0x3ba   :  { %v1048_v19 = vld [vmem:[%s1047_s22] sm:$0x1]  ;;  %1045 = vst.msk [vmem:[#allocation3 + $0x1d] sm:$0x1] %vm129_vm1, %v1044_v18  ;;  %v2532_v18 = vld [vmem:[%s3559_s17 + $0x48] sm:$0xff]  ;;  %s3305_s22 = sld [smem:[#allocation9 + $0xa]] }
 0x3bb   :  { %v1052_v20 = vld [vmem:[%s1051_s13] sm:$0x1]  ;;  %1049 = vst.msk [vmem:[#allocation3 + $0x1e] sm:$0x1] %vm129_vm1, %v1048_v19  ;;  %v1056_v21 = vld [vmem:[#allocation3 + $0x10] sm:$0xff]  ;;  %s3307_s13 = sld [smem:[#allocation9 + $0xb]] }
 0x3bc   :  { %1053 = vst.msk [vmem:[#allocation3 + $0x1f] sm:$0x1] %vm129_vm1, %v1052_v20  ;;  %v1058_v22 = vadd.f32 %v1056_v21, %v1054_v11  ;;  %v2534_v11 = vld [vmem:[%s3559_s17 + $0x58] sm:$0xff]  ;;  %s3335_s4 = sld [smem:[#allocation9 + $0x14]] }
 0x3bd   :  { %1281 = vmatpush.bf16.msra.mxu1 %v2534_v11  ;;  %s3337_s12 = sld [smem:[#allocation9 + $0x15]] }
 0x3be   :  { %s3339_s14 = sld [smem:[#allocation9 + $0x16]] }
 0x3bf   :  { %s3341_s28 = sld [smem:[#allocation9 + $0x17]] }
 0x3c0   :  { %s3343_s20 = sld [smem:[#allocation9 + $0x18]] }
 0x3c1   :  { %s3345_s23 = sld [smem:[#allocation9 + $0x19]] }
 0x3c2   :  { %s3347_s11 = sld [smem:[#allocation9 + $0x1a]] }
 0x3c3   :  { %v1057_v23 = vld [vmem:[#allocation3 + $0x18] sm:$0xff]  ;;  %s3350_s25 = sld [smem:[#allocation9 + $0x1b]] }
 0x3c4   :  { %v1059_v24 = vadd.f32 %v1057_v23, %v1055_v14  ;;  %v1063_v25 = vpack.c.bf16 %v1057_v23, %v1056_v21  ;;  %v2533_v14 = vld [vmem:[%s3559_s17 + $0x50] sm:$0xff] }
 0x3c5   :  { %1282 = vmatpush.bf16.msra.mxu1 %v2533_v14  ;;  %3562 = sst [smem:[#allocation15_spill]] %s3341_s28  ;;  %s1369_s28 = scalar_lea.vmem [#allocation4], %s3285_s8 }
 0x3c6   :  { %v1138_v26 = vpack.c.bf16 %v1059_v24, %v1058_v22  ;;  %2344 = vmatmul.msk.bf16.gmra.mxu2 %vm71_vm0, %v1063_v25  ;;  %v2531_v22 = vld [vmem:[%s3559_s17 + $0x40] sm:$0xff]  ;;  %s3359_s17 = sld [smem:[#allocation9 + $0x1e]]  ;;  %s1381_s8 = scalar_lea.vmem [#allocation4], %s3291_s1 }
 0x3c7   :  { %3563 = sst [smem:[#allocation16_spill]] %s3345_s23  ;;  %s1390_s23 = scalar_lea.vmem [#allocation4], %s3295_s15 }
 0x3c8   :  { %2363 = vmatmul.msk.bf16.vlgmr.msrb.gmra.mxu0 %vm71_vm0, %v1138_v26  ;;  %3564 = sst [smem:[#allocation18_spill]] %s3347_s11  ;;  %s1437_s1 = scalar_lea.vmem [#allocation4], %s3317_s6 }
 0x3c9   :  { %1283 = vmatpush.bf16.msra.mxu1 %v2532_v18  ;;  %3565 = sst [smem:[#allocation21_spill]] %s3350_s25  ;;  %s1373_s25 = scalar_lea.vmem [#allocation4], %s3287_s2 }
 0x3ca   :  { %s3361_s11 = sld [smem:[#allocation9 + $0x1f]]  ;;  %s1394_s2 = scalar_lea.vmem [#allocation4], %s3297_s19 }
 0x3cb   :  { %s1415_s15 = scalar_lea.vmem [#allocation4], %s3307_s13  ;;  %s1428_s19 = scalar_lea.vmem [#allocation4], %s3313_s9 }
 0x3cc   :  { %3568 = sst [smem:[#allocation19_spill]] %s3359_s17  ;;  %s1432_s13 = scalar_lea.vmem [#allocation4], %s3315_s10 }
 0x3cd   :  { %1284 = vmatpush.bf16.msra.mxu1 %v2531_v22  ;;  %s1471_s9 = scalar_lea.vmem [#allocation4], %s3343_s20  ;;  %s3572_s6 = sld [smem:[#allocation15_spill]] }
 0x3ce   :  { %s3574_s10 = sld [smem:[#allocation19_spill]] }
 0x3d8   :  { %2364 = vmatmul.msk.bf16.gmra.mxu0 %vm71_vm0, %v1138_v26 }
 0x41a   :  { %v3203_v31 = vpop.f32.mrf.mxu3 }
 0x422   :  { %v1561_v32 = vpop.f32.mrf.mxu3 }
 0x439   :  { %v1091_v33 = vpop.f32.mrf.mxu2 }
 0x43a   :  { %v1129_v38 = vadd.f32 %v1128_v27, %v1091_v33 }
 0x441   :  { %v1093_v34 = vpop.f32.mrf.mxu2 }
 0x442   :  { %v1131_v37 = vadd.f32 %v1130_v28, %v1093_v34  ;;  %v2563_v34 = vld [vmem:[%s3560_s21 + $0x4] ss:$0 sm:$0xff] }
 0x445   :  { %v1163_v35 = vpop.f32.mrf.mxu0 }
 0x446   :  { %v3207_v42 = vadd.f32 %v1163_v35, %v1129_v38 }
 0x448   :  { %v1190_v46 = vmul.f32 %v3207_v42, %v3207_v42  ;;  %v1177_v50 = vsel %vm373_vm2, %v3207_v42, 0.0 }
 0x449   :  { %v1096_v7 = vpop.f32.mrf.mxu2 }
 0x44a   :  { %v1134_v39 = vadd.f32 %v1133_v29, %v1096_v7  ;;  %v1194_v55 = vsel %vm373_vm2, %v1190_v46, 0.0 }
 0x44d   :  { %v1165_v36 = vpop.f32.mrf.mxu0 }
 0x44e   :  { %v3205_v40 = vadd.f32 %v1165_v36, %v1131_v37  ;;  %v2564_v37 = vld [vmem:[%s3560_s21 + $0x5] ss:$0 sm:$0xff]  ;;  %s3356_s21 = sld [smem:[#allocation9 + $0x1d]] }
 0x450   :  { %v1191_v45 = vmul.f32 %v3205_v40, %v3205_v40  ;;  %v1178_v47 = vsel %vm373_vm2, %v3205_v40, 0.0 }
 0x451   :  { %v1098_v44 = vpop.f32.mrf.mxu2  ;;  %v1179_v53 = vadd.f32 %v1178_v47, %v1177_v50 }
 0x452   :  { %v1136_v49 = vadd.f32 %v1135_v30, %v1098_v44  ;;  %v1195_v51 = vsel %vm373_vm2, %v1191_v45, 0.0 }
 0x453   :  { %v1196_v58 = vadd.f32 %v1195_v51, %v1194_v55 }
 0x454   :  { %3567 = sst [smem:[#allocation17_spill]] %s3356_s21  ;;  %s1377_s21 = scalar_lea.vmem [#allocation4], %s3289_s16 }
 0x455   :  { %v1168_v41 = vpop.f32.mrf.mxu0  ;;  %s1424_s16 = scalar_lea.vmem [#allocation4], %s3311_s27  ;;  %s3571_s27 = sld [smem:[#allocation17_spill]] }
 0x456   :  { %v3209_v43 = vadd.f32 %v1168_v41, %v1134_v39 }
 0x458   :  { %v1192_v48 = vmul.f32 %v3209_v43, %v3209_v43  ;;  %v1180_v52 = vsel %vm373_vm2, %v3209_v43, 0.0 }
 0x459   :  { %v1181_v59 = vadd.f32 %v1180_v52, %v1179_v53 }
 0x45a   :  { %v1197_v56 = vsel %vm373_vm2, %v1192_v48, 0.0 }
 0x45b   :  { %v1198_v1 = vadd.f32 %v1197_v56, %v1196_v58  ;;  %s1492_s20 = scalar_lea.vmem [#allocation4], %s3571_s27  ;;  %s3582_s27 = sld [smem:[#allocation31_spill]] }
 0x45d   :  { %v1170_v54 = vpop.f32.mrf.mxu0 }
 0x45e   :  { %v1176_v57 = vadd.f32 %v1170_v54, %v1136_v49 }
 0x460   :  { %v1182_v60 = vsel %vm373_vm2, %v1176_v57, 0.0  ;;  %v1193_v62 = vmul.f32 %v1176_v57, %v1176_v57 }
 0x461   :  { %v1183_v2 = vadd.f32 %v1182_v60, %v1181_v59 }
 0x462   :  { %v1199_v3 = vsel %vm373_vm2, %v1193_v62, 0.0 }
 0x463   :  { %v1184_v63 = vrot.slane %v1183_v2, 4  ;;  %v1200_v61 = vadd.f32 %v1199_v3, %v1198_v1 }
 0x465   :  { %v1185_v4 = vadd.f32 %v1184_v63, %v1183_v2  ;;  %v1201_v5 = vrot.slane %v1200_v61, 4 }
 0x467   :  { %v1186_v6 = vrot.slane %v1185_v4, 2  ;;  %v1202_v8 = vadd.f32 %v1201_v5, %v1200_v61 }
 0x469   :  { %v1187_v9 = vadd.f32 %v1186_v6, %v1185_v4  ;;  %v1203_v10 = vrot.slane %v1202_v8, 2 }
 0x46b   :  { %v1188_v12 = vrot.slane %v1187_v9, 1  ;;  %v1204_v13 = vadd.f32 %v1203_v10, %v1202_v8 }
 0x46d   :  { %v1189_v16 = vadd.f32 %v1188_v12, %v1187_v9  ;;  %v1205_v15 = vrot.slane %v1204_v13, 1 }
 0x46f   :  { %v1206_v17 = vadd.f32 %v1205_v15, %v1204_v13  ;;  %v1207_v0 = vmul.f32 0.03125, %v1189_v16 }
 0x471   :  { %v1208_v19 = vmul.f32 0.03125, %v1206_v17  ;;  %v1209_v20 = vmul.f32 %v1207_v0, %v1207_v0  ;;  %v1212_v32 = vsub.f32 %v3207_v42, %v1207_v0  ;;  %v1213_v33 = vsub.f32 %v3205_v40, %v1207_v0 }
 0x472   :  { %v1215_v45 = vsub.f32 %v1176_v57, %v1207_v0  ;;  %v1214_v40 = vsub.f32 %v3209_v43, %v1207_v0 }
 0x473   :  { %v1210_v21 = vsub.f32 %v1208_v19, %v1209_v20 }
 0x475   :  { %v1211_v23 = vmax.f32 %v1210_v21, 0.0 }
 0x477   :  { %v1216_v24 = vadd.f32 1e-05, %v1211_v23 }
 0x479   :  { %2584 = vrsqrt.f32 %v1216_v24  ;;  %vm1223_vm3 = vweird.f32 %v1216_v24 }
 0x47f   :  { %v2585_v25 = vpop.eup %2584 }
 0x480   :  { %v1218_v26 = vmul.f32 %v2585_v25, %v1216_v24  ;;  %vm1224_vm15 = vweird.f32 %v2585_v25 }
 0x481   :  { %vm1225_vm4 = vmor %vm1223_vm3, %vm1224_vm15  ;;  %vm1795_vm15 = vcmask 517120  }
 0x482   :  { %v1219_v27 = vmul.f32 %v2585_v25, %v1218_v26 }
 0x484   :  { %v1220_v28 = vmul.f32 0.5, %v1219_v27 }
 0x486   :  { %v1221_v29 = vsub.f32 1.5, %v1220_v28 }
 0x488   :  { %v1222_v30 = vmul.f32 %v2585_v25, %v1221_v29 }
 0x48a   :  { %v1226_v35 = vsel %vm1225_vm4, %v2585_v25, %v1222_v30 }
 0x48b   :  { %v1227_v36 = vmul.f32 %v1226_v35, %v1212_v32  ;;  %v1228_v7 = vmul.f32 %v1226_v35, %v1213_v33  ;;  %v1230_v47 = vmul.f32 %v1226_v35, %v1215_v45  ;;  %v1229_v49 = vmul.f32 %v1226_v35, %v1214_v40  ;;  %v2530_v33 = vld [vmem:[%s3509_s5 + $0x98] sm:$0xff]  ;;  %v2529_v35 = vld [vmem:[%s3509_s5 + $0x90] sm:$0xff]  ;;  %s3301_s5 = sld [smem:[#allocation9 + $0x8]]  ;;  %v2565_v40 = vld [vmem:[%s3561_s18 + $0x4] ss:$0 sm:$0xff] }
 0x48c   :  { %1528 = vmatpush.bf16.msra.mxu2 %v2530_v33 }
 0x48d   :  { %v1232_v38 = vmul.f32 %v2563_v34, %v1227_v36  ;;  %v1233_v39 = vmul.f32 %v2563_v34, %v1228_v7  ;;  %v1234_v50 = vmul.f32 %v2563_v34, %v1229_v49  ;;  %v1235_v51 = vmul.f32 %v2563_v34, %v1230_v47 }
 0x48f   :  { %v1237_v41 = vadd.f32 %v2564_v37, %v1232_v38  ;;  %v1238_v44 = vadd.f32 %v2564_v37, %v1233_v39  ;;  %v1239_v52 = vadd.f32 %v2564_v37, %v1234_v50  ;;  %v1240_v53 = vadd.f32 %v2564_v37, %v1235_v51 }
 0x490   :  { %1529 = vmatpush.bf16.msra.mxu2 %v2529_v35 }
 0x491   :  { %v1241_v42 = vmax.f32 %v1237_v41, 0.0  ;;  %v1242_v46 = vmax.f32 %v1238_v44, 0.0  ;;  %v1243_v54 = vmax.f32 %v1239_v52, 0.0  ;;  %v1244_v55 = vmax.f32 %v1240_v53, 0.0  ;;  %v2566_v52 = vld [vmem:[%s3561_s18 + $0x5] ss:$0 sm:$0xff] }
 0x492   :  { %s3353_s18 = sld [smem:[#allocation9 + $0x1c]]  ;;  %s1403_s17 = scalar_lea.vmem [#allocation4], %s3301_s5 }
 0x493   :  { %v1245_v48 = vpack.c.bf16 %v1242_v46, %v1241_v42  ;;  %v1246_v56 = vpack.c.bf16 %v1244_v55, %v1243_v54  ;;  %s1445_s5 = scalar_lea.vmem [#allocation4], %s3328_s24  ;;  %s3573_s24 = sld [smem:[#allocation18_spill]] }
 0x495   :  { %2381 = vmatmul.msk.bf16.vlgmr.msra.gmra.mxu1 %vm373_vm2, %v1245_v48 }
 0x498   :  { %3566 = sst [smem:[#allocation22_spill]] %s3353_s18  ;;  %s1386_s18 = scalar_lea.vmem [#allocation4], %s3293_s30 }
 0x499   :  { %s1441_s30 = scalar_lea.vmem [#allocation4], %s3326_s0  ;;  %s1449_s0 = scalar_lea.vmem [#allocation4], %s3333_s29 }
 0x49a   :  { %s1466_s29 = scalar_lea.vmem [#allocation4], %s3572_s6 }
 0x4a5   :  { %2382 = vmatmul.msk.bf16.gmra.mxu1 %vm373_vm2, %v1246_v56 }
 0x512   :  { %v3251_v58 = vpop.f32.mrf.mxu1 }
 0x513   :  { %v1309_v60 = vmul.f32 %v3251_v58, %v3251_v58  ;;  %v1296_v2 = vsel %vm71_vm0, %v3251_v58, 0.0 }
 0x515   :  { %v1313_v4 = vsel %vm71_vm0, %v1309_v60, 0.0 }
 0x51a   :  { %v3253_v57 = vpop.f32.mrf.mxu1 }
 0x51b   :  { %v1310_v43 = vmul.f32 %v3253_v57, %v3253_v57  ;;  %v1297_v62 = vsel %vm71_vm0, %v3253_v57, 0.0 }
 0x51c   :  { %v1298_v61 = vadd.f32 %v1297_v62, %v1296_v2 }
 0x51d   :  { %v1314_v3 = vsel %vm71_vm0, %v1310_v43, 0.0 }
 0x51e   :  { %v1315_v6 = vadd.f32 %v1314_v3, %v1313_v4 }
 0x522   :  { %v3255_v59 = vpop.f32.mrf.mxu1 }
 0x523   :  { %v1311_v1 = vmul.f32 %v3255_v59, %v3255_v59  ;;  %v1299_v63 = vsel %vm71_vm0, %v3255_v59, 0.0 }
 0x524   :  { %v1300_v8 = vadd.f32 %v1299_v63, %v1298_v61 }
 0x525   :  { %v1316_v5 = vsel %vm71_vm0, %v1311_v1, 0.0 }
 0x526   :  { %v1317_v12 = vadd.f32 %v1316_v5, %v1315_v6 }
 0x52a   :  { %v3272_v9 = vpop.f32.mrf.mxu1 }
 0x52b   :  { %v1301_v10 = vsel %vm71_vm0, %v3272_v9, 0.0  ;;  %v1312_v11 = vmul.f32 %v3272_v9, %v3272_v9 }
 0x52c   :  { %v1302_v13 = vadd.f32 %v1301_v10, %v1300_v8 }
 0x52d   :  { %v1318_v14 = vsel %vm71_vm0, %v1312_v11, 0.0 }
 0x52e   :  { %v1303_v16 = vrot.slane %v1302_v13, 4  ;;  %v1319_v15 = vadd.f32 %v1318_v14, %v1317_v12 }
 0x530   :  { %v1304_v17 = vadd.f32 %v1303_v16, %v1302_v13  ;;  %v1320_v0 = vrot.slane %v1319_v15, 4 }
 0x532   :  { %v1305_v18 = vrot.slane %v1304_v17, 2  ;;  %v1321_v19 = vadd.f32 %v1320_v0, %v1319_v15 }
 0x534   :  { %v1306_v20 = vadd.f32 %v1305_v18, %v1304_v17  ;;  %v1322_v21 = vrot.slane %v1321_v19, 2 }
 0x536   :  { %v1307_v22 = vrot.slane %v1306_v20, 1  ;;  %v1323_v23 = vadd.f32 %v1322_v21, %v1321_v19 }
 0x538   :  { %v1308_v24 = vadd.f32 %v1307_v22, %v1306_v20  ;;  %v1324_v25 = vrot.slane %v1323_v23, 1 }
 0x53a   :  { %v1325_v26 = vadd.f32 %v1324_v25, %v1323_v23  ;;  %v1326_v27 = vmul.f32 0.03125, %v1308_v24 }
 0x53c   :  { %v1327_v28 = vmul.f32 0.03125, %v1325_v26  ;;  %v1328_v29 = vmul.f32 %v1326_v27, %v1326_v27  ;;  %v1331_v44 = vsub.f32 %v3251_v58, %v1326_v27  ;;  %v1332_v45 = vsub.f32 %v3253_v57, %v1326_v27 }
 0x53d   :  { %v1333_v42 = vsub.f32 %v3255_v59, %v1326_v27  ;;  %v1334_v46 = vsub.f32 %v3272_v9, %v1326_v27 }
 0x53e   :  { %v1329_v30 = vsub.f32 %v1327_v28, %v1328_v29 }
 0x540   :  { %v1330_v32 = vmax.f32 %v1329_v30, 0.0 }
 0x542   :  { %v1335_v34 = vadd.f32 1e-05, %v1330_v32 }
 0x544   :  { %2586 = vrsqrt.f32 %v1335_v34  ;;  %vm1342_vm6 = vweird.f32 %v1335_v34 }
 0x54a   :  { %v2587_v36 = vpop.eup %2586 }
 0x54b   :  { %v1337_v7 = vmul.f32 %v2587_v36, %v1335_v34  ;;  %vm1343_vm5 = vweird.f32 %v2587_v36 }
 0x54c   :  { %vm1344_vm7 = vmor %vm1342_vm6, %vm1343_vm5 }
 0x54d   :  { %v1338_v37 = vmul.f32 %v2587_v36, %v1337_v7 }
 0x54f   :  { %v1339_v38 = vmul.f32 0.5, %v1338_v37 }
 0x551   :  { %v1340_v39 = vsub.f32 1.5, %v1339_v38 }
 0x553   :  { %v1341_v41 = vmul.f32 %v2587_v36, %v1340_v39 }
 0x555   :  { %v1345_v47 = vsel %vm1344_vm7, %v2587_v36, %v1341_v41 }
 0x556   :  { %v1346_v48 = vmul.f32 %v1345_v47, %v1331_v44  ;;  %v1347_v49 = vmul.f32 %v1345_v47, %v1332_v45  ;;  %v1348_v50 = vmul.f32 %v1345_v47, %v1333_v42  ;;  %v1349_v51 = vmul.f32 %v1345_v47, %v1334_v46 }
 0x558   :  { %v1351_v53 = vmul.f32 %v2565_v40, %v1346_v48  ;;  %v1352_v54 = vmul.f32 %v2565_v40, %v1347_v49  ;;  %v1353_v55 = vmul.f32 %v2565_v40, %v1348_v50  ;;  %v1354_v56 = vmul.f32 %v2565_v40, %v1349_v51 }
 0x55a   :  { %v1356_v58 = vadd.f32 %v2566_v52, %v1351_v53  ;;  %v1357_v57 = vadd.f32 %v2566_v52, %v1352_v54  ;;  %v1358_v59 = vadd.f32 %v2566_v52, %v1353_v55  ;;  %v1359_v43 = vadd.f32 %v2566_v52, %v1354_v56 }
 0x55c   :  { %v1360_v60 = vmax.f32 %v1356_v58, 0.0  ;;  %v1361_v62 = vmax.f32 %v1357_v57, 0.0  ;;  %v1362_v1 = vmax.f32 %v1358_v59, 0.0  ;;  %v1363_v2 = vmax.f32 %v1359_v43, 0.0 }
 0x55e   :  { %1364 = vst.msk [vmem:[#allocation4] sm:$0xff] %vm71_vm0, %v1360_v60 }
 0x55f   :  { %1365 = vst.msk [vmem:[#allocation4 + $0x8] sm:$0xff] %vm71_vm0, %v1361_v62 }
 0x560   :  { %1366 = vst.msk [vmem:[#allocation4 + $0x10] sm:$0xff] %vm71_vm0, %v1362_v1 }
 0x561   :  { %1367 = vst.msk [vmem:[#allocation4 + $0x18] sm:$0xff] %vm71_vm0, %v1363_v2 }
 0x568   :  { %v1370_v3 = vld [vmem:[%s1369_s28] sm:$0x1]  ;;  %s1407_s28 = scalar_lea.vmem [#allocation4], %s3303_s7  ;;  %s3569_s7 = sld [smem:[#allocation16_spill]] }
 0x569   :  { %v1374_v63 = vld [vmem:[%s1373_s25] sm:$0x1] }
 0x56a   :  { %v1375_v61 = vadd.f32 %v1374_v63, %v1370_v3  ;;  %v1387_v4 = vld [vmem:[%s1386_s18] sm:$0x1]  ;;  %s1398_s18 = scalar_lea.vmem [#allocation4], %s3299_s3  ;;  %s1454_s3 = scalar_lea.vmem [#allocation4], %s3335_s4 }
 0x56b   :  { %v1391_v5 = vld [vmem:[%s1390_s23] sm:$0x1]  ;;  %s1462_s4 = scalar_lea.vmem [#allocation4], %s3339_s14  ;;  %s3575_s23 = sld [smem:[#allocation21_spill]] }
 0x56c   :  { %v1378_v6 = vld [vmem:[%s1377_s21] sm:$0x1]  ;;  %v1392_v8 = vadd.f32 %v1391_v5, %v1387_v4  ;;  %s1420_s21 = scalar_lea.vmem [#allocation4], %s3309_s26  ;;  %s3570_s26 = sld [smem:[#allocation22_spill]] }
 0x56d   :  { %v1404_v9 = vld [vmem:[%s1403_s17] sm:$0x1]  ;;  %v1379_v10 = vadd.f32 %v1378_v6, %v1375_v61  ;;  %s1411_s17 = scalar_lea.vmem [#allocation4], %s3305_s22  ;;  %s1458_s22 = scalar_lea.vmem [#allocation4], %s3337_s12 }
 0x56e   :  { %v1382_v11 = vld [vmem:[%s1381_s8] sm:$0x1]  ;;  %s1475_s12 = scalar_lea.vmem [#allocation4], %s3569_s7  ;;  %s1479_s14 = scalar_lea.vmem [#allocation4], %s3573_s24 }
 0x56f   :  { %v1395_v12 = vld [vmem:[%s1394_s2] sm:$0x1]  ;;  %v1383_v18 = vadd.f32 %v1382_v11, %v1379_v10  ;;  %s1496_s8 = scalar_lea.vmem [#allocation4], %s3574_s10  ;;  %s3577_s7 = sld [smem:[#allocation27_spill]] }
 0x570   :  { %v1408_v13 = vld [vmem:[%s1407_s28] sm:$0x1]  ;;  %v1396_v14 = vadd.f32 %v1395_v12, %v1392_v8  ;;  %s1500_s28 = scalar_lea.vmem [#allocation4], %s3361_s11  ;;  %s3579_s24 = sld [smem:[#allocation29_spill]] }
 0x571   :  { %v1399_v16 = vld [vmem:[%s1398_s18] sm:$0x1]  ;;  %v1409_v15 = vadd.f32 %v1408_v13, %v1404_v9  ;;  %1384 = vst.msk [vmem:[#allocation5] sm:$0x1] %vm129_vm1, %v1383_v18  ;;  %s1483_s2 = scalar_lea.vmem [#allocation4], %s3575_s23  ;;  %s3580_s10 = sld [smem:[#allocation28_spill]] }
 0x572   :  { %v1421_v17 = vld [vmem:[%s1420_s21] sm:$0x1]  ;;  %v1400_v23 = vadd.f32 %v1399_v16, %v1396_v14  ;;  %s1488_s25 = scalar_lea.vmem [#allocation4], %s3570_s26  ;;  %s3576_s21 = sld [smem:[#allocation26_spill]] }
 0x573   :  { %v1425_v0 = vld [vmem:[%s1424_s16] sm:$0x1] }
 0x574   :  { %v1412_v19 = vld [vmem:[%s1411_s17] sm:$0x1]  ;;  %v1426_v20 = vadd.f32 %v1425_v0, %v1421_v17  ;;  %1401 = vst.msk [vmem:[#allocation5 + $0x1] sm:$0x1] %vm129_vm1, %v1400_v23 }
 0x575   :  { %v1438_v21 = vld [vmem:[%s1437_s1] sm:$0x1]  ;;  %v1413_v24 = vadd.f32 %v1412_v19, %v1409_v15 }
 0x576   :  { %v1442_v22 = vld [vmem:[%s1441_s30] sm:$0x1] }
 0x577   :  { %v1416_v25 = vld [vmem:[%s1415_s15] sm:$0x1]  ;;  %v1443_v27 = vadd.f32 %v1442_v22, %v1438_v21 }
 0x578   :  { %v1429_v26 = vld [vmem:[%s1428_s19] sm:$0x1]  ;;  %v1417_v33 = vadd.f32 %v1416_v25, %v1413_v24  ;;  %v2538_v5 = vld [vmem:[%s3576_s21 + $0x78] sm:$0xff]  ;;  %v2536_v15 = vld [vmem:[%s3576_s21 + $0x68] sm:$0xff] }
 0x579   :  { %v1455_v28 = vld [vmem:[%s1454_s3] sm:$0x1]  ;;  %v1430_v29 = vadd.f32 %v1429_v26, %v1426_v20  ;;  %1633 = vmatpush.bf16.msra.mxu0 %v2538_v5 }
 0x57a   :  { %v1446_v30 = vld [vmem:[%s1445_s5] sm:$0x1]  ;;  %1418 = vst.msk [vmem:[#allocation5 + $0x2] sm:$0x1] %vm129_vm1, %v1417_v33  ;;  %s3581_s5 = sld [smem:[#allocation30_spill]] }
 0x57b   :  { %v1459_v32 = vld [vmem:[%s1458_s22] sm:$0x1]  ;;  %v1447_v35 = vadd.f32 %v1446_v30, %v1443_v27 }
 0x57c   :  { %v1433_v34 = vld [vmem:[%s1432_s13] sm:$0x1]  ;;  %v1460_v36 = vadd.f32 %v1459_v32, %v1455_v28  ;;  %v2567_v32 = vld [vmem:[%s3577_s7 + $0x6] ss:$0 sm:$0xff] }
 0x57d   :  { %v1472_v7 = vld [vmem:[%s1471_s9] sm:$0x1]  ;;  %v1434_v37 = vadd.f32 %v1433_v34, %v1430_v29  ;;  %s3578_s9 = sld [smem:[#allocation25_spill]] }
 0x57e   :  { %v1450_v38 = vld [vmem:[%s1449_s0] sm:$0x1] }
 0x57f   :  { %v1463_v39 = vld [vmem:[%s1462_s4] sm:$0x1]  ;;  %v1451_v44 = vadd.f32 %v1450_v38, %v1447_v35  ;;  %1435 = vst.msk [vmem:[#allocation5 + $0x3] sm:$0x1] %vm129_vm1, %v1434_v37  ;;  %v2568_v35 = vld [vmem:[%s3577_s7 + $0x7] ss:$0 sm:$0xff] }
 0x580   :  { %v1476_v41 = vld [vmem:[%s1475_s12] sm:$0x1]  ;;  %v1464_v45 = vadd.f32 %v1463_v39, %v1460_v36 }
 0x581   :  { %v1477_v42 = vadd.f32 %v1476_v41, %v1472_v7  ;;  %v1489_v46 = vld [vmem:[%s1488_s25] sm:$0x1]  ;;  %1452 = vst.msk [vmem:[#allocation5 + $0x4] sm:$0x1] %vm129_vm1, %v1451_v44 }
 0x582   :  { %v1493_v40 = vld [vmem:[%s1492_s20] sm:$0x1] }
 0x583   :  { %v1467_v47 = vld [vmem:[%s1466_s29] sm:$0x1]  ;;  %v1494_v49 = vadd.f32 %v1493_v40, %v1489_v46 }
 0x584   :  { %v1480_v48 = vld [vmem:[%s1479_s14] sm:$0x1]  ;;  %v1468_v50 = vadd.f32 %v1467_v47, %v1464_v45 }
 0x585   :  { %v1481_v51 = vadd.f32 %v1480_v48, %v1477_v42  ;;  %v1497_v52 = vld [vmem:[%s1496_s8] sm:$0x1]  ;;  %s3583_s8 = sld [smem:[#allocation32_spill]] }
 0x586   :  { %v1484_v53 = vld [vmem:[%s1483_s2] sm:$0x1]  ;;  %v1498_v54 = vadd.f32 %v1497_v52, %v1494_v49  ;;  %1469 = vst.msk [vmem:[#allocation5 + $0x5] sm:$0x1] %vm129_vm1, %v1468_v50  ;;  %s2653_s2 = smov [#allocation11]  }
 0x587   :  { %v1485_v55 = vadd.f32 %v1484_v53, %v1481_v51  ;;  %v1501_v56 = vld [vmem:[%s1500_s28] sm:$0x1]  ;;  %s1975_s28 = sshll.u32 %s2653_s2, 4  ;;  %s1976_s28 = int_to_ptr.vmem [resolvable:$true] %s1975_s28 }
 0x588   :  { %v1502_v58 = vadd.f32 %v1501_v56, %v1498_v54  ;;  %v2535_v20 = vld [vmem:[%s3576_s21 + $0x60] sm:$0xff] }
 0x589   :  { %1486 = vst.msk [vmem:[#allocation5 + $0x6] sm:$0x1] %vm129_vm1, %v1485_v55  ;;  %v1681_v47 = vld [vmem:[%s3578_s9] sm:$0x1] }
 0x58a   :  { %1503 = vst.msk [vmem:[#allocation5 + $0x7] sm:$0x1] %vm129_vm1, %v1502_v58 }
 0x591   :  { %v1504_v57 = vld [vmem:[#allocation5] sm:$0xff] }
 0x592   :  { %v1506_v59 = vpack.c.bf16 %v1504_v57, %v1504_v57 }
 0x594   :  { %2422 = vmatmul.msk.bf16.vlgmr.msra.gmra.mxu2 %vm71_vm0, %v1506_v59  ;;  %v1704_v43 = vsel %vm1687_vm8, %v1506_v59, 0 }
 0x595   :  { %1713 = vmatpush.bf16.msrb.mxu2 %v1704_v43 }
 0x5a4   :  { %2450 = vmatmul.msk.bf16.vlgmr.msrb.gmra.mxu2 %vm1683_vm11, %v1681_v47 }
 0x617   :  { %v1531_v60 = vpop.f32.mrf.mxu2 }
 0x618   :  { %v1560_v62 = vadd.f32 %v3203_v31, %v1531_v60  ;;  %v2537_v31 = vld [vmem:[%s3576_s21 + $0x70] sm:$0xff]  ;;  %s3584_s21 = sld [smem:[#allocation33_spill]] }
 0x619   :  { %1634 = vmatpush.bf16.msra.mxu0 %v2537_v31  ;;  %v2570_v31 = vld [vmem:[%s3580_s10 + $0x7] ss:$0 sm:$0xff] }
 0x61a   :  { %v1563_v1 = vsel %vm373_vm2, %v1560_v62, 0.0  ;;  %v1570_v2 = vmul.f32 %v1560_v62, %v1560_v62 }
 0x61b   :  { %v1564_v3 = vrot.slane %v1563_v1, 4 }
 0x61c   :  { %v1571_v63 = vsel %vm373_vm2, %v1570_v2, 0.0  ;;  %v2542_v2 = vld [vmem:[%s3579_s24 + $0x18] sm:$0xff] }
 0x61d   :  { %v1565_v61 = vadd.f32 %v1564_v3, %v1563_v1  ;;  %v1572_v4 = vrot.slane %v1571_v63, 4  ;;  %1635 = vmatpush.bf16.msra.mxu0 %v2536_v15  ;;  %1758 = vmatpush.bf16.msrb.mxu3 %v2542_v2 }
 0x61e   :  { %s1977_s16 = sshll.u32 %s3584_s21, 4  ;;  %s1978_s16 = int_to_ptr.hbm [resolvable:$true] %s1977_s16 }
 0x61f   :  { %v1566_v6 = vrot.slane %v1565_v61, 2  ;;  %v1573_v8 = vadd.f32 %v1572_v4, %v1571_v63  ;;  %v1533_v9 = vpop.f32.mrf.mxu2 }
 0x620   :  { %v2569_v9 = vld [vmem:[%s3580_s10 + $0x6] ss:$0 sm:$0xff] }
 0x621   :  { %v1567_v10 = vadd.f32 %v1566_v6, %v1565_v61  ;;  %v1574_v11 = vrot.slane %v1573_v8, 2  ;;  %1636 = vmatpush.bf16.msra.mxu0 %v2535_v20 }
 0x623   :  { %v1568_v12 = vrot.slane %v1567_v10, 1  ;;  %v1575_v13 = vadd.f32 %v1574_v11, %v1573_v8 }
 0x625   :  { %v1569_v14 = vadd.f32 %v1568_v12, %v1567_v10  ;;  %v1576_v16 = vrot.slane %v1575_v13, 1 }
 0x627   :  { %v1577_v17 = vadd.f32 %v1576_v16, %v1575_v13  ;;  %v1578_v0 = vmul.f32 0.125, %v1569_v14 }
 0x629   :  { %v1579_v18 = vmul.f32 0.125, %v1577_v17  ;;  %v1580_v19 = vmul.f32 %v1578_v0, %v1578_v0  ;;  %v1583_v30 = vsub.f32 %v1560_v62, %v1578_v0  ;;  %v2541_v17 = vld [vmem:[%s3579_s24 + $0x10] sm:$0xff]  ;;  %v2540_v0 = vld [vmem:[%s3579_s24 + $0x8] sm:$0xff] }
 0x62a   :  { %1759 = vmatpush.bf16.msrb.mxu3 %v2541_v17  ;;  %1786 = vmatpush.bf16.msrb.mxu0 %v2540_v0 }
 0x62b   :  { %v1581_v21 = vsub.f32 %v1579_v18, %v1580_v19  ;;  %v1715_v18 = vpop.f32.mrf.mxu2 }
 0x62c   :  { %v1736_v19 = vpack.c.bf16 %v1715_v18, %v1715_v18 }
 0x62d   :  { %v1582_v22 = vmax.f32 %v1581_v21, 0.0  ;;  %v2539_v21 = vld [vmem:[%s3579_s24] sm:$0xff] }
 0x62e   :  { %2459 = vmatmul.msk.bf16.vlgmr.msrb.gmra.mxu3 %vm71_vm0, %v1736_v19  ;;  %1787 = vmatpush.bf16.msrb.mxu0 %v2539_v21  ;;  %v2549_v19 = vld [vmem:[%s3582_s27 + $0x10] sm:$0xff] }
 0x62f   :  { %v1584_v23 = vadd.f32 1e-05, %v1582_v22 }
 0x631   :  { %2588 = vrsqrt.f32 %v1584_v23  ;;  %vm1591_vm9 = vweird.f32 %v1584_v23 }
 0x633   :  { %v1717_v20 = vpop.f32.mrf.mxu2 }
 0x637   :  { %v2589_v24 = vpop.eup %2588 }
 0x638   :  { %v1586_v25 = vmul.f32 %v2589_v24, %v1584_v23  ;;  %vm1592_vm1 = vweird.f32 %v2589_v24 }
 0x639   :  { %vm1593_vm10 = vmor %vm1591_vm9, %vm1592_vm1 }
 0x63a   :  { %v1587_v26 = vmul.f32 %v2589_v24, %v1586_v25 }
 0x63c   :  { %v1588_v27 = vmul.f32 0.5, %v1587_v26 }
 0x63e   :  { %v1589_v28 = vsub.f32 1.5, %v1588_v27 }
 0x640   :  { %v1590_v29 = vmul.f32 %v2589_v24, %v1589_v28 }
 0x642   :  { %v1594_v33 = vsel %vm1593_vm10, %v2589_v24, %v1590_v29 }
 0x643   :  { %v1595_v34 = vmul.f32 %v1594_v33, %v1583_v30 }
 0x645   :  { %v1597_v36 = vmul.f32 %v2567_v32, %v1595_v34 }
 0x647   :  { %v1599_v7 = vadd.f32 %v2568_v35, %v1597_v36  ;;  %v2546_v36 = vld [vmem:[%s3579_s24 + $0x38] sm:$0xff] }
 0x649   :  { %v1600_v37 = vmax.f32 %v1599_v7, 0.0 }
 0x64b   :  { %v1601_v38 = vpack.c.bf16 %v1600_v37, %v1600_v37 }
 0x64d   :  { %2448 = vmatmul.msk.bf16.vlgmr.msra.gmra.mxu0 %vm373_vm2, %v1601_v38 }
 0x6b1   :  { %v1761_v25 = vpop.f32.mrf.mxu3 }
 0x6b9   :  { %v1763_v26 = vpop.f32.mrf.mxu3 }
 0x6ca   :  { %v1638_v39 = vpop.f32.mrf.mxu0 }
 0x6cb   :  { %v1642_v41 = vsel %vm71_vm0, %v1638_v39, 0.0  ;;  %v1649_v44 = vmul.f32 %v1638_v39, %v1638_v39 }
 0x6cc   :  { %v1643_v45 = vrot.slane %v1642_v41, 4 }
 0x6cd   :  { %v1650_v42 = vsel %vm71_vm0, %v1649_v44, 0.0  ;;  %v2545_v44 = vld [vmem:[%s3579_s24 + $0x30] sm:$0xff] }
 0x6ce   :  { %v1644_v46 = vadd.f32 %v1643_v45, %v1642_v41  ;;  %v1651_v40 = vrot.slane %v1650_v42, 4 }
 0x6d0   :  { %v1645_v48 = vrot.slane %v1644_v46, 2  ;;  %v1652_v49 = vadd.f32 %v1651_v40, %v1650_v42 }
 0x6d2   :  { %v1646_v50 = vadd.f32 %v1645_v48, %v1644_v46  ;;  %v1653_v51 = vrot.slane %v1652_v49, 2  ;;  %v1640_v52 = vpop.f32.mrf.mxu0 }
 0x6d3   :  { %v2543_v52 = vld [vmem:[%s3579_s24 + $0x20] sm:$0xff] }
 0x6d4   :  { %v1647_v53 = vrot.slane %v1646_v50, 1  ;;  %v1654_v54 = vadd.f32 %v1653_v51, %v1652_v49 }
 0x6d6   :  { %v1648_v55 = vadd.f32 %v1647_v53, %v1646_v50  ;;  %v1655_v56 = vrot.slane %v1654_v54, 1 }
 0x6d8   :  { %v1656_v58 = vadd.f32 %v1655_v56, %v1654_v54  ;;  %v1657_v57 = vmul.f32 0.125, %v1648_v55 }
 0x6da   :  { %v1658_v59 = vmul.f32 0.125, %v1656_v58  ;;  %v1659_v43 = vmul.f32 %v1657_v57, %v1657_v57  ;;  %v1662_v8 = vsub.f32 %v1638_v39, %v1657_v57 }
 0x6dc   :  { %v1660_v60 = vsub.f32 %v1658_v59, %v1659_v43 }
 0x6de   :  { %v1661_v62 = vmax.f32 %v1660_v60, 0.0 }
 0x6e0   :  { %v1663_v1 = vadd.f32 1e-05, %v1661_v62 }
 0x6e2   :  { %2590 = vrsqrt.f32 %v1663_v1  ;;  %vm1670_vm13 = vweird.f32 %v1663_v1 }
 0x6e8   :  { %v2591_v3 = vpop.eup %2590 }
 0x6e9   :  { %v1665_v63 = vmul.f32 %v2591_v3, %v1663_v1  ;;  %vm1671_vm12 = vweird.f32 %v2591_v3  ;;  %v2571_v1 = vld [vmem:[%s3581_s5] ss:$0 sm:$0xff] }
 0x6ea   :  { %vm1672_vm14 = vmor %vm1670_vm13, %vm1671_vm12 }
 0x6eb   :  { %v1666_v61 = vmul.f32 %v2591_v3, %v1665_v63  ;;  %v2572_v63 = vld [vmem:[%s3581_s5 + $0x1] ss:$0 sm:$0xff] }
 0x6ed   :  { %v1667_v4 = vmul.f32 0.5, %v1666_v61 }
 0x6ef   :  { %v1668_v5 = vsub.f32 1.5, %v1667_v4 }
 0x6f1   :  { %v1669_v6 = vmul.f32 %v2591_v3, %v1668_v5 }
 0x6f3   :  { %v1673_v10 = vsel %vm1672_vm14, %v2591_v3, %v1669_v6 }
 0x6f4   :  { %v1674_v11 = vmul.f32 %v1673_v10, %v1662_v8 }
 0x6f6   :  { %v1676_v12 = vmul.f32 %v2569_v9, %v1674_v11 }
 0x6f8   :  { %v1678_v13 = vadd.f32 %v2570_v31, %v1676_v12 }
 0x6fa   :  { %v1679_v14 = vmax.f32 %v1678_v13, 0.0 }
 0x6fc   :  { %1680 = vst.msk [vmem:[#allocation2] sm:$0xff] %vm71_vm0, %v1679_v14  ;;  %v1682_v16 = vpack.c.bf16 %v1679_v14, %v1679_v14  ;;  %v2550_v14 = vld [vmem:[%s3582_s27 + $0x18] sm:$0xff] }
 0x6fd   :  { %1959 = vmatpush.bf16.msra.mxu2 %v2550_v14 }
 0x6fe   :  { %v1689_v15 = vsel %vm1687_vm8, %v1682_v16, 0  ;;  %vm1968_vm8 = vcmask 58368  }
 0x6ff   :  { %1698 = vmatpush.bf16.msrb.mxu1 %v1689_v15 }
 0x701   :  { %1960 = vmatpush.bf16.msra.mxu2 %v2549_v19 }
 0x702   :  { %2449 = vmatmul.msk.bf16.vlgmr.msrb.gmra.mxu1 %vm1683_vm11, %v1681_v47  ;;  %v2544_v47 = vld [vmem:[%s3579_s24 + $0x28] sm:$0xff] }
 0x703   :  { %1866 = vmatpush.bf16.msra.mxu1 %v2546_v36 }
 0x707   :  { %1867 = vmatpush.bf16.msra.mxu1 %v2545_v44 }
 0x70b   :  { %1868 = vmatpush.bf16.msra.mxu1 %v2544_v47 }
 0x70f   :  { %1869 = vmatpush.bf16.msra.mxu1 %v2543_v52 }
 0x77f   :  { %v1700_v22 = vpop.f32.mrf.mxu1 }
 0x780   :  { %v1735_v23 = vpack.c.bf16 %v1700_v22, %v1700_v22 }
 0x782   :  { %2468 = vmatmul.msk.bf16.vlgmr.msrb.gmra.mxu0 %vm71_vm0, %v1735_v23 }
 0x787   :  { %v1702_v24 = vpop.f32.mrf.mxu1 }
 0x788   :  { %v2548_v24 = vld [vmem:[%s3582_s27 + $0x8] sm:$0xff] }
 0x789   :  { %1961 = vmatpush.bf16.msra.mxu2 %v2548_v24 }
 0x7ff   :  { %v1789_v27 = vpop.f32.mrf.mxu0 }
 0x800   :  { %v1790_v28 = vadd.f32 %v1789_v27, %v1761_v25 }
 0x802   :  { %v1796_v29 = vsel %vm1795_vm15, %v1790_v28, 0.0  ;;  %v1803_v30 = vmul.f32 %v1790_v28, %v1790_v28 }
 0x803   :  { %v1797_v32 = vrot.slane %v1796_v29, 4 }
 0x804   :  { %v1804_v33 = vsel %vm1795_vm15, %v1803_v30, 0.0 }
 0x805   :  { %v1798_v34 = vadd.f32 %v1797_v32, %v1796_v29  ;;  %v1805_v35 = vrot.slane %v1804_v33, 4  ;;  %v2547_v29 = vld [vmem:[%s3582_s27] sm:$0xff] }
 0x806   :  { %1962 = vmatpush.bf16.msra.mxu2 %v2547_v29 }
 0x807   :  { %v1799_v7 = vrot.slane %v1798_v34, 2  ;;  %v1806_v37 = vadd.f32 %v1805_v35, %v1804_v33  ;;  %v1791_v38 = vpop.f32.mrf.mxu0 }
 0x809   :  { %v1800_v39 = vadd.f32 %v1799_v7, %v1798_v34  ;;  %v1807_v41 = vrot.slane %v1806_v37, 2 }
 0x80b   :  { %v1801_v45 = vrot.slane %v1800_v39, 1  ;;  %v1808_v42 = vadd.f32 %v1807_v41, %v1806_v37  ;;  %v2573_v41 = vld [vmem:[%s3581_s5 + $0x2] ss:$0 sm:$0xff] }
 0x80d   :  { %v1802_v46 = vadd.f32 %v1801_v45, %v1800_v39  ;;  %v1809_v40 = vrot.slane %v1808_v42, 1 }
 0x80f   :  { %v1810_v48 = vadd.f32 %v1809_v40, %v1808_v42  ;;  %v1811_v49 = vmul.f32 0.5, %v1802_v46  ;;  %v2574_v42 = vld [vmem:[%s3581_s5 + $0x3] ss:$0 sm:$0xff] }
 0x811   :  { %v1812_v50 = vmul.f32 0.5, %v1810_v48  ;;  %v1813_v51 = vmul.f32 %v1811_v49, %v1811_v49  ;;  %v1816_v62 = vsub.f32 %v1790_v28, %v1811_v49  ;;  %v2575_v49 = vld [vmem:[%s3583_s8] ss:$0 sm:$0xff] }
 0x813   :  { %v1814_v53 = vsub.f32 %v1812_v50, %v1813_v51 }
 0x815   :  { %v1815_v54 = vmax.f32 %v1814_v53, 0.0 }
 0x817   :  { %v1817_v55 = vadd.f32 1e-05, %v1815_v54 }
 0x819   :  { %2592 = vrsqrt.f32 %v1817_v55  ;;  %vm1824_vm3 = vweird.f32 %v1817_v55 }
 0x81f   :  { %v2593_v56 = vpop.eup %2592 }
 0x820   :  { %v1819_v58 = vmul.f32 %v2593_v56, %v1817_v55  ;;  %vm1825_vm0 = vweird.f32 %v2593_v56 }
 0x821   :  { %vm1826_vm4 = vmor %vm1824_vm3, %vm1825_vm0 }
 0x822   :  { %v1820_v57 = vmul.f32 %v2593_v56, %v1819_v58 }
 0x824   :  { %v1821_v59 = vmul.f32 0.5, %v1820_v57 }
 0x826   :  { %v1822_v43 = vsub.f32 1.5, %v1821_v59 }
 0x828   :  { %v1823_v60 = vmul.f32 %v2593_v56, %v1822_v43 }
 0x82a   :  { %v1827_v2 = vsel %vm1826_vm4, %v2593_v56, %v1823_v60 }
 0x82b   :  { %v1828_v3 = vmul.f32 %v1827_v2, %v1816_v62 }
 0x82d   :  { %v1830_v61 = vmul.f32 %v2571_v1, %v1828_v3 }
 0x82f   :  { %v1832_v4 = vadd.f32 %v2572_v63, %v1830_v61 }
 0x831   :  { %v1833_v5 = vmax.f32 %v1832_v4, 0.0 }
 0x833   :  { %v1834_v6 = vpack.c.bf16 %v1833_v5, %v1833_v5 }
 0x835   :  { %2485 = vmatmul.msk.bf16.vlgmr.msra.gmra.mxu1 %vm373_vm2, %v1834_v6 }
 0x8b2   :  { %v1871_v8 = vpop.f32.mrf.mxu1 }
 0x8b3   :  { %v1877_v9 = vsel %vm1795_vm15, %v1871_v8, 0.0  ;;  %v1884_v10 = vmul.f32 %v1871_v8, %v1871_v8 }
 0x8b4   :  { %v1878_v11 = vrot.slane %v1877_v9, 4 }
 0x8b5   :  { %v1885_v31 = vsel %vm1795_vm15, %v1884_v10, 0.0 }
 0x8b6   :  { %v1879_v12 = vadd.f32 %v1878_v11, %v1877_v9  ;;  %v1886_v13 = vrot.slane %v1885_v31, 4 }
 0x8b8   :  { %v1880_v16 = vrot.slane %v1879_v12, 2  ;;  %v1887_v15 = vadd.f32 %v1886_v13, %v1885_v31 }
 0x8ba   :  { %v1881_v17 = vadd.f32 %v1880_v16, %v1879_v12  ;;  %v1888_v0 = vrot.slane %v1887_v15, 2  ;;  %v1873_v18 = vpop.f32.mrf.mxu1 }
 0x8bc   :  { %v1882_v20 = vrot.slane %v1881_v17, 1  ;;  %v1889_v21 = vadd.f32 %v1888_v0, %v1887_v15 }
 0x8be   :  { %v1883_v22 = vadd.f32 %v1882_v20, %v1881_v17  ;;  %v1890_v23 = vrot.slane %v1889_v21, 1 }
 0x8c0   :  { %v1891_v25 = vadd.f32 %v1890_v23, %v1889_v21  ;;  %v1892_v26 = vmul.f32 0.5, %v1883_v22 }
 0x8c2   :  { %v1893_v27 = vmul.f32 0.5, %v1891_v25  ;;  %v1894_v28 = vmul.f32 %v1892_v26, %v1892_v26  ;;  %v1897_v39 = vsub.f32 %v1871_v8, %v1892_v26 }
 0x8c4   :  { %v1895_v30 = vsub.f32 %v1893_v27, %v1894_v28 }
 0x8c6   :  { %v1896_v32 = vmax.f32 %v1895_v30, 0.0 }
 0x8c8   :  { %v1898_v33 = vadd.f32 1e-05, %v1896_v32 }
 0x8ca   :  { %2594 = vrsqrt.f32 %v1898_v33  ;;  %vm1905_vm6 = vweird.f32 %v1898_v33 }
 0x8d0   :  { %v2595_v34 = vpop.eup %2594 }
 0x8d1   :  { %v1900_v35 = vmul.f32 %v2595_v34, %v1898_v33  ;;  %vm1906_vm5 = vweird.f32 %v2595_v34 }
 0x8d2   :  { %vm1907_vm7 = vmor %vm1905_vm6, %vm1906_vm5 }
 0x8d3   :  { %v1901_v36 = vmul.f32 %v2595_v34, %v1900_v35 }
 0x8d5   :  { %v1902_v7 = vmul.f32 0.5, %v1901_v36 }
 0x8d7   :  { %v1903_v37 = vsub.f32 1.5, %v1902_v7 }
 0x8d9   :  { %v1904_v38 = vmul.f32 %v2595_v34, %v1903_v37 }
 0x8db   :  { %v1908_v44 = vsel %vm1907_vm7, %v2595_v34, %v1904_v38 }
 0x8dc   :  { %v1909_v45 = vmul.f32 %v1908_v44, %v1897_v39 }
 0x8de   :  { %v1911_v46 = vmul.f32 %v2573_v41, %v1909_v45 }
 0x8e0   :  { %v1913_v40 = vadd.f32 %v2574_v42, %v1911_v46 }
 0x8e2   :  { %v1914_v47 = vmax.f32 %v1913_v40, 0.0 }
 0x8e4   :  { %v1923_v48 = vpack.c.bf16 %v1914_v47, %v1914_v47 }
 0x8e6   :  { %2502 = vmatmul.msk.bf16.vlgmr.msra.gmra.mxu2 %vm373_vm2, %v1923_v48 }
 0x969   :  { %v1964_v50 = vpop.f32.mrf.mxu2 }
 0x96a   :  { %v1965_v51 = vadd.f32 %v2575_v49, %v1964_v50 }
 0x96c   :  { %1969 = vst.msk [vmem:[#allocation11] sm:$0x3] %vm1968_vm8, %v1965_v51 }
 0x96d   :  { %1980 = dma.vmem_to_hbm [thread:$0]  %s1976_s28, 32, %s1978_s16, [#allocation7]  }
 0x971   :  { %v1966_v52 = vpop.f32.mrf.mxu2 }
 0x972   :  { %2648 = dma.done.wait [#allocation7], 32  }
 0x973   :  { %2649 = vsyncadd [#allocation7], 4294967264 }
 0x974   :  { %1985 = vsyncpa [#allocation7], 1 }
 0x975   :  { %1986 = vsyncpa [#allocation8], 1 }
 0x976   :  { %1987 = vsyncpa [#allocation10], 1 }

</bundles_post_ra>
